<compile_context>
chip_gen: v6e
topology: v6e:2x2x1
jax: 0.10.0
libtpu: 0.0.40
codegen_flags: <defaults>
</compile_context>

<pallas_src>
import functools

import numpy as np
import jax
import jax.numpy as jnp
from jax.experimental import pallas as pl
from jax.experimental.pallas import tpu as pltpu

# ----------------------------- model config ---------------------------------
EMBED = 32          # embed_size
HEADS = 4
HEAD_DIM = EMBED // HEADS
T_LEN = 8           # t_len
N_SENSORS = 16
N_REGIONS = 8
FWD_EXP = 4
LN_EPS = 1e-5

_NEG = -40.0   # additive penalty: kills cross-time entries after exp (~1e-16)
_FILL = 10.0   # pushes adjacency-masked entries to the +5 clamp -> exp(5) fill


# --------------------------- fused Pallas kernel ------------------------------
def _st_fused_kernel(offs, T, H, C, add_ds_q,
                     value_ref, key_ref, query_ref, slab_ref,
                     m1_ref, m2_ref, m3_ref, out_ref):
    """Whole STransformer forward (3 attentions + LN/FFN/LN/fs), gridless."""
    f32 = jnp.float32

    def sl(name):                                   # static slab slice (free)
        off, r, c = offs[name]
        return slab_ref[off:off + r, :c]

    hm = sl('hm')          # (H, C)   head channel mask
    hm2 = sl('hm2')        # (H, 2C)  [hm | hm] for the value+ones augmentation
    dsf = sl('d_s')        # (Ns*T, C) embedded sensor distances, n-major rows

    def core_attn(qp, kp, vp_aug, m_add, wo, bo):
        """qp: (Rq,C) scaled queries; kp: (Rk,C); vp_aug: (Rk,2C)=[v|1]."""
        Rk = kp.shape[0]
        # Head-stacked, head-masked key / value operands (broadcast, no concat).
        k_stack = (kp[None, :, :] * hm[:, None, :]).reshape(H * Rk, C)
        v_stack = (vp_aug[None, :, :] * hm2[:, None, :]).reshape(H * Rk, 2 * C)
        # One flattened energy matmul for all heads and all time steps.
        energy = jax.lax.dot_general(qp, k_stack, (((1,), (1,)), ((), ())),
                                     preferred_element_type=f32)     # (Rq, H*Rk)
        # clamp(-5,5); +10 fill saturates masked entries to exp(5); -40 kills
        # cross-time entries (exp <= e^-35).
        e = jnp.exp(jnp.minimum(jnp.clip(energy, -5.0, 5.0) + m_add, 5.0))
        # One matmul yields [head-packed numerator | per-head denominator
        # already broadcast to the head's channels].
        o_aug = jnp.dot(e, v_stack, preferred_element_type=f32)      # (Rq, 2C)
        o = o_aug[:, :C] * pl.reciprocal(o_aug[:, C:], approx=True)
        return jnp.dot(o, wo, preferred_element_type=f32) + bo

    # ---- layer 1: att_sr  (query = learned I, keys = key + D_S, values = value)
    k3 = key_ref[...] + dsf
    kp1 = jnp.dot(k3, sl('wk1'), preferred_element_type=f32)
    vp1 = jnp.dot(value_ref[...], sl('wv1_aug'),
                  preferred_element_type=f32) + sl('aug_b')
    h1 = core_attn(sl('qI'), kp1, vp1, m1_ref[...], sl('wo1'), sl('bo1'))

    # ---- layer 2: att_rr  (q = k = v = h1), fused QKV projection
    y2 = jnp.dot(h1, sl('w_rr_all'), preferred_element_type=f32) + sl('b_rr_all')
    h2 = core_attn(y2[:, :C], y2[:, C:2 * C], y2[:, 2 * C:],
                   m2_ref[...], sl('wo2'), sl('bo2'))

    # ---- layer 3: att_rs  (query = query (+ D_S), keys = values = h2)
    q3 = query_ref[...] + dsf if add_ds_q else query_ref[...]
    qp3 = jnp.dot(q3, sl('wq3'), preferred_element_type=f32)
    y3 = jnp.dot(h2, sl('w_rs_kv'), preferred_element_type=f32) + sl('b_rs_kv')
    att = core_attn(qp3, y3[:, :C], y3[:, C:], m3_ref[...], sl('wo3'), sl('bo3'))

    # ---- residual + norm1 + FFN + norm2 + fs (dropout = identity, eval mode)
    def layer_norm(y, g, b):
        mu = jnp.mean(y, axis=-1, keepdims=True)
        yc = y - mu
        var = jnp.mean(yc * yc, axis=-1, keepdims=True)
        return yc * jax.lax.rsqrt(var + LN_EPS) * g + b

    x = att + q3
    x1 = layer_norm(x, sl('g1'), sl('be1'))
    hdn = jnp.maximum(
        jnp.dot(x1, sl('w1'), preferred_element_type=f32) + sl('b1'), 0.0)
    ffn = jnp.dot(hdn, sl('w2'), preferred_element_type=f32) + sl('b2')
    u = layer_norm(ffn + x1, sl('g2'), sl('be2'))
    out_ref[...] = jnp.dot(u, sl('wfs'), preferred_element_type=f32) + sl('bfs')


# ------------------------------ param packing --------------------------------
def pack_params(p):
    """One-time numpy packing of all parameters into kernel-ready constants."""
    H = int(p['heads'])
    C = int(np.asarray(p['g1']).shape[0])
    hd = C // H
    scale = 1.0 / np.sqrt(C)
    I = np.asarray(p['I'], np.float32)
    Nr, T, _ = I.shape
    adj_sr = np.asarray(p['adj_sr'], np.float32)             # (Ns, Nr)
    adj_r = np.asarray(p['adj_r'], np.float32)               # (Nr, Nr)
    Ns = adj_sr.shape[0]

    def block_diag(w):          # per-head (hd,hd) torch weight -> (C,C), x @ out
        w = np.asarray(w, np.float32)
        out = np.zeros((C, C), np.float32)
        for h in range(H):
            out[h * hd:(h + 1) * hd, h * hd:(h + 1) * hd] = w.T
        return out

    def lin_t(w):
        return np.asarray(w, np.float32).T

    def row(b):
        return np.asarray(b, np.float32).reshape(1, -1)

    # D_S embedding, expanded to n-major rows (row = s*T + t).
    d_s = (np.asarray(p['D_S'], np.float32) @ lin_t(p['embed_w'])
           + np.asarray(p['embed_b'], np.float32))            # (Ns, C)
    d_s_full = np.repeat(d_s, T, axis=0)                      # (Ns*T, C)

    I_flat = I.reshape(Nr * T, C)
    zc = np.zeros((C, C), np.float32)

    a1, a2, a3 = p['att_sr'], p['att_rr'], p['att_rs']
    qI = (I_flat @ block_diag(a1['wq'])) * scale              # query proj of I
    wk1 = block_diag(a1['wk'])
    wv1_aug = np.concatenate([block_diag(a1['wv']), zc], axis=1)        # (C,2C)
    w_rr_all = np.concatenate([block_diag(a2['wq']) * scale, block_diag(a2['wk']),
                               block_diag(a2['wv']), zc], axis=1)       # (C,4C)
    b_rr_all = np.concatenate([np.zeros((1, 3 * C), np.float32),
                               np.ones((1, C), np.float32)], axis=1)
    wq3 = block_diag(a3['wq']) * scale
    w_rs_kv = np.concatenate([block_diag(a3['wk']), block_diag(a3['wv']), zc],
                             axis=1)                                    # (C,3C)
    b_rs_kv = np.concatenate([np.zeros((1, 2 * C), np.float32),
                              np.ones((1, C), np.float32)], axis=1)
    aug_b = np.concatenate([np.zeros((1, C), np.float32),
                            np.ones((1, C), np.float32)], axis=1)

    hm = np.zeros((H, C), np.float32)
    for h in range(H):
        hm[h, h * hd:(h + 1) * hd] = 1.0
    hm2 = np.concatenate([hm, hm], axis=1)

    arrays = dict(
        d_s=d_s_full, qI=qI,
        wk1=wk1, wv1_aug=wv1_aug, wo1=lin_t(a1['wo']), bo1=row(a1['bo']),
        w_rr_all=w_rr_all, b_rr_all=b_rr_all, wo2=lin_t(a2['wo']), bo2=row(a2['bo']),
        wq3=wq3, w_rs_kv=w_rs_kv, b_rs_kv=b_rs_kv, wo3=lin_t(a3['wo']),
        bo3=row(a3['bo']), aug_b=aug_b, hm=hm, hm2=hm2,
        g1=row(p['g1']), be1=row(p['be1']),
        w1=lin_t(p['w1']), b1=row(p['b1']),
        w2=lin_t(p['w2']), b2=row(p['b2']),
        g2=row(p['g2']), be2=row(p['be2']),
        wfs=lin_t(p['wfs']), bfs=row(p['bfs']),
    )

    # Pack everything into ONE (rows, 128) f32 slab (8-row aligned entries).
    offs, blocks, cur = {}, [], 0
    for name, arr in arrays.items():
        arr = np.asarray(arr, np.float32)
        r, c = arr.shape
        rp = r + (-r % 8)
        blk = np.zeros((rp, 128), np.float32)
        blk[:r, :c] = arr
        blocks.append(blk)
        offs[name] = (cur, r, c)
        cur += rp
    slab = np.concatenate(blocks, axis=0)

    # Additive softmax masks, flattened over time and heads.
    # rows: query rows (n*T + t_q); cols: h*(nk*T) + k*T + t_k.
    def build_mask(nq, nk, adj):
        rq, cols = nq * T, H * nk * T
        tq = np.arange(rq) % T
        tk = np.arange(cols) % T
        valid = (tq[:, None] == tk[None, :])
        m = np.where(valid, 0.0, _NEG).astype(np.float32)
        if adj is not None:
            qn = np.arange(rq) // T
            kn = (np.arange(cols) // T) % nk
            masked = (np.asarray(adj, np.float32)[qn][:, kn] == 0.0)
            m = m + np.where(valid & masked, _FILL, 0.0).astype(np.float32)
        return m

    masks = dict(
        m1=build_mask(Nr, Ns, adj_sr.T),     # att_sr mask = adj_sr.T
        m2=build_mask(Nr, Nr, adj_r),        # att_rr mask = adj_r
        m3=build_mask(Ns, Nr, None),         # att_rs, adj_rs=None (time only)
        m1_nomask=build_mask(Nr, Ns, None),
        m2_nomask=build_mask(Nr, Nr, None),
    )
    meta = dict(T=T, H=H, C=C, Ns=Ns, Nr=Nr)
    return slab, offs, masks, meta


# ------------------------------ forward factory -------------------------------
def make_stransformer(params):
    slab_np, offs, masks_np, meta = pack_params(params)
    T, H, C = meta['T'], meta['H'], meta['C']
    Ns, Nr = meta['Ns'], meta['Nr']
    slab = jnp.asarray(slab_np)
    masks = {k: jnp.asarray(v) for k, v in masks_np.items()}

    @functools.partial(jax.jit, static_argnames=('mask',))
    def forward(value, key, query, d=None, adj_rs=None, mask=True):
        # TODO(synk): forward input `d` is unused by the reference module.
        Nq, Tq, Cq = query.shape
        Nk = key.shape[0]
        if Nq != Ns or Nk != Ns or Tq != T or Cq != C:
            # TODO(synk): decoder-style shapes (Nq != sensors) not supported here.
            raise NotImplementedError("fused kernel packed for the encoder shapes")

        v_flat = value.reshape(Nk * T, C).astype(jnp.float32)
        k_flat = key.reshape(Nk * T, C).astype(jnp.float32)
        q_flat = query.reshape(Nq * T, C).astype(jnp.float32)

        if mask:
            m1, m2 = masks['m1'], masks['m2']
        else:
            m1, m2 = masks['m1_nomask'], masks['m2_nomask']
        if adj_rs is None or not mask:
            m3 = masks['m3']
        else:
            adj3 = jnp.asarray(adj_rs, jnp.float32).T                   # (Nq, Nr)
            fill = _FILL * (adj3 == 0.0).astype(jnp.float32)
            fill = jnp.repeat(jnp.repeat(fill, T, axis=0), T, axis=1)
            m3 = masks['m3'] + jnp.tile(fill, (1, H))

        kern = functools.partial(_st_fused_kernel, offs, T, H, C, Nq == Nk)
        out = pl.pallas_call(
            kern,
            out_shape=jax.ShapeDtypeStruct((Nq * T, C), jnp.float32),
            in_specs=[pl.BlockSpec(memory_space=pltpu.MemorySpace.VMEM)] * 7,
            out_specs=pl.BlockSpec(memory_space=pltpu.MemorySpace.VMEM),
        )(v_flat, k_flat, q_flat, slab, m1, m2, m3)
        return out.reshape(Nq, T, C)        # free row-major reshape, no launch

    return forward


# ------------------------- pure-JAX reference --------------------------------
def _ref_attention(values, keys, query, p, heads, mask=None):
    Nq, Tq, C = query.shape
    dh = C // heads

    def proj(x, w):
        x4 = x.reshape(x.shape[0], x.shape[1], heads, dh)
        return jnp.einsum('nthd,ed->nthe', x4, w)

    v = proj(values, p['wv'])
    k = proj(keys, p['wk'])
    q = proj(query, p['wq'])
    energy = jnp.einsum('qthd,kthd->qkth', q, k)
    if mask is not None:
        energy = energy * mask[:, :, None, None]
        energy = jnp.where((mask == 0)[:, :, None, None], 1e6, energy)
    att = jax.nn.softmax(jnp.clip(energy / (C ** 0.5), -5.0, 5.0), axis=1)
    out = jnp.einsum('qkth,kthd->qthd', att, v).reshape(Nq, Tq, C)
    return out @ p['wo'].T + p['bo']


def _ref_forward(params, value, key, query, adj_rs=None, mask=True):
    Nq, T, C = query.shape
    Nk = key.shape[0]
    heads = params['heads']
    d_s = params['D_S'] @ params['embed_w'].T + params['embed_b']
    q = query + d_s[:, None, :] if Nq == Nk else query
    k = key + d_s[:, None, :]
    if mask:
        Hh = _ref_attention(value, k, params['I'], params['att_sr'], heads,
                            mask=params['adj_sr'].T)
        Hh = _ref_attention(Hh, Hh, Hh, params['att_rr'], heads, mask=params['adj_r'])
        attn = _ref_attention(Hh, Hh, q, params['att_rs'], heads,
                              mask=None if adj_rs is None else adj_rs.T)
    else:
        Hh = _ref_attention(value, k, params['I'], params['att_sr'], heads)
        Hh = _ref_attention(Hh, Hh, Hh, params['att_rr'], heads)
        attn = _ref_attention(Hh, Hh, q, params['att_rs'], heads)

    def ln(x, g, b):
        mu = x.mean(-1, keepdims=True)
        var = ((x - mu) ** 2).mean(-1, keepdims=True)
        return (x - mu) / jnp.sqrt(var + LN_EPS) * g + b

    x = ln(attn + q, params['g1'], params['be1'])
    fwd = jnp.maximum(x @ params['w1'].T + params['b1'], 0.0) @ params['w2'].T + params['b2']
    u = ln(fwd + x, params['g2'], params['be2'])
    return u @ params['wfs'].T + params['bfs']


# ---------------------------- init & main -------------------------------------
def init_params(key):
    keys = jax.random.split(key, 40)
    ki = iter(keys)

    def lin_w(out_f, in_f):
        bound = 1.0 / np.sqrt(in_f)
        return jax.random.uniform(next(ki), (out_f, in_f), jnp.float32, -bound, bound)

    def lin_b(out_f, in_f):
        bound = 1.0 / np.sqrt(in_f)
        return jax.random.uniform(next(ki), (out_f,), jnp.float32, -bound, bound)

    def attn_params():
        return dict(
            wv=lin_w(HEAD_DIM, HEAD_DIM),
            wk=lin_w(HEAD_DIM, HEAD_DIM),
            wq=lin_w(HEAD_DIM, HEAD_DIM),
            wo=lin_w(EMBED, EMBED),
            bo=lin_b(EMBED, EMBED),
        )

    sensor_dist = jax.random.uniform(next(ki), (N_SENSORS,), jnp.float32, 0.0, 1.0)
    xavier = np.sqrt(2.0 / (N_REGIONS * T_LEN + EMBED))
    params = dict(
        heads=HEADS,
        D_S=sensor_dist[:, None],
        embed_w=lin_w(EMBED, 1),
        embed_b=lin_b(EMBED, 1),
        I=jax.random.normal(next(ki), (N_REGIONS, T_LEN, EMBED), jnp.float32) * xavier,
        att_sr=attn_params(),
        att_rr=attn_params(),
        att_rs=attn_params(),
        g1=jnp.ones((EMBED,), jnp.float32),
        be1=jnp.zeros((EMBED,), jnp.float32),
        g2=jnp.ones((EMBED,), jnp.float32),
        be2=jnp.zeros((EMBED,), jnp.float32),
        w1=lin_w(FWD_EXP * EMBED, EMBED),
        b1=lin_b(FWD_EXP * EMBED, EMBED),
        w2=lin_w(EMBED, FWD_EXP * EMBED),
        b2=lin_b(EMBED, FWD_EXP * EMBED),
        wfs=lin_w(EMBED, EMBED),
        bfs=lin_b(EMBED, EMBED),
        adj_r=(jax.random.uniform(next(ki), (N_REGIONS, N_REGIONS)) > 0.4).astype(jnp.float32),
        adj_sr=(jax.random.uniform(next(ki), (N_SENSORS, N_REGIONS)) > 0.4).astype(jnp.float32),
    )
    return params


if __name__ == "__main__":
    root = jax.random.PRNGKey(0)
    pkey, dkey = jax.random.split(root)
    params = init_params(pkey)
    forward = make_stransformer(params)       # one-time numpy packing / caching

    dk1, dk2, dk3 = jax.random.split(dkey, 3)
    value = jax.random.normal(dk1, (N_SENSORS, T_LEN, EMBED), jnp.float32)
    key_x = jax.random.normal(dk2, (N_SENSORS, T_LEN, EMBED), jnp.float32)
    query = jax.random.normal(dk3, (N_SENSORS, T_LEN, EMBED), jnp.float32)

    out = jax.block_until_ready(
        forward(value, key_x, query, d=None, adj_rs=None, mask=True))

    ref = jax.block_until_ready(
        _ref_forward(params, value, key_x, query, adj_rs=None, mask=True))
    np.testing.assert_allclose(np.asarray(out), np.asarray(ref),
                               rtol=2e-2, atol=2e-2)
    assert out.shape == (N_SENSORS, T_LEN, EMBED)
    print("KERNEL_OK")
</pallas_src>

<mosaic_0001>
module attributes {stable_mosaic.version = 11 : i64} {
  func.func @_st_fused_kernel(%arg0: memref<128x32xf32, #tpu.memory_space<vmem>>, %arg1: memref<128x32xf32, #tpu.memory_space<vmem>>, %arg2: memref<128x32xf32, #tpu.memory_space<vmem>>, %arg3: memref<760x128xf32, #tpu.memory_space<vmem>>, %arg4: memref<64x512xf32, #tpu.memory_space<vmem>>, %arg5: memref<64x256xf32, #tpu.memory_space<vmem>>, %arg6: memref<128x256xf32, #tpu.memory_space<vmem>>, %arg7: memref<128x32xf32, #tpu.memory_space<vmem>>) attributes {dimension_semantics = [], scalar_prefetch = 0 : i64, scratch_operands = 0 : i64, tpu.core_type = #tpu.core_type<tc>} {
    %c496 = arith.constant 496 : index
    %c0 = arith.constant 0 : index
    %0 = vector.load %arg3[%c496, %c0] : memref<760x128xf32, #tpu.memory_space<vmem>>, vector<4x32xf32>
    %c504 = arith.constant 504 : index
    %c0_0 = arith.constant 0 : index
    %1 = vector.load %arg3[%c504, %c0_0] : memref<760x128xf32, #tpu.memory_space<vmem>>, vector<4x64xf32>
    %c0_1 = arith.constant 0 : index
    %c0_2 = arith.constant 0 : index
    %2 = vector.load %arg3[%c0_1, %c0_2] : memref<760x128xf32, #tpu.memory_space<vmem>>, vector<128x32xf32>
    %c0_3 = arith.constant 0 : index
    %c0_4 = arith.constant 0 : index
    %3 = vector.load %arg1[%c0_3, %c0_4] : memref<128x32xf32, #tpu.memory_space<vmem>>, vector<128x32xf32>
    %4 = arith.addf %3, %2 : vector<128x32xf32>
    %c192 = arith.constant 192 : index
    %c0_5 = arith.constant 0 : index
    %5 = vector.load %arg3[%c192, %c0_5] : memref<760x128xf32, #tpu.memory_space<vmem>>, vector<32x32xf32>
    %cst = arith.constant dense<0.000000e+00> : vector<128x32xf32>
    %6 = tpu.matmul %4, %5, %cst {dimension_numbers = #tpu.dot_dimension_numbers<[1], [0], [0], [1], [0, 0, 1, 1], [], []>} : vector<128x32xf32>, vector<32x32xf32>, vector<128x32xf32> -> vector<128x32xf32>
    %c0_6 = arith.constant 0 : index
    %c0_7 = arith.constant 0 : index
    %7 = vector.load %arg0[%c0_6, %c0_7] : memref<128x32xf32, #tpu.memory_space<vmem>>, vector<128x32xf32>
    %c224 = arith.constant 224 : index
    %c0_8 = arith.constant 0 : index
    %8 = vector.load %arg3[%c224, %c0_8] : memref<760x128xf32, #tpu.memory_space<vmem>>, vector<32x64xf32>
    %cst_9 = arith.constant dense<0.000000e+00> : vector<128x64xf32>
    %9 = tpu.matmul %7, %8, %cst_9 {dimension_numbers = #tpu.dot_dimension_numbers<[1], [0], [0], [1], [0, 0, 1, 1], [], []>} : vector<128x32xf32>, vector<32x64xf32>, vector<128x64xf32> -> vector<128x64xf32>
    %c488 = arith.constant 488 : index
    %c0_10 = arith.constant 0 : index
    %10 = vector.load %arg3[%c488, %c0_10] : memref<760x128xf32, #tpu.memory_space<vmem>>, vector<1x64xf32>
    %11 = vector.broadcast %10 : vector<1x64xf32> to vector<128x64xf32>
    %12 = arith.addf %9, %11 : vector<128x64xf32>
    %c128 = arith.constant 128 : index
    %c0_11 = arith.constant 0 : index
    %13 = vector.load %arg3[%c128, %c0_11] : memref<760x128xf32, #tpu.memory_space<vmem>>, vector<64x32xf32>
    %c0_12 = arith.constant 0 : index
    %c0_13 = arith.constant 0 : index
    %14 = vector.load %arg4[%c0_12, %c0_13] : memref<64x512xf32, #tpu.memory_space<vmem>>, vector<64x512xf32>
    %c256 = arith.constant 256 : index
    %c0_14 = arith.constant 0 : index
    %15 = vector.load %arg3[%c256, %c0_14] : memref<760x128xf32, #tpu.memory_space<vmem>>, vector<32x32xf32>
    %c288 = arith.constant 288 : index
    %c0_15 = arith.constant 0 : index
    %16 = vector.load %arg3[%c288, %c0_15] : memref<760x128xf32, #tpu.memory_space<vmem>>, vector<1x32xf32>
    %17 = vector.shape_cast %6 : vector<128x32xf32> to vector<1x128x32xf32>
    %18 = vector.shape_cast %0 : vector<4x32xf32> to vector<4x1x32xf32>
    %19 = vector.broadcast %17 : vector<1x128x32xf32> to vector<4x128x32xf32>
    %20 = vector.broadcast %18 : vector<4x1x32xf32> to vector<4x128x32xf32>
    %21 = arith.mulf %19, %20 : vector<4x128x32xf32>
    %22 = vector.shape_cast %21 : vector<4x128x32xf32> to vector<512x32xf32>
    %23 = vector.shape_cast %12 : vector<128x64xf32> to vector<1x128x64xf32>
    %24 = vector.shape_cast %1 : vector<4x64xf32> to vector<4x1x64xf32>
    %25 = vector.broadcast %23 : vector<1x128x64xf32> to vector<4x128x64xf32>
    %26 = vector.broadcast %24 : vector<4x1x64xf32> to vector<4x128x64xf32>
    %27 = arith.mulf %25, %26 : vector<4x128x64xf32>
    %28 = vector.shape_cast %27 : vector<4x128x64xf32> to vector<512x64xf32>
    %cst_16 = arith.constant dense<0.000000e+00> : vector<64x512xf32>
    %29 = tpu.matmul %13, %22, %cst_16 {dimension_numbers = #tpu.dot_dimension_numbers<[1], [1], [0], [0], [0, 0, 1, 0], [], []>} : vector<64x32xf32>, vector<512x32xf32>, vector<64x512xf32> -> vector<64x512xf32>
    %cst_17 = arith.constant -5.000000e+00 : f32
    %cst_18 = arith.constant 5.000000e+00 : f32
    %30 = vector.broadcast %cst_17 : f32 to vector<64x512xf32>
    %31 = arith.maximumf %30, %29 : vector<64x512xf32>
    %32 = vector.broadcast %cst_18 : f32 to vector<64x512xf32>
    %33 = arith.minimumf %32, %31 : vector<64x512xf32>
    %34 = arith.addf %33, %14 : vector<64x512xf32>
    %cst_19 = arith.constant 5.000000e+00 : f32
    %35 = vector.broadcast %cst_19 : f32 to vector<64x512xf32>
    %36 = arith.minimumf %34, %35 : vector<64x512xf32>
    %37 = math.exp %36 : vector<64x512xf32>
    %cst_20 = arith.constant dense<0.000000e+00> : vector<64x64xf32>
    %38 = tpu.matmul %37, %28, %cst_20 {dimension_numbers = #tpu.dot_dimension_numbers<[1], [0], [0], [1], [0, 0, 1, 1], [], []>} : vector<64x512xf32>, vector<512x64xf32>, vector<64x64xf32> -> vector<64x64xf32>
    %39 = vector.extract_strided_slice %38 {offsets = [0, 0], sizes = [64, 32], strides = [1, 1]} : vector<64x64xf32> to vector<64x32xf32>
    %40 = vector.extract_strided_slice %38 {offsets = [0, 32], sizes = [64, 32], strides = [1, 1]} : vector<64x64xf32> to vector<64x32xf32>
    %41 = tpu.reciprocal %40 {approx = true} : vector<64x32xf32> -> vector<64x32xf32>
    %42 = arith.mulf %39, %41 : vector<64x32xf32>
    %cst_21 = arith.constant dense<0.000000e+00> : vector<64x32xf32>
    %43 = tpu.matmul %42, %15, %cst_21 {dimension_numbers = #tpu.dot_dimension_numbers<[1], [0], [0], [1], [0, 0, 1, 1], [], []>} : vector<64x32xf32>, vector<32x32xf32>, vector<64x32xf32> -> vector<64x32xf32>
    %44 = vector.broadcast %16 : vector<1x32xf32> to vector<64x32xf32>
    %45 = arith.addf %43, %44 : vector<64x32xf32>
    %c296 = arith.constant 296 : index
    %c0_22 = arith.constant 0 : index
    %46 = vector.load %arg3[%c296, %c0_22] : memref<760x128xf32, #tpu.memory_space<vmem>>, vector<32x128xf32>
    %cst_23 = arith.constant dense<0.000000e+00> : vector<64x128xf32>
    %47 = tpu.matmul %45, %46, %cst_23 {dimension_numbers = #tpu.dot_dimension_numbers<[1], [0], [0], [1], [0, 0, 1, 1], [], []>} : vector<64x32xf32>, vector<32x128xf32>, vector<64x128xf32> -> vector<64x128xf32>
    %c328 = arith.constant 328 : index
    %c0_24 = arith.constant 0 : index
    %48 = vector.load %arg3[%c328, %c0_24] : memref<760x128xf32, #tpu.memory_space<vmem>>, vector<1x128xf32>
    %49 = vector.broadcast %48 : vector<1x128xf32> to vector<64x128xf32>
    %50 = arith.addf %47, %49 : vector<64x128xf32>
    %51 = vector.extract_strided_slice %50 {offsets = [0, 0], sizes = [64, 32], strides = [1, 1]} : vector<64x128xf32> to vector<64x32xf32>
    %52 = vector.extract_strided_slice %50 {offsets = [0, 32], sizes = [64, 32], strides = [1, 1]} : vector<64x128xf32> to vector<64x32xf32>
    %53 = vector.extract_strided_slice %50 {offsets = [0, 64], sizes = [64, 64], strides = [1, 1]} : vector<64x128xf32> to vector<64x64xf32>
    %c0_25 = arith.constant 0 : index
    %c0_26 = arith.constant 0 : index
    %54 = vector.load %arg5[%c0_25, %c0_26] : memref<64x256xf32, #tpu.memory_space<vmem>>, vector<64x256xf32>
    %c336 = arith.constant 336 : index
    %c0_27 = arith.constant 0 : index
    %55 = vector.load %arg3[%c336, %c0_27] : memref<760x128xf32, #tpu.memory_space<vmem>>, vector<32x32xf32>
    %c368 = arith.constant 368 : index
    %c0_28 = arith.constant 0 : index
    %56 = vector.load %arg3[%c368, %c0_28] : memref<760x128xf32, #tpu.memory_space<vmem>>, vector<1x32xf32>
    %57 = vector.shape_cast %52 : vector<64x32xf32> to vector<1x64x32xf32>
    %58 = vector.shape_cast %0 : vector<4x32xf32> to vector<4x1x32xf32>
    %59 = vector.broadcast %57 : vector<1x64x32xf32> to vector<4x64x32xf32>
    %60 = vector.broadcast %58 : vector<4x1x32xf32> to vector<4x64x32xf32>
    %61 = arith.mulf %59, %60 : vector<4x64x32xf32>
    %62 = vector.shape_cast %61 : vector<4x64x32xf32> to vector<256x32xf32>
    %63 = vector.shape_cast %53 : vector<64x64xf32> to vector<1x64x64xf32>
    %64 = vector.shape_cast %1 : vector<4x64xf32> to vector<4x1x64xf32>
    %65 = vector.broadcast %63 : vector<1x64x64xf32> to vector<4x64x64xf32>
    %66 = vector.broadcast %64 : vector<4x1x64xf32> to vector<4x64x64xf32>
    %67 = arith.mulf %65, %66 : vector<4x64x64xf32>
    %68 = vector.shape_cast %67 : vector<4x64x64xf32> to vector<256x64xf32>
    %cst_29 = arith.constant dense<0.000000e+00> : vector<64x256xf32>
    %69 = tpu.matmul %51, %62, %cst_29 {dimension_numbers = #tpu.dot_dimension_numbers<[1], [1], [0], [0], [0, 0, 1, 0], [], []>} : vector<64x32xf32>, vector<256x32xf32>, vector<64x256xf32> -> vector<64x256xf32>
    %cst_30 = arith.constant -5.000000e+00 : f32
    %cst_31 = arith.constant 5.000000e+00 : f32
    %70 = vector.broadcast %cst_30 : f32 to vector<64x256xf32>
    %71 = arith.maximumf %70, %69 : vector<64x256xf32>
    %72 = vector.broadcast %cst_31 : f32 to vector<64x256xf32>
    %73 = arith.minimumf %72, %71 : vector<64x256xf32>
    %74 = arith.addf %73, %54 : vector<64x256xf32>
    %cst_32 = arith.constant 5.000000e+00 : f32
    %75 = vector.broadcast %cst_32 : f32 to vector<64x256xf32>
    %76 = arith.minimumf %74, %75 : vector<64x256xf32>
    %77 = math.exp %76 : vector<64x256xf32>
    %cst_33 = arith.constant dense<0.000000e+00> : vector<64x64xf32>
    %78 = tpu.matmul %77, %68, %cst_33 {dimension_numbers = #tpu.dot_dimension_numbers<[1], [0], [0], [1], [0, 0, 1, 1], [], []>} : vector<64x256xf32>, vector<256x64xf32>, vector<64x64xf32> -> vector<64x64xf32>
    %79 = vector.extract_strided_slice %78 {offsets = [0, 0], sizes = [64, 32], strides = [1, 1]} : vector<64x64xf32> to vector<64x32xf32>
    %80 = vector.extract_strided_slice %78 {offsets = [0, 32], sizes = [64, 32], strides = [1, 1]} : vector<64x64xf32> to vector<64x32xf32>
    %81 = tpu.reciprocal %80 {approx = true} : vector<64x32xf32> -> vector<64x32xf32>
    %82 = arith.mulf %79, %81 : vector<64x32xf32>
    %cst_34 = arith.constant dense<0.000000e+00> : vector<64x32xf32>
    %83 = tpu.matmul %82, %55, %cst_34 {dimension_numbers = #tpu.dot_dimension_numbers<[1], [0], [0], [1], [0, 0, 1, 1], [], []>} : vector<64x32xf32>, vector<32x32xf32>, vector<64x32xf32> -> vector<64x32xf32>
    %84 = vector.broadcast %56 : vector<1x32xf32> to vector<64x32xf32>
    %85 = arith.addf %83, %84 : vector<64x32xf32>
    %c0_35 = arith.constant 0 : index
    %c0_36 = arith.constant 0 : index
    %86 = vector.load %arg2[%c0_35, %c0_36] : memref<128x32xf32, #tpu.memory_space<vmem>>, vector<128x32xf32>
    %87 = arith.addf %86, %2 : vector<128x32xf32>
    %c376 = arith.constant 376 : index
    %c0_37 = arith.constant 0 : index
    %88 = vector.load %arg3[%c376, %c0_37] : memref<760x128xf32, #tpu.memory_space<vmem>>, vector<32x32xf32>
    %cst_38 = arith.constant dense<0.000000e+00> : vector<128x32xf32>
    %89 = tpu.matmul %87, %88, %cst_38 {dimension_numbers = #tpu.dot_dimension_numbers<[1], [0], [0], [1], [0, 0, 1, 1], [], []>} : vector<128x32xf32>, vector<32x32xf32>, vector<128x32xf32> -> vector<128x32xf32>
    %c408 = arith.constant 408 : index
    %c0_39 = arith.constant 0 : index
    %90 = vector.load %arg3[%c408, %c0_39] : memref<760x128xf32, #tpu.memory_space<vmem>>, vector<32x96xf32>
    %cst_40 = arith.constant dense<0.000000e+00> : vector<64x96xf32>
    %91 = tpu.matmul %85, %90, %cst_40 {dimension_numbers = #tpu.dot_dimension_numbers<[1], [0], [0], [1], [0, 0, 1, 1], [], []>} : vector<64x32xf32>, vector<32x96xf32>, vector<64x96xf32> -> vector<64x96xf32>
    %c440 = arith.constant 440 : index
    %c0_41 = arith.constant 0 : index
    %92 = vector.load %arg3[%c440, %c0_41] : memref<760x128xf32, #tpu.memory_space<vmem>>, vector<1x96xf32>
    %93 = vector.broadcast %92 : vector<1x96xf32> to vector<64x96xf32>
    %94 = arith.addf %91, %93 : vector<64x96xf32>
    %95 = vector.extract_strided_slice %94 {offsets = [0, 0], sizes = [64, 32], strides = [1, 1]} : vector<64x96xf32> to vector<64x32xf32>
    %96 = vector.extract_strided_slice %94 {offsets = [0, 32], sizes = [64, 64], strides = [1, 1]} : vector<64x96xf32> to vector<64x64xf32>
    %c0_42 = arith.constant 0 : index
    %c0_43 = arith.constant 0 : index
    %97 = vector.load %arg6[%c0_42, %c0_43] : memref<128x256xf32, #tpu.memory_space<vmem>>, vector<128x256xf32>
    %c448 = arith.constant 448 : index
    %c0_44 = arith.constant 0 : index
    %98 = vector.load %arg3[%c448, %c0_44] : memref<760x128xf32, #tpu.memory_space<vmem>>, vector<32x32xf32>
    %c480 = arith.constant 480 : index
    %c0_45 = arith.constant 0 : index
    %99 = vector.load %arg3[%c480, %c0_45] : memref<760x128xf32, #tpu.memory_space<vmem>>, vector<1x32xf32>
    %100 = vector.shape_cast %95 : vector<64x32xf32> to vector<1x64x32xf32>
    %101 = vector.shape_cast %0 : vector<4x32xf32> to vector<4x1x32xf32>
    %102 = vector.broadcast %100 : vector<1x64x32xf32> to vector<4x64x32xf32>
    %103 = vector.broadcast %101 : vector<4x1x32xf32> to vector<4x64x32xf32>
    %104 = arith.mulf %102, %103 : vector<4x64x32xf32>
    %105 = vector.shape_cast %104 : vector<4x64x32xf32> to vector<256x32xf32>
    %106 = vector.shape_cast %96 : vector<64x64xf32> to vector<1x64x64xf32>
    %107 = vector.shape_cast %1 : vector<4x64xf32> to vector<4x1x64xf32>
    %108 = vector.broadcast %106 : vector<1x64x64xf32> to vector<4x64x64xf32>
    %109 = vector.broadcast %107 : vector<4x1x64xf32> to vector<4x64x64xf32>
    %110 = arith.mulf %108, %109 : vector<4x64x64xf32>
    %111 = vector.shape_cast %110 : vector<4x64x64xf32> to vector<256x64xf32>
    %cst_46 = arith.constant dense<0.000000e+00> : vector<128x256xf32>
    %112 = tpu.matmul %89, %105, %cst_46 {dimension_numbers = #tpu.dot_dimension_numbers<[1], [1], [0], [0], [0, 0, 1, 0], [], []>} : vector<128x32xf32>, vector<256x32xf32>, vector<128x256xf32> -> vector<128x256xf32>
    %cst_47 = arith.constant -5.000000e+00 : f32
    %cst_48 = arith.constant 5.000000e+00 : f32
    %113 = vector.broadcast %cst_47 : f32 to vector<128x256xf32>
    %114 = arith.maximumf %113, %112 : vector<128x256xf32>
    %115 = vector.broadcast %cst_48 : f32 to vector<128x256xf32>
    %116 = arith.minimumf %115, %114 : vector<128x256xf32>
    %117 = arith.addf %116, %97 : vector<128x256xf32>
    %cst_49 = arith.constant 5.000000e+00 : f32
    %118 = vector.broadcast %cst_49 : f32 to vector<128x256xf32>
    %119 = arith.minimumf %117, %118 : vector<128x256xf32>
    %120 = math.exp %119 : vector<128x256xf32>
    %cst_50 = arith.constant dense<0.000000e+00> : vector<128x64xf32>
    %121 = tpu.matmul %120, %111, %cst_50 {dimension_numbers = #tpu.dot_dimension_numbers<[1], [0], [0], [1], [0, 0, 1, 1], [], []>} : vector<128x256xf32>, vector<256x64xf32>, vector<128x64xf32> -> vector<128x64xf32>
    %122 = vector.extract_strided_slice %121 {offsets = [0, 0], sizes = [128, 32], strides = [1, 1]} : vector<128x64xf32> to vector<128x32xf32>
    %123 = vector.extract_strided_slice %121 {offsets = [0, 32], sizes = [128, 32], strides = [1, 1]} : vector<128x64xf32> to vector<128x32xf32>
    %124 = tpu.reciprocal %123 {approx = true} : vector<128x32xf32> -> vector<128x32xf32>
    %125 = arith.mulf %122, %124 : vector<128x32xf32>
    %cst_51 = arith.constant dense<0.000000e+00> : vector<128x32xf32>
    %126 = tpu.matmul %125, %98, %cst_51 {dimension_numbers = #tpu.dot_dimension_numbers<[1], [0], [0], [1], [0, 0, 1, 1], [], []>} : vector<128x32xf32>, vector<32x32xf32>, vector<128x32xf32> -> vector<128x32xf32>
    %127 = vector.broadcast %99 : vector<1x32xf32> to vector<128x32xf32>
    %128 = arith.addf %126, %127 : vector<128x32xf32>
    %129 = arith.addf %128, %87 : vector<128x32xf32>
    %c512 = arith.constant 512 : index
    %c0_52 = arith.constant 0 : index
    %130 = vector.load %arg3[%c512, %c0_52] : memref<760x128xf32, #tpu.memory_space<vmem>>, vector<1x32xf32>
    %c520 = arith.constant 520 : index
    %c0_53 = arith.constant 0 : index
    %131 = vector.load %arg3[%c520, %c0_53] : memref<760x128xf32, #tpu.memory_space<vmem>>, vector<1x32xf32>
    %cst_54 = arith.constant dense<0.000000e+00> : vector<128xf32>
    %132 = vector.multi_reduction <add>, %129, %cst_54 [1] : vector<128x32xf32> to vector<128xf32>
    %133 = vector.shape_cast %132 : vector<128xf32> to vector<128x1xf32>
    %cst_55 = arith.constant 3.200000e+01 : f32
    %134 = vector.broadcast %cst_55 : f32 to vector<128x1xf32>
    %135 = arith.divf %133, %134 : vector<128x1xf32>
    %136 = vector.broadcast %135 : vector<128x1xf32> to vector<128x32xf32>
    %137 = arith.subf %129, %136 : vector<128x32xf32>
    %138 = arith.mulf %137, %137 : vector<128x32xf32>
    %cst_56 = arith.constant dense<0.000000e+00> : vector<128xf32>
    %139 = vector.multi_reduction <add>, %138, %cst_56 [1] : vector<128x32xf32> to vector<128xf32>
    %140 = vector.shape_cast %139 : vector<128xf32> to vector<128x1xf32>
    %cst_57 = arith.constant 3.200000e+01 : f32
    %141 = vector.broadcast %cst_57 : f32 to vector<128x1xf32>
    %142 = arith.divf %140, %141 : vector<128x1xf32>
    %cst_58 = arith.constant 9.99999974E-6 : f32
    %143 = vector.broadcast %cst_58 : f32 to vector<128x1xf32>
    %144 = arith.addf %142, %143 : vector<128x1xf32>
    %145 = math.rsqrt %144 : vector<128x1xf32>
    %146 = vector.broadcast %145 : vector<128x1xf32> to vector<128x32xf32>
    %147 = arith.mulf %137, %146 : vector<128x32xf32>
    %148 = vector.broadcast %130 : vector<1x32xf32> to vector<128x32xf32>
    %149 = arith.mulf %147, %148 : vector<128x32xf32>
    %150 = vector.broadcast %131 : vector<1x32xf32> to vector<128x32xf32>
    %151 = arith.addf %149, %150 : vector<128x32xf32>
    %c528 = arith.constant 528 : index
    %c0_59 = arith.constant 0 : index
    %152 = vector.load %arg3[%c528, %c0_59] : memref<760x128xf32, #tpu.memory_space<vmem>>, vector<32x128xf32>
    %cst_60 = arith.constant dense<0.000000e+00> : vector<128x128xf32>
    %153 = tpu.matmul %151, %152, %cst_60 {dimension_numbers = #tpu.dot_dimension_numbers<[1], [0], [0], [1], [0, 0, 1, 1], [], []>} : vector<128x32xf32>, vector<32x128xf32>, vector<128x128xf32> -> vector<128x128xf32>
    %c560 = arith.constant 560 : index
    %c0_61 = arith.constant 0 : index
    %154 = vector.load %arg3[%c560, %c0_61] : memref<760x128xf32, #tpu.memory_space<vmem>>, vector<1x128xf32>
    %155 = vector.broadcast %154 : vector<1x128xf32> to vector<128x128xf32>
    %156 = arith.addf %153, %155 : vector<128x128xf32>
    %cst_62 = arith.constant 0.000000e+00 : f32
    %157 = vector.broadcast %cst_62 : f32 to vector<128x128xf32>
    %158 = arith.maximumf %156, %157 : vector<128x128xf32>
    %c568 = arith.constant 568 : index
    %c0_63 = arith.constant 0 : index
    %159 = vector.load %arg3[%c568, %c0_63] : memref<760x128xf32, #tpu.memory_space<vmem>>, vector<128x32xf32>
    %cst_64 = arith.constant dense<0.000000e+00> : vector<128x32xf32>
    %160 = tpu.matmul %158, %159, %cst_64 {dimension_numbers = #tpu.dot_dimension_numbers<[1], [0], [0], [1], [0, 0, 1, 1], [], []>} : vector<128x128xf32>, vector<128x32xf32>, vector<128x32xf32> -> vector<128x32xf32>
    %c696 = arith.constant 696 : index
    %c0_65 = arith.constant 0 : index
    %161 = vector.load %arg3[%c696, %c0_65] : memref<760x128xf32, #tpu.memory_space<vmem>>, vector<1x32xf32>
    %162 = vector.broadcast %161 : vector<1x32xf32> to vector<128x32xf32>
    %163 = arith.addf %160, %162 : vector<128x32xf32>
    %164 = arith.addf %163, %151 : vector<128x32xf32>
    %c704 = arith.constant 704 : index
    %c0_66 = arith.constant 0 : index
    %165 = vector.load %arg3[%c704, %c0_66] : memref<760x128xf32, #tpu.memory_space<vmem>>, vector<1x32xf32>
    %c712 = arith.constant 712 : index
    %c0_67 = arith.constant 0 : index
    %166 = vector.load %arg3[%c712, %c0_67] : memref<760x128xf32, #tpu.memory_space<vmem>>, vector<1x32xf32>
    %cst_68 = arith.constant dense<0.000000e+00> : vector<128xf32>
    %167 = vector.multi_reduction <add>, %164, %cst_68 [1] : vector<128x32xf32> to vector<128xf32>
    %168 = vector.shape_cast %167 : vector<128xf32> to vector<128x1xf32>
    %cst_69 = arith.constant 3.200000e+01 : f32
    %169 = vector.broadcast %cst_69 : f32 to vector<128x1xf32>
    %170 = arith.divf %168, %169 : vector<128x1xf32>
    %171 = vector.broadcast %170 : vector<128x1xf32> to vector<128x32xf32>
    %172 = arith.subf %164, %171 : vector<128x32xf32>
    %173 = arith.mulf %172, %172 : vector<128x32xf32>
    %cst_70 = arith.constant dense<0.000000e+00> : vector<128xf32>
    %174 = vector.multi_reduction <add>, %173, %cst_70 [1] : vector<128x32xf32> to vector<128xf32>
    %175 = vector.shape_cast %174 : vector<128xf32> to vector<128x1xf32>
    %cst_71 = arith.constant 3.200000e+01 : f32
    %176 = vector.broadcast %cst_71 : f32 to vector<128x1xf32>
    %177 = arith.divf %175, %176 : vector<128x1xf32>
    %cst_72 = arith.constant 9.99999974E-6 : f32
    %178 = vector.broadcast %cst_72 : f32 to vector<128x1xf32>
    %179 = arith.addf %177, %178 : vector<128x1xf32>
    %180 = math.rsqrt %179 : vector<128x1xf32>
    %181 = vector.broadcast %180 : vector<128x1xf32> to vector<128x32xf32>
    %182 = arith.mulf %172, %181 : vector<128x32xf32>
    %183 = vector.broadcast %165 : vector<1x32xf32> to vector<128x32xf32>
    %184 = arith.mulf %182, %183 : vector<128x32xf32>
    %185 = vector.broadcast %166 : vector<1x32xf32> to vector<128x32xf32>
    %186 = arith.addf %184, %185 : vector<128x32xf32>
    %c720 = arith.constant 720 : index
    %c0_73 = arith.constant 0 : index
    %187 = vector.load %arg3[%c720, %c0_73] : memref<760x128xf32, #tpu.memory_space<vmem>>, vector<32x32xf32>
    %cst_74 = arith.constant dense<0.000000e+00> : vector<128x32xf32>
    %188 = tpu.matmul %186, %187, %cst_74 {dimension_numbers = #tpu.dot_dimension_numbers<[1], [0], [0], [1], [0, 0, 1, 1], [], []>} : vector<128x32xf32>, vector<32x32xf32>, vector<128x32xf32> -> vector<128x32xf32>
    %c752 = arith.constant 752 : index
    %c0_75 = arith.constant 0 : index
    %189 = vector.load %arg3[%c752, %c0_75] : memref<760x128xf32, #tpu.memory_space<vmem>>, vector<1x32xf32>
    %190 = vector.broadcast %189 : vector<1x32xf32> to vector<128x32xf32>
    %191 = arith.addf %188, %190 : vector<128x32xf32>
    %c0_76 = arith.constant 0 : index
    %c0_77 = arith.constant 0 : index
    %192 = vector.load %arg7[%c0_76, %c0_77] : memref<128x32xf32, #tpu.memory_space<vmem>>, vector<128x32xf32>
    tpu.vector_store %arg7[%c0_76, %c0_77], %191 {strides = array<i32>} : memref<128x32xf32, #tpu.memory_space<vmem>>, vector<128x32xf32>,
    return
  }
}

</mosaic_0001>

<bundles_post_ra>
// kernel: forward.1
= control target key start
LH: loop header
LB: loop body
LE: loop exit
PB: predicated region body
PF: predicated region fallthrough
CT: control target
= control target key end

     0   :  { %12 = vsyncpa [#allocation3], 0  ;;  %s9469_s0 = inlined_call_operand.hbm [shape: f32[128,32], index: 0, kind: input, shape index: {}]   ;;  %s9470_s1 = inlined_call_operand.hbm [shape: f32[128,32], index: 1, kind: input, shape index: {}]   ;;  %s9471_s2 = inlined_call_operand.hbm [shape: f32[128,32], index: 2, kind: input, shape index: {}]   ;;  %s9472_s3 = inlined_call_operand.hbm [shape: f32[760,128], index: 3, kind: input, shape index: {}]   ;;  %s9473_s4 = inlined_call_operand.hbm [shape: f32[64,512], index: 4, kind: input, shape index: {}]   ;;  %s9474_s5 = inlined_call_operand.hbm [shape: f32[64,256], index: 5, kind: input, shape index: {}]   ;;  %s9475_s6 = inlined_call_operand.hbm [shape: f32[128,256], index: 6, kind: input, shape index: {}]   ;;  %s9476_s7 = inlined_call_operand.hbm [shape: f32[128,32], index: 7, kind: output, shape index: {}]  }
   0x1   :  { %13 = vsyncpa [#allocation6], 0 }
   0x2   :  { %14 = vsyncpa [#allocation9], 0 }
   0x3   :  { %15 = vsyncpa [#allocation12], 0 }
   0x4   :  { %16 = vsyncpa [#allocation4], 0  ;;  %s7526_s24 = smov [#allocation5]   ;;  %s7527_s26 = smov [#allocation8]  }
   0x5   :  { %s34_s25 = sshll.u32 %s7526_s24, 4  ;;  %s58_s27 = sshll.u32 %s7527_s26, 4  ;;  %s35_s25 = int_to_ptr.vmem [resolvable:$true] %s34_s25  ;;  %s59_s27 = int_to_ptr.vmem [resolvable:$true] %s58_s27 }
   0x6   :  { %s7364_s28 = scalar_lea.vmem %s35_s25, 2048  ;;  %p7369_p1 = scmp.lt.s32.totalorder %s35_s25, %s35_s25 }
   0x7   :  { %p7365_p0 = scmp.ne.s32.totalorder %s35_s25, %s7364_s28  ;;  %p7370_p2 = scmp.lt.s32.totalorder %s7364_s28, %s7364_s28 }
   0x9   :  { %p7371_p3 = por %p7370_p2, %p7369_p1 }
   0xb   :  { %p7372_p4 = pnand %p7371_p3, %p7365_p0 }
   0xd   :  { %7375 = shalt.err (!%p7372_p4)
}
   0xe   :  { %s7528_s29 = smov 128   ;;  %s7529_s30 = smov 8  }
   0xf   :  { %40 = dma.hbm_to_vmem [thread:$0]  %s9470_s1, 2048, %s35_s25, [#allocation6], %s7528_s29, %s7528_s29, %s7529_s30  }
  0x10   :  { %s7384_s10 = scalar_lea.vmem %s59_s27, 12160  ;;  %p7389_p6 = scmp.lt.s32.totalorder %s59_s27, %s59_s27 }
  0x11   :  { %p7385_p5 = scmp.ne.s32.totalorder %s59_s27, %s7384_s10  ;;  %p7390_p7 = scmp.lt.s32.totalorder %s7384_s10, %s7384_s10 }
  0x13   :  { %p7391_p8 = por %p7390_p7, %p7389_p6 }
  0x15   :  { %p7392_p9 = pnand %p7391_p8, %p7385_p5 }
  0x17   :  { %7395 = shalt.err (!%p7392_p9)
}
  0x18   :  { %64 = dma.hbm_to_vmem [thread:$0]  %s9472_s3, 12160, %s59_s27, [#allocation9], %s7528_s29, %s7528_s29, %s7529_s30  }
  0x19   :  { %s7530_s13 = smov [#allocation11]  }
  0x1a   :  { %s82_s14 = sshll.u32 %s7530_s13, 4  ;;  %s83_s14 = int_to_ptr.vmem [resolvable:$true] %s82_s14 }
  0x1b   :  { %s7404_s15 = scalar_lea.vmem %s83_s14, 2048  ;;  %p7409_p11 = scmp.lt.s32.totalorder %s83_s14, %s83_s14 }
  0x1c   :  { %p7405_p10 = scmp.ne.s32.totalorder %s83_s14, %s7404_s15  ;;  %p7410_p12 = scmp.lt.s32.totalorder %s7404_s15, %s7404_s15 }
  0x1e   :  { %p7411_p13 = por %p7410_p12, %p7409_p11 }
  0x20   :  { %p7412_p0 = pnand %p7411_p13, %p7405_p10 }
  0x22   :  { %7415 = shalt.err (!%p7412_p0)
}
  0x23   :  { %s7531_s1 = smov 256   ;;  %s7532_s16 = smov 16  }
  0x24   :  { %88 = dma.hbm_to_vmem [thread:$0]  %s9474_s5, 2048, %s83_s14, [#allocation12], %s7531_s1, %s7531_s1, %s7532_s16  }
  0x25   :  { %s7533_s3 = smov [#allocation2]   ;;  %s7534_s20 = smov [#allocation7]  }
  0x26   :  { %s22_s19 = sshll.u32 %s7533_s3, 4  ;;  %s46_s21 = sshll.u32 %s7534_s20, 4  ;;  %s23_s19 = int_to_ptr.vmem [resolvable:$true] %s22_s19  ;;  %s47_s21 = int_to_ptr.vmem [resolvable:$true] %s46_s21 }
  0x27   :  { %s7424_s22 = scalar_lea.vmem %s23_s19, 2048  ;;  %p7429_p2 = scmp.lt.s32.totalorder %s23_s19, %s23_s19 }
  0x28   :  { %p7425_p1 = scmp.ne.s32.totalorder %s23_s19, %s7424_s22  ;;  %p7430_p3 = scmp.lt.s32.totalorder %s7424_s22, %s7424_s22 }
  0x2a   :  { %p7431_p4 = por %p7430_p3, %p7429_p2 }
  0x2c   :  { %p7432_p5 = pnand %p7431_p4, %p7425_p1 }
  0x2e   :  { %7435 = shalt.err (!%p7432_p5)
}
  0x2f   :  { %28 = dma.hbm_to_vmem [thread:$0]  %s9469_s0, 2048, %s23_s19, [#allocation3], %s7528_s29, %s7528_s29, %s7529_s30  }
  0x30   :  { %s7444_s5 = scalar_lea.vmem %s47_s21, 2048  ;;  %p7449_p7 = scmp.lt.s32.totalorder %s47_s21, %s47_s21 }
  0x31   :  { %p7445_p6 = scmp.ne.s32.totalorder %s47_s21, %s7444_s5  ;;  %p7450_p8 = scmp.lt.s32.totalorder %s7444_s5, %s7444_s5 }
  0x33   :  { %p7451_p9 = por %p7450_p8, %p7449_p7 }
  0x35   :  { %p7452_p10 = pnand %p7451_p9, %p7445_p6 }
  0x37   :  { %7455 = shalt.err (!%p7452_p10)
}
  0x38   :  { %52 = dma.hbm_to_vmem [thread:$0]  %s9471_s2, 2048, %s47_s21, [#allocation6], %s7528_s29, %s7528_s29, %s7529_s30  }
  0x39   :  { %s7535_s27 = smov [#allocation10]  }
  0x3a   :  { %s70_s28 = sshll.u32 %s7535_s27, 4  ;;  %s71_s28 = int_to_ptr.vmem [resolvable:$true] %s70_s28 }
  0x3b   :  { %s7464_s8 = scalar_lea.vmem %s71_s28, 4096  ;;  %p7469_p12 = scmp.lt.s32.totalorder %s71_s28, %s71_s28 }
  0x3c   :  { %p7465_p11 = scmp.ne.s32.totalorder %s71_s28, %s7464_s8  ;;  %p7470_p13 = scmp.lt.s32.totalorder %s7464_s8, %s7464_s8 }
  0x3e   :  { %p7471_p0 = por %p7470_p13, %p7469_p12 }
  0x40   :  { %p7472_p1 = pnand %p7471_p0, %p7465_p11 }
  0x42   :  { %7475 = shalt.err (!%p7472_p1)
}
  0x43   :  { %s7536_s0 = smov 512   ;;  %s7537_s9 = smov 32  }
  0x44   :  { %76 = dma.hbm_to_vmem [thread:$0]  %s9473_s4, 4096, %s71_s28, [#allocation9], %s7536_s0, %s7536_s0, %s7537_s9  }
  0x45   :  { %s7538_s12 = smov [#allocation13]  }
  0x46   :  { %s94_s13 = sshll.u32 %s7538_s12, 4  ;;  %s95_s13 = int_to_ptr.vmem [resolvable:$true] %s94_s13 }
  0x47   :  { %s7484_s2 = scalar_lea.vmem %s95_s13, 4096  ;;  %p7489_p3 = scmp.lt.s32.totalorder %s95_s13, %s95_s13 }
  0x48   :  { %p7485_p2 = scmp.ne.s32.totalorder %s95_s13, %s7484_s2  ;;  %p7490_p4 = scmp.lt.s32.totalorder %s7484_s2, %s7484_s2 }
  0x4a   :  { %p7491_p5 = por %p7490_p4, %p7489_p3 }
  0x4c   :  { %p7492_p6 = pnand %p7491_p5, %p7485_p2 }
  0x4e   :  { %7495 = shalt.err (!%p7492_p6)
}
  0x4f   :  { %100 = dma.hbm_to_vmem [thread:$0]  %s9475_s6, 4096, %s95_s13, [#allocation12], %s7531_s1, %s7531_s1, %s7532_s16  }
  0x50   :  { %7516 = dma.done.wait [#allocation3], 2048  }
  0x51   :  { %7517 = vsyncadd [#allocation3], 4294965248 }
  0x52   :  { %7518 = dma.done.wait [#allocation6], 4096  }
  0x53   :  { %7519 = vsyncadd [#allocation6], 4294963200 }
  0x54   :  { %7520 = dma.done.wait [#allocation9], 16256  }
  0x55   :  { %7521 = vsyncadd [#allocation9], 4294951040 }
  0x56   :  { %7522 = dma.done.wait [#allocation12], 6144  }
  0x57   :  { %7523 = vsyncadd [#allocation12], 4294961152  ;;  %v175_v0 = vld [vmem:[#allocation8 + $0xd8] sm:$0xff]  ;;  %v174_v1 = vld [vmem:[#allocation8 + $0xd0] sm:$0xff]  ;;  %vm176_vm0 = vcmask 261120   ;;  %s7540_s4 = smov 96  }
  0x58   :  { %6675 = vmatprep.subr.mxu0 %v175_v0  ;;  %v124_v2 = vld [vmem:[#allocation8] sm:$0xff]  ;;  %v173_v4 = vld [vmem:[#allocation8 + $0xc8] sm:$0xff]  ;;  %v126_v8 = vld [vmem:[#allocation8 + $0x10] sm:$0xff]  ;;  %s7541_s6 = smov 64   ;;  %s7542_s1 = smov [#allocation14]  }
  0x59   :  { %v140_v3 = vld [vmem:[#allocation5] sm:$0xff]  ;;  %6676 = vmatpush3.msra.mxu0 %v175_v0  ;;  %v125_v6 = vld [vmem:[#allocation8 + $0x8] sm:$0xff]  ;;  %v142_v9 = vld [vmem:[#allocation5 + $0x10] sm:$0xff]  ;;  %s5613_s16 = sshll.u32 %s7542_s1, 4  ;;  %s5614_s16 = int_to_ptr.vmem [resolvable:$true] %s5613_s16 }
  0x5a   :  { %v156_v5 = vadd.f32 %v140_v3, %v124_v2  ;;  %v141_v7 = vld [vmem:[#allocation5 + $0x8] sm:$0xff]  ;;  %6677 = vmatprep.subr.mxu0 %v174_v1  ;;  %v172_v10 = vld [vmem:[#allocation8 + $0xc0] sm:$0xff]  ;;  %v158_v12 = vadd.f32 %v142_v9, %v126_v8  ;;  %v127_v13 = vld [vmem:[#allocation8 + $0x18] sm:$0xff]  ;;  %s7496_s17 = scalar_lea.vmem %s5614_s16, 2048  ;;  %p7501_p8 = scmp.lt.s32.totalorder %s5614_s16, %s5614_s16 }
  0x5b   :  { %6678 = vmatpush3.msra.mxu0 %v174_v1  ;;  %v157_v11 = vadd.f32 %v141_v7, %v125_v6  ;;  %v143_v14 = vld [vmem:[#allocation5 + $0x18] sm:$0xff]  ;;  %v128_v15 = vld [vmem:[#allocation8 + $0x20] sm:$0xff]  ;;  %v129_v19 = vld [vmem:[#allocation8 + $0x28] sm:$0xff]  ;;  %p7497_p7 = scmp.ne.s32.totalorder %s5614_s16, %s7496_s17  ;;  %p7502_p9 = scmp.lt.s32.totalorder %s7496_s17, %s7496_s17 }
  0x5c   :  { %6683 = vmatprep.mubr.msk.f32.mxu0 %vm176_vm0, %v156_v5  ;;  %6679 = vmatprep.subr.mxu0 %v173_v4  ;;  %v144_v16 = vld [vmem:[#allocation5 + $0x20] sm:$0xff]  ;;  %v159_v17 = vadd.f32 %v143_v14, %v127_v13  ;;  %v145_v20 = vld [vmem:[#allocation5 + $0x28] sm:$0xff]  ;;  %v130_v21 = vld [vmem:[#allocation8 + $0x30] sm:$0xff]  ;;  %v7539_v13 = vmov 1966171168  }
  0x5d   :  { %6680 = vmatpush3.msra.mxu0 %v173_v4  ;;  %v160_v18 = vadd.f32 %v144_v16, %v128_v15  ;;  %v146_v22 = vld [vmem:[#allocation5 + $0x30] sm:$0xff]  ;;  %v389_v23 = vld [vmem:[#allocation8 + $0xf8] sm:$0xff]  ;;  %v161_v24 = vadd.f32 %v145_v20, %v129_v19  ;;  %v387_v29 = vld [vmem:[#allocation8 + $0xe8] sm:$0xff]  ;;  %v643_v14 = vunpack.c.l.s4 %v7539_v13  ;;  %v645_v15 = vlaneseq  ;;  %p7503_p10 = por %p7502_p9, %p7501_p8 }
  0x5e   :  { %6681 = vmatprep.subr.mxu0 %v172_v10  ;;  %v131_v25 = vld [vmem:[#allocation8 + $0x38] sm:$0xff]  ;;  %6707 = vmatprep.subr.mxu1 %v389_v23  ;;  %v388_v26 = vld [vmem:[#allocation8 + $0xf0] sm:$0xff]  ;;  %v162_v27 = vadd.f32 %v146_v22, %v130_v21  ;;  %v370_v30 = vld [vmem:[#allocation2] sm:$0xff] }
  0x5f   :  { %6682 = vmatpush3.msra.mxu0 %v172_v10  ;;  %v147_v28 = vld [vmem:[#allocation5 + $0x38] sm:$0xff]  ;;  %6708 = vmatpush3.msra.mxu1 %v389_v23  ;;  %v132_v31 = vld [vmem:[#allocation8 + $0x40] sm:$0xff]  ;;  %v133_v36 = vld [vmem:[#allocation8 + $0x48] sm:$0xff]  ;;  %v646_v19 = vshrl.u32 %v645_v15, 7  ;;  %p7504_p11 = pnand %p7503_p10, %p7497_p7 }
  0x60   :  { %6684 = vmatmul.mubr.msk.f32.vlgmr.msra.gmra.mxu0 %vm176_vm0, %v157_v11  ;;  %v148_v32 = vld [vmem:[#allocation5 + $0x40] sm:$0xff]  ;;  %6709 = vmatprep.subr.mxu1 %v388_v26  ;;  %v163_v34 = vadd.f32 %v147_v28, %v131_v25  ;;  %v149_v37 = vld [vmem:[#allocation5 + $0x48] sm:$0xff]  ;;  %v134_v39 = vld [vmem:[#allocation8 + $0x50] sm:$0xff] }
  0x61   :  { %6686 = vmatprep.mubr.msk.f32.mxu0 %vm176_vm0, %v158_v12  ;;  %6715 = vmatprep.mubr.msk.f32.mxu1 %vm176_vm0, %v370_v30  ;;  %v386_v33 = vld [vmem:[#allocation8 + $0xe0] sm:$0xff]  ;;  %v164_v35 = vadd.f32 %v148_v32, %v132_v31  ;;  %v371_v38 = vld [vmem:[#allocation2 + $0x8] sm:$0xff]  ;;  %v150_v40 = vld [vmem:[#allocation5 + $0x50] sm:$0xff]  ;;  %v165_v42 = vadd.f32 %v149_v37, %v133_v36 }
  0x62   :  { %6710 = vmatpush3.msra.mxu1 %v388_v26  ;;  %v372_v41 = vld [vmem:[#allocation2 + $0x10] sm:$0xff]  ;;  %v166_v43 = vadd.f32 %v150_v40, %v134_v39  ;;  %v135_v44 = vld [vmem:[#allocation8 + $0x58] sm:$0xff]  ;;  %v136_v47 = vld [vmem:[#allocation8 + $0x60] sm:$0xff] }
  0x63   :  { %6711 = vmatprep.subr.mxu1 %v387_v29  ;;  %v151_v45 = vld [vmem:[#allocation5 + $0x58] sm:$0xff]  ;;  %v152_v48 = vld [vmem:[#allocation5 + $0x60] sm:$0xff]  ;;  %v137_v51 = vld [vmem:[#allocation8 + $0x68] sm:$0xff] }
  0x64   :  { %6687 = vmatmul.mubr.msk.f32.gmra.mxu0 %vm176_vm0, %v159_v17  ;;  %6712 = vmatpush3.msra.mxu1 %v387_v29  ;;  %v373_v46 = vld [vmem:[#allocation2 + $0x18] sm:$0xff]  ;;  %v167_v49 = vadd.f32 %v151_v45, %v135_v44  ;;  %v168_v50 = vadd.f32 %v152_v48, %v136_v47  ;;  %v153_v52 = vld [vmem:[#allocation5 + $0x68] sm:$0xff]  ;;  %v138_v53 = vld [vmem:[#allocation8 + $0x70] sm:$0xff] }
  0x65   :  { %6689 = vmatprep.mubr.msk.f32.mxu0 %vm176_vm0, %v160_v18  ;;  %6713 = vmatprep.subr.mxu1 %v386_v33  ;;  %v154_v54 = vld [vmem:[#allocation5 + $0x70] sm:$0xff]  ;;  %v169_v55 = vadd.f32 %v153_v52, %v137_v51  ;;  %v139_v57 = vld [vmem:[#allocation8 + $0x78] sm:$0xff]  ;;  %v374_v60 = vld [vmem:[#allocation2 + $0x20] sm:$0xff]  ;;  %v644_v18 = vunpack.c.0.s8 %v643_v14 }
  0x66   :  { %6714 = vmatpush3.msra.mxu1 %v386_v33  ;;  %v170_v56 = vadd.f32 %v154_v54, %v138_v53  ;;  %v155_v58 = vld [vmem:[#allocation5 + $0x78] sm:$0xff]  ;;  %v375_v61 = vld [vmem:[#allocation2 + $0x28] sm:$0xff]  ;;  %v376_v62 = vld [vmem:[#allocation2 + $0x30] sm:$0xff]  ;;  %v7685_v33 = vsub.s32 0, %v646_v19 }
  0x67   :  { %6716 = vmatmul.mubr.msk.f32.vlgmr.msra.gmra.mxu1 %vm176_vm0, %v371_v38  ;;  %v171_v59 = vadd.f32 %v155_v58, %v139_v57  ;;  %v377_v63 = vld [vmem:[#allocation2 + $0x38] sm:$0xff]  ;;  %v378_v0 = vld [vmem:[#allocation2 + $0x40] sm:$0xff]  ;;  %v379_v1 = vld [vmem:[#allocation2 + $0x48] sm:$0xff] }
  0x68   :  { %6690 = vmatmul.mubr.msk.f32.gmra.mxu0 %vm176_vm0, %v161_v24  ;;  %6718 = vmatprep.mubr.msk.f32.mxu1 %vm176_vm0, %v372_v41  ;;  %v380_v2 = vld [vmem:[#allocation2 + $0x50] sm:$0xff]  ;;  %v381_v3 = vld [vmem:[#allocation2 + $0x58] sm:$0xff]  ;;  %v382_v4 = vld [vmem:[#allocation2 + $0x60] sm:$0xff]  ;;  %v7677_v24 = vsub.s32 %v644_v18, %v646_v19 }
  0x69   :  { %6692 = vmatprep.mubr.msk.f32.mxu0 %vm176_vm0, %v162_v27  ;;  %v383_v5 = vld [vmem:[#allocation2 + $0x68] sm:$0xff]  ;;  %v384_v6 = vld [vmem:[#allocation2 + $0x70] sm:$0xff]  ;;  %v385_v7 = vld [vmem:[#allocation2 + $0x78] sm:$0xff] }
  0x6a   :  { %v7655_v8 = vld [vmem:[#allocation8 + $0x80] sm:$0xff]  ;;  %v5661_v20 = vld.sshfl [vmem:[#allocation8 + $0x1f0] sm:$0x33 pattern:$0x75316420] }
  0x6b   :  { %6719 = vmatmul.mubr.msk.f32.gmra.mxu1 %vm176_vm0, %v373_v46  ;;  %v641_v23 = vcombine.high %v5661_v20, %v5661_v20  ;;  %v648_v27 = vrot.slane %v5661_v20, %v7677_v24 }
  0x6c   :  { %6693 = vmatmul.mubr.msk.f32.gmra.mxu0 %vm176_vm0, %v163_v34  ;;  %6721 = vmatprep.mubr.msk.f32.mxu1 %vm176_vm0, %v374_v60 }
  0x6d   :  { %6695 = vmatprep.mubr.msk.f32.mxu0 %vm176_vm0, %v164_v35  ;;  %v655_v28 = vrot.slane %v641_v23, %v7677_v24  ;;  %v656_v31 = vcombine.high %v648_v27, %v648_v27  ;;  %v7688_v36 = vrot.slane %v648_v27, %v7685_v33 }
  0x6f   :  { %6722 = vmatmul.mubr.msk.f32.gmra.mxu1 %vm176_vm0, %v375_v61  ;;  %v657_v32 = vcombine.high %v655_v28, %v655_v28  ;;  %9496 = vst [vmem:[#allocation20_spill] sm:$0xff] %v7688_v36  ;;  %v7691_v37 = vrot.slane %v655_v28, %v7685_v33  ;;  %v7694_v38 = vrot.slane %v656_v31, %v7685_v33 }
  0x70   :  { %6696 = vmatmul.mubr.msk.f32.gmra.mxu0 %vm176_vm0, %v165_v42  ;;  %6724 = vmatprep.mubr.msk.f32.mxu1 %vm176_vm0, %v376_v62 }
  0x71   :  { %6698 = vmatprep.mubr.msk.f32.mxu0 %vm176_vm0, %v166_v43  ;;  %9497 = vst [vmem:[#allocation21_spill] sm:$0xff] %v7691_v37  ;;  %9498 = vst [vmem:[#allocation22_spill] sm:$0xff] %v7694_v38  ;;  %v7697_v39 = vrot.slane %v657_v32, %v7685_v33 }
  0x73   :  { %6725 = vmatmul.mubr.msk.f32.gmra.mxu1 %vm176_vm0, %v377_v63  ;;  %9499 = vst [vmem:[#allocation23_spill] sm:$0xff] %v7697_v39 }
  0x74   :  { %6699 = vmatmul.mubr.msk.f32.gmra.mxu0 %vm176_vm0, %v167_v49  ;;  %6727 = vmatprep.mubr.msk.f32.mxu1 %vm176_vm0, %v378_v0 }
  0x75   :  { %6701 = vmatprep.mubr.msk.f32.mxu0 %vm176_vm0, %v168_v50 }
  0x77   :  { %6728 = vmatmul.mubr.msk.f32.gmra.mxu1 %vm176_vm0, %v379_v1 }
  0x78   :  { %6702 = vmatmul.mubr.msk.f32.gmra.mxu0 %vm176_vm0, %v169_v55  ;;  %6730 = vmatprep.mubr.msk.f32.mxu1 %vm176_vm0, %v380_v2 }
  0x79   :  { %6704 = vmatprep.mubr.msk.f32.mxu0 %vm176_vm0, %v170_v56 }
  0x7b   :  { %6731 = vmatmul.mubr.msk.f32.gmra.mxu1 %vm176_vm0, %v381_v3 }
  0x7c   :  { %6705 = vmatmul.mubr.msk.f32.gmra.mxu0 %vm176_vm0, %v171_v59  ;;  %6733 = vmatprep.mubr.msk.f32.mxu1 %vm176_vm0, %v382_v4 }
  0x7d   :  { %6091 = vmatprep.mubr.msk.f32.mxu0 %vm176_vm0, %v7655_v8 }
  0x7f   :  { %6734 = vmatmul.mubr.msk.f32.gmra.mxu1 %vm176_vm0, %v383_v5 }
  0x80   :  { %6736 = vmatprep.mubr.msk.f32.mxu1 %vm176_vm0, %v384_v6 }
  0x83   :  { %6737 = vmatmul.mubr.msk.f32.gmra.mxu1 %vm176_vm0, %v385_v7 }
  0x84   :  { %6139 = vmatprep.mubr.msk.f32.mxu1 %vm176_vm0, %v7655_v8 }
 0x120   :  { %v7661_v9 = vpop.f32.mrf.mxu0 }
 0x122   :  { %v7663_v10 = vpop.f32.mrf.mxu0 }
 0x124   :  { %v7665_v11 = vpop.f32.mrf.mxu0 }
 0x126   :  { %v7667_v12 = vpop.f32.mrf.mxu0 }
 0x127   :  { %v7743_v0 = vpop.f32.mrf.mxu1 }
 0x128   :  { %v7669_v16 = vpop.f32.mrf.mxu0 }
 0x129   :  { %v7755_v5 = vpop.f32.mrf.mxu1  ;;  %v699_v32 = vmul.f32 %v7669_v16, %v7691_v37 }
 0x12a   :  { %v7671_v17 = vpop.f32.mrf.mxu0 }
 0x12b   :  { %v7769_v15 = vpop.f32.mrf.mxu1 }
 0x12c   :  { %v7673_v21 = vpop.f32.mrf.mxu0 }
 0x12d   :  { %v701_v20 = vmul.f32 %v7673_v21, %v7691_v37  ;;  %v733_v23 = vmul.f32 %v7673_v21, %v7697_v39  ;;  %v685_v27 = vmul.f32 %v7673_v21, %v7688_v36 }
 0x12e   :  { %v7675_v22 = vpop.f32.mrf.mxu0 }
 0x12f   :  { %v700_v28 = vmul.f32 %v7691_v37, %v7675_v22  ;;  %v684_v31 = vmul.f32 %v7688_v36, %v7675_v22 }
 0x130   :  { %v7679_v25 = vpop.f32.mrf.mxu0 }
 0x131   :  { %v703_v3 = vmul.f32 %v7679_v25, %v7691_v37  ;;  %v735_v4 = vmul.f32 %v7679_v25, %v7697_v39  ;;  %v687_v6 = vmul.f32 %v7679_v25, %v7688_v36  ;;  %v719_v7 = vmul.f32 %v7679_v25, %v7694_v38  ;;  %v7783_v25 = vpop.f32.mrf.mxu1 }
 0x132   :  { %v7681_v26 = vpop.f32.mrf.mxu0 }
 0x133   :  { %v702_v13 = vmul.f32 %v7691_v37, %v7681_v26  ;;  %v734_v14 = vmul.f32 %v7697_v39, %v7681_v26  ;;  %v686_v18 = vmul.f32 %v7688_v36, %v7681_v26  ;;  %v718_v19 = vmul.f32 %v7694_v38, %v7681_v26 }
 0x134   :  { %v6700_v29 = vpop.f32.mrf.mxu0  ;;  %v717_v26 = vmul.f32 %v7673_v21, %v7694_v38  ;;  %v716_v21 = vmul.f32 %v7694_v38, %v7675_v22 }
 0x135   :  { %v705_v58 = vmul.f32 %v6700_v29, %v7691_v37  ;;  %v737_v59 = vmul.f32 %v6700_v29, %v7697_v39  ;;  %v689_v60 = vmul.f32 %v6700_v29, %v7688_v36  ;;  %v721_v61 = vmul.f32 %v6700_v29, %v7694_v38 }
 0x136   :  { %v341_v30 = vpop.f32.mrf.mxu0  ;;  %v732_v29 = vmul.f32 %v7697_v39, %v7675_v22  ;;  %v683_v22 = vmul.f32 %v7669_v16, %v7688_v36 }
 0x137   :  { %v704_v62 = vmul.f32 %v7691_v37, %v341_v30  ;;  %v736_v63 = vmul.f32 %v7697_v39, %v341_v30  ;;  %v688_v1 = vmul.f32 %v7688_v36, %v341_v30  ;;  %v720_v2 = vmul.f32 %v7694_v38, %v341_v30  ;;  %v7797_v30 = vpop.f32.mrf.mxu1 }
 0x138   :  { %v6703_v34 = vpop.f32.mrf.mxu0 }
 0x139   :  { %v707_v50 = vmul.f32 %v6703_v34, %v7691_v37  ;;  %v739_v51 = vmul.f32 %v6703_v34, %v7697_v39  ;;  %v691_v52 = vmul.f32 %v6703_v34, %v7688_v36  ;;  %v723_v53 = vmul.f32 %v6703_v34, %v7694_v38 }
 0x13a   :  { %v351_v35 = vpop.f32.mrf.mxu0  ;;  %v731_v34 = vmul.f32 %v7669_v16, %v7697_v39 }
 0x13b   :  { %v706_v54 = vmul.f32 %v7691_v37, %v351_v35  ;;  %v738_v55 = vmul.f32 %v7697_v39, %v351_v35  ;;  %v690_v56 = vmul.f32 %v7688_v36, %v351_v35  ;;  %v722_v57 = vmul.f32 %v7694_v38, %v351_v35  ;;  %v7807_v35 = vpop.f32.mrf.mxu1 }
 0x13c   :  { %v6706_v40 = vpop.f32.mrf.mxu0 }
 0x13d   :  { %v693_v41 = vmul.f32 %v6706_v40, %v7688_v36  ;;  %v709_v42 = vmul.f32 %v6706_v40, %v7691_v37  ;;  %v725_v43 = vmul.f32 %v6706_v40, %v7694_v38  ;;  %v741_v44 = vmul.f32 %v6706_v40, %v7697_v39  ;;  %v7813_v40 = vpop.f32.mrf.mxu1 }
 0x13e   :  { %v361_v45 = vpop.f32.mrf.mxu0 }
 0x13f   :  { %6059 = vmatprep.subr.msk.mxu0 %vm176_vm0, %v709_v42  ;;  %6107 = vmatprep.subr.msk.mxu1 %vm176_vm0, %v741_v44  ;;  %v708_v46 = vmul.f32 %v7691_v37, %v361_v45  ;;  %v740_v47 = vmul.f32 %v7697_v39, %v361_v45  ;;  %v692_v48 = vmul.f32 %v7688_v36, %v361_v45  ;;  %v5662_v42 = vld.sshfl [vmem:[#allocation8 + $0x1f8] sm:$0x33 pattern:$0x75316420] }
 0x140   :  { %6060 = vmatpush3.xpose.msk.msra.mxu0 %vm176_vm0, %v693_v41  ;;  %6108 = vmatpush3.xpose.msk.msra.mxu1 %vm176_vm0, %v725_v43  ;;  %v724_v49 = vmul.f32 %v7694_v38, %v361_v45  ;;  %v715_v41 = vmul.f32 %v7669_v16, %v7694_v38  ;;  %v698_v43 = vmul.f32 %v7691_v37, %v7671_v17  ;;  %v7823_v45 = vpop.f32.mrf.mxu1 }
 0x141   :  { %6061 = vmatprep.subr.msk.mxu0 %vm176_vm0, %v708_v46  ;;  %6109 = vmatprep.subr.msk.mxu1 %vm176_vm0, %v740_v47  ;;  %v730_v44 = vmul.f32 %v7697_v39, %v7671_v17  ;;  %v750_v16 = vcombine.high %v5662_v42, %v5662_v42  ;;  %v682_v47 = vmul.f32 %v7688_v36, %v7671_v17 }
 0x142   :  { %v7829_v46 = vpop.f32.mrf.mxu1 }
 0x144   :  { %6062 = vmatpush3.xpose.msk.msra.mxu0 %vm176_vm0, %v692_v48  ;;  %6110 = vmatpush3.xpose.msk.msra.mxu1 %vm176_vm0, %v724_v49  ;;  %v714_v48 = vmul.f32 %v7694_v38, %v7671_v17  ;;  %v697_v49 = vmul.f32 %v7665_v11, %v7691_v37  ;;  %v764_v17 = vrot.slane %v750_v16, %v7677_v24  ;;  %v591_v16 = vld [vmem:[#allocation8 + $0x98] sm:$0xff] }
 0x145   :  { %6063 = vmatprep.subr.msk.mxu0 %vm176_vm0, %v707_v50  ;;  %6111 = vmatprep.subr.msk.mxu1 %vm176_vm0, %v739_v51  ;;  %v729_v50 = vmul.f32 %v7665_v11, %v7697_v39  ;;  %v7839_v51 = vpop.f32.mrf.mxu1 }
 0x148   :  { %6064 = vmatpush3.xpose.msk.msra.mxu0 %vm176_vm0, %v691_v52  ;;  %6112 = vmatpush3.xpose.msk.msra.mxu1 %vm176_vm0, %v723_v53  ;;  %v7845_v52 = vpop.f32.mrf.mxu1  ;;  %v681_v53 = vmul.f32 %v7665_v11, %v7688_v36 }
 0x149   :  { %6065 = vmatprep.subr.msk.mxu0 %vm176_vm0, %v706_v54  ;;  %6113 = vmatprep.subr.msk.mxu1 %vm176_vm0, %v738_v55  ;;  %v713_v54 = vmul.f32 %v7665_v11, %v7694_v38  ;;  %v696_v55 = vmul.f32 %v7691_v37, %v7667_v12  ;;  %v757_v11 = vrot.slane %v5662_v42, %v7677_v24 }
 0x14c   :  { %6066 = vmatpush3.xpose.msk.msra.mxu0 %vm176_vm0, %v690_v56  ;;  %6114 = vmatpush3.xpose.msk.msra.mxu1 %vm176_vm0, %v722_v57  ;;  %v728_v56 = vmul.f32 %v7697_v39, %v7667_v12  ;;  %v7856_v57 = vpop.f32.mrf.mxu1 }
 0x14d   :  { %6067 = vmatprep.subr.msk.mxu0 %vm176_vm0, %v705_v58  ;;  %6115 = vmatprep.subr.msk.mxu1 %vm176_vm0, %v737_v59  ;;  %v766_v59 = vcombine.high %v764_v17, %v764_v17 }
 0x14e   :  { %v6735_v58 = vpop.f32.mrf.mxu1 }
 0x150   :  { %6068 = vmatpush3.xpose.msk.msra.mxu0 %vm176_vm0, %v689_v60  ;;  %6116 = vmatpush3.xpose.msk.msra.mxu1 %vm176_vm0, %v721_v61  ;;  %v680_v60 = vmul.f32 %v7688_v36, %v7667_v12  ;;  %v712_v61 = vmul.f32 %v7694_v38, %v7667_v12  ;;  %v7878_v12 = vrot.slane %v764_v17, %v7685_v33 }
 0x151   :  { %6069 = vmatprep.subr.msk.mxu0 %vm176_vm0, %v704_v62  ;;  %6117 = vmatprep.subr.msk.mxu1 %vm176_vm0, %v736_v63  ;;  %v695_v62 = vmul.f32 %v7661_v9, %v7691_v37  ;;  %v727_v63 = vmul.f32 %v7661_v9, %v7697_v39 }
 0x152   :  { %9500 = vst [vmem:[#allocation24_spill] sm:$0xff] %v7878_v12 }
 0x154   :  { %6070 = vmatpush3.xpose.msk.msra.mxu0 %vm176_vm0, %v688_v1  ;;  %6118 = vmatpush3.xpose.msk.msra.mxu1 %vm176_vm0, %v720_v2  ;;  %v7871_v1 = vld [vmem:[#allocation8 + $0x1e8] ss:$0 sm:$0xff]  ;;  %v569_v2 = vpop.f32.mrf.mxu1 }
 0x155   :  { %6071 = vmatprep.subr.msk.mxu0 %vm176_vm0, %v703_v3  ;;  %6119 = vmatprep.subr.msk.mxu1 %vm176_vm0, %v735_v4  ;;  %v7881_v3 = vrot.slane %v766_v59, %v7685_v33  ;;  %v765_v4 = vcombine.high %v757_v11, %v757_v11  ;;  %v593_v59 = vld [vmem:[#allocation8 + $0xa8] sm:$0xff] }
 0x156   :  { %v6738_v24 = vpop.f32.mrf.mxu1 }
 0x157   :  { %9501 = vst [vmem:[#allocation25_spill] sm:$0xff] %v7881_v3 }
 0x158   :  { %6072 = vmatpush3.xpose.msk.msra.mxu0 %vm176_vm0, %v687_v6  ;;  %6120 = vmatpush3.xpose.msk.msra.mxu1 %vm176_vm0, %v719_v7  ;;  %v679_v6 = vmul.f32 %v7661_v9, %v7688_v36  ;;  %v711_v7 = vmul.f32 %v7661_v9, %v7694_v38 }
 0x159   :  { %6073 = vmatprep.subr.msk.mxu0 %vm176_vm0, %v702_v13  ;;  %6121 = vmatprep.subr.msk.mxu1 %vm176_vm0, %v734_v14  ;;  %v585_v13 = vadd.f32 %v6738_v24, %v7871_v1  ;;  %v694_v14 = vmul.f32 %v7691_v37, %v7663_v10  ;;  %v550_v24 = vadd.f32 %v7871_v1, %v7839_v51  ;;  %v612_v37 = vld [vmem:[#allocation10 + $0x80] sm:$0xff] }
 0x15a   :  { %v545_v51 = vadd.f32 %v7813_v40, %v7871_v1  ;;  %v540_v40 = vadd.f32 %v7871_v1, %v7823_v45 }
 0x15b   :  { %v818_v9 = vmul.f32 %v7878_v12, %v585_v13 }
 0x15c   :  { %6074 = vmatpush3.xpose.msk.msra.mxu0 %vm176_vm0, %v686_v18  ;;  %6122 = vmatpush3.xpose.msk.msra.mxu1 %vm176_vm0, %v718_v19  ;;  %v726_v18 = vmul.f32 %v7697_v39, %v7663_v10  ;;  %v579_v19 = vpop.f32.mrf.mxu1 }
 0x15d   :  { %6075 = vmatprep.subr.msk.mxu0 %vm176_vm0, %v701_v20  ;;  %6123 = vmatprep.subr.msk.mxu1 %vm176_vm0, %v733_v23  ;;  %v7895_v20 = vrot.slane %v757_v11, %v7685_v33  ;;  %v7901_v23 = vmul.f32 %v7881_v3, %v585_v13 }
 0x15f   :  { %9502 = vst [vmem:[#allocation26_spill] sm:$0xff] %v7895_v20  ;;  %v794_v45 = vmul.f32 %v7895_v20, %v545_v51 }
 0x160   :  { %6076 = vmatpush3.xpose.msk.msra.mxu0 %vm176_vm0, %v685_v27  ;;  %6124 = vmatpush3.xpose.msk.msra.mxu1 %vm176_vm0, %v717_v26  ;;  %v7904_v27 = vrot.slane %v765_v4, %v7685_v33  ;;  %v678_v26 = vmul.f32 %v7688_v36, %v7663_v10 }
 0x161   :  { %6077 = vmatprep.subr.msk.mxu0 %vm176_vm0, %v700_v28  ;;  %6125 = vmatprep.subr.msk.mxu1 %vm176_vm0, %v732_v29  ;;  %v710_v28 = vmul.f32 %v7694_v38, %v7663_v10  ;;  %v580_v29 = vadd.f32 %v7871_v1, %v579_v19  ;;  %v8018_v19 = vmul.f32 %v7881_v3, %v550_v24 }
 0x162   :  { %9503 = vst [vmem:[#allocation27_spill] sm:$0xff] %v7904_v27  ;;  %v7916_v33 = vmul.f32 %v7904_v27, %v585_v13 }
 0x163   :  { %v7921_v10 = vmul.f32 %v7881_v3, %v580_v29  ;;  %v7932_v42 = vmul.f32 %v7904_v27, %v580_v29 }
 0x164   :  { %6078 = vmatpush3.xpose.msk.msra.mxu0 %vm176_vm0, %v684_v31  ;;  %6126 = vmatpush3.xpose.msk.msra.mxu1 %vm176_vm0, %v716_v21  ;;  %v589_v31 = vld [vmem:[#allocation8 + $0x88] sm:$0xff]  ;;  %v802_v21 = vmul.f32 %v7895_v20, %v585_v13 }
 0x165   :  { %6079 = vmatprep.subr.msk.mxu0 %vm176_vm0, %v699_v32  ;;  %6127 = vmatprep.subr.msk.mxu1 %vm176_vm0, %v731_v34  ;;  %v575_v32 = vadd.f32 %v6735_v58, %v7871_v1  ;;  %v817_v34 = vmul.f32 %v7878_v12, %v580_v29 }
 0x168   :  { %6080 = vmatpush3.xpose.msk.msra.mxu0 %vm176_vm0, %v683_v22  ;;  %6128 = vmatpush3.xpose.msk.msra.mxu1 %vm176_vm0, %v715_v41  ;;  %v590_v22 = vld [vmem:[#allocation8 + $0x90] sm:$0xff]  ;;  %v801_v41 = vmul.f32 %v7895_v20, %v580_v29  ;;  %v810_v29 = vmul.f32 %v7878_v12, %v545_v51 }
 0x169   :  { %6081 = vmatprep.subr.msk.mxu0 %vm176_vm0, %v698_v43  ;;  %6129 = vmatprep.subr.msk.mxu1 %vm176_vm0, %v730_v44  ;;  %v570_v43 = vadd.f32 %v7871_v1, %v569_v2  ;;  %v7938_v44 = vmul.f32 %v7881_v3, %v575_v32 }
 0x16b   :  { %v7954_v17 = vmul.f32 %v7881_v3, %v570_v43 }
 0x16c   :  { %6082 = vmatpush3.xpose.msk.msra.mxu0 %vm176_vm0, %v682_v47  ;;  %6130 = vmatpush3.xpose.msk.msra.mxu1 %vm176_vm0, %v714_v48  ;;  %v800_v47 = vmul.f32 %v7895_v20, %v575_v32  ;;  %v7947_v48 = vmul.f32 %v7904_v27, %v575_v32 }
 0x16d   :  { %6083 = vmatprep.subr.msk.mxu0 %vm176_vm0, %v697_v49  ;;  %6131 = vmatprep.subr.msk.mxu1 %vm176_vm0, %v729_v50  ;;  %v565_v49 = vadd.f32 %v7845_v52, %v7871_v1  ;;  %v815_v50 = vmul.f32 %v7878_v12, %v570_v43  ;;  %v799_v52 = vmul.f32 %v7895_v20, %v570_v43 }
 0x16f   :  { %v7970_v58 = vmul.f32 %v7881_v3, %v565_v49  ;;  %v7979_v11 = vmul.f32 %v7904_v27, %v565_v49 }
 0x170   :  { %6084 = vmatpush3.xpose.msk.msra.mxu0 %vm176_vm0, %v681_v53  ;;  %6132 = vmatpush3.xpose.msk.msra.mxu1 %vm176_vm0, %v713_v54  ;;  %v592_v53 = vld [vmem:[#allocation8 + $0xa0] sm:$0xff]  ;;  %v7963_v54 = vmul.f32 %v7904_v27, %v570_v43  ;;  %v525_v43 = vadd.f32 %v7769_v15, %v7871_v1 }
 0x171   :  { %6085 = vmatprep.subr.msk.mxu0 %vm176_vm0, %v696_v55  ;;  %6133 = vmatprep.subr.msk.mxu1 %vm176_vm0, %v728_v56  ;;  %v560_v55 = vadd.f32 %v7871_v1, %v7856_v57  ;;  %v814_v56 = vmul.f32 %v7878_v12, %v565_v49  ;;  %v798_v57 = vmul.f32 %v7895_v20, %v565_v49 }
 0x172   :  { %v520_v49 = vadd.f32 %v7871_v1, %v7783_v25  ;;  %v806_v25 = vmul.f32 %v7878_v12, %v525_v43 }
 0x173   :  { %v7995_v2 = vmul.f32 %v7904_v27, %v560_v55 }
 0x174   :  { %6086 = vmatpush3.xpose.msk.msra.mxu0 %vm176_vm0, %v680_v60  ;;  %6134 = vmatpush3.xpose.msk.msra.mxu1 %vm176_vm0, %v712_v61  ;;  %v555_v60 = vadd.f32 %v7829_v46, %v7871_v1  ;;  %v813_v61 = vmul.f32 %v7878_v12, %v560_v55  ;;  %v797_v46 = vmul.f32 %v7895_v20, %v560_v55 }
 0x175   :  { %6087 = vmatprep.subr.msk.mxu0 %vm176_vm0, %v695_v62  ;;  %6135 = vmatprep.subr.msk.mxu1 %vm176_vm0, %v727_v63  ;;  %v7986_v62 = vmul.f32 %v7881_v3, %v560_v55  ;;  %v594_v63 = vld [vmem:[#allocation8 + $0xb0] sm:$0xff]  ;;  %v515_v55 = vadd.f32 %v7743_v0, %v7871_v1  ;;  %v805_v0 = vmul.f32 %v7878_v12, %v520_v49 }
 0x176   :  { %v812_v4 = vmul.f32 %v7878_v12, %v555_v60  ;;  %v796_v13 = vmul.f32 %v7895_v20, %v555_v60 }
 0x178   :  { %6088 = vmatpush3.xpose.msk.msra.mxu0 %vm176_vm0, %v679_v6  ;;  %6136 = vmatpush3.xpose.msk.msra.mxu1 %vm176_vm0, %v711_v7  ;;  %v8002_v6 = vmul.f32 %v7881_v3, %v555_v60  ;;  %v595_v7 = vld [vmem:[#allocation8 + $0xb8] sm:$0xff] }
 0x179   :  { %6089 = vmatprep.subr.msk.mxu0 %vm176_vm0, %v694_v14  ;;  %6137 = vmatprep.subr.msk.mxu1 %vm176_vm0, %v726_v18  ;;  %v8013_v14 = vmul.f32 %v7904_v27, %v555_v60  ;;  %v811_v18 = vmul.f32 %v7878_v12, %v550_v24  ;;  %v510_v60 = vadd.f32 %v7871_v1, %v7755_v5 }
 0x17a   :  { %v804_v5 = vmul.f32 %v7878_v12, %v515_v55 }
 0x17c   :  { %6090 = vmatpush3.xpose.msk.msra.mxu0 %vm176_vm0, %v678_v26  ;;  %6138 = vmatpush3.xpose.msk.msra.mxu1 %vm176_vm0, %v710_v28  ;;  %v8028_v26 = vmul.f32 %v7904_v27, %v550_v24  ;;  %v535_v28 = vadd.f32 %v7797_v30, %v7871_v1  ;;  %v530_v30 = vadd.f32 %v7871_v1, %v7807_v35 }
 0x17d   :  { %6155 = vmatprep.subr.mxu0 %v818_v9  ;;  %7003 = vmatprep.subr.mxu1 %v7901_v23  ;;  %v795_v9 = vmul.f32 %v7895_v20, %v550_v24  ;;  %v8106_v1 = vmul.f32 %v7881_v3, %v515_v55  ;;  %v788_v24 = vmul.f32 %v7895_v20, %v515_v55 }
 0x17e   :  { %v808_v35 = vmul.f32 %v7878_v12, %v535_v28  ;;  %v807_v15 = vmul.f32 %v7878_v12, %v530_v30 }
 0x17f   :  { %6092 = vmatmul.mubr.msk.f32.vlgmr.msra.gmra.mxu0 %vm176_vm0, %v7655_v8  ;;  %6140 = vmatmul.mubr.msk.f32.vlgmr.msra.gmra.mxu1 %vm176_vm0, %v7655_v8  ;;  %v816_v8 = vmul.f32 %v7878_v12, %v575_v32  ;;  %v809_v32 = vmul.f32 %v7878_v12, %v540_v40 }
 0x180   :  { %6093 = vmatprep.mubr.msk.f32.mxu0 %vm176_vm0, %v589_v31  ;;  %6141 = vmatprep.mubr.msk.f32.mxu1 %vm176_vm0, %v589_v31 }
 0x181   :  { %6156 = vmatpush3.msra.mxu0 %v802_v21  ;;  %7019 = vmatpush3.msra.mxu1 %v7916_v33  ;;  %v8040_v21 = vmul.f32 %v7904_v27, %v545_v51 }
 0x182   :  { %6157 = vmatprep.subr.mxu0 %v817_v34  ;;  %7004 = vmatprep.subr.mxu1 %v7921_v10  ;;  %v8048_v34 = vmul.f32 %v7881_v3, %v540_v40 }
 0x183   :  { %6094 = vmatmul.mubr.msk.f32.gmra.mxu0 %vm176_vm0, %v589_v31  ;;  %6142 = vmatmul.mubr.msk.f32.gmra.mxu1 %vm176_vm0, %v589_v31  ;;  %v8035_v31 = vmul.f32 %v7881_v3, %v545_v51  ;;  %v8116_v51 = vmul.f32 %v7881_v3, %v510_v60 }
 0x184   :  { %6095 = vmatprep.mubr.msk.f32.mxu0 %vm176_vm0, %v590_v22  ;;  %6143 = vmatprep.mubr.msk.f32.mxu1 %vm176_vm0, %v590_v22 }
 0x185   :  { %6158 = vmatpush3.msra.mxu0 %v801_v41  ;;  %7020 = vmatpush3.msra.mxu1 %v7932_v42  ;;  %v8053_v41 = vmul.f32 %v7904_v27, %v540_v40  ;;  %9505 = vst [vmem:[#allocation29_spill] sm:$0xff] %v8116_v51 }
 0x186   :  { %6159 = vmatprep.subr.mxu0 %v816_v8  ;;  %7005 = vmatprep.subr.mxu1 %v7938_v44  ;;  %v8060_v8 = vmul.f32 %v7881_v3, %v535_v28 }
 0x187   :  { %6096 = vmatmul.mubr.msk.f32.gmra.mxu0 %vm176_vm0, %v590_v22  ;;  %6144 = vmatmul.mubr.msk.f32.gmra.mxu1 %vm176_vm0, %v590_v22  ;;  %v793_v22 = vmul.f32 %v7895_v20, %v540_v40  ;;  %v596_v40 = vld [vmem:[#allocation10] sm:$0xff] }
 0x188   :  { %6097 = vmatprep.mubr.msk.f32.mxu0 %vm176_vm0, %v591_v16  ;;  %6145 = vmatprep.mubr.msk.f32.mxu1 %vm176_vm0, %v591_v16 }
 0x189   :  { %6160 = vmatpush3.msra.mxu0 %v800_v47  ;;  %7021 = vmatpush3.msra.mxu1 %v7947_v48  ;;  %v8065_v47 = vmul.f32 %v7904_v27, %v535_v28 }
 0x18a   :  { %6161 = vmatprep.subr.mxu0 %v815_v50  ;;  %7006 = vmatprep.subr.mxu1 %v7954_v17  ;;  %v8072_v50 = vmul.f32 %v7881_v3, %v530_v30 }
 0x18b   :  { %6098 = vmatmul.mubr.msk.f32.gmra.mxu0 %vm176_vm0, %v591_v16  ;;  %6146 = vmatmul.mubr.msk.f32.gmra.mxu1 %vm176_vm0, %v591_v16  ;;  %v792_v16 = vmul.f32 %v7895_v20, %v535_v28 }
 0x18c   :  { %6099 = vmatprep.mubr.msk.f32.mxu0 %vm176_vm0, %v592_v53  ;;  %6147 = vmatprep.mubr.msk.f32.mxu1 %vm176_vm0, %v592_v53 }
 0x18d   :  { %6162 = vmatpush3.msra.mxu0 %v799_v52  ;;  %7022 = vmatpush3.msra.mxu1 %v7963_v54  ;;  %v8077_v52 = vmul.f32 %v7904_v27, %v530_v30 }
 0x18e   :  { %6163 = vmatprep.subr.mxu0 %v814_v56  ;;  %7007 = vmatprep.subr.mxu1 %v7970_v58  ;;  %v8084_v56 = vmul.f32 %v7881_v3, %v525_v43 }
 0x18f   :  { %6100 = vmatmul.mubr.msk.f32.gmra.mxu0 %vm176_vm0, %v592_v53  ;;  %6148 = vmatmul.mubr.msk.f32.gmra.mxu1 %vm176_vm0, %v592_v53  ;;  %v791_v53 = vmul.f32 %v7895_v20, %v530_v30 }
 0x190   :  { %6101 = vmatprep.mubr.msk.f32.mxu0 %vm176_vm0, %v593_v59  ;;  %6149 = vmatprep.mubr.msk.f32.mxu1 %vm176_vm0, %v593_v59 }
 0x191   :  { %6164 = vmatpush3.msra.mxu0 %v798_v57  ;;  %7023 = vmatpush3.msra.mxu1 %v7979_v11  ;;  %v8089_v57 = vmul.f32 %v7904_v27, %v525_v43 }
 0x192   :  { %6165 = vmatprep.subr.mxu0 %v813_v61  ;;  %7008 = vmatprep.subr.mxu1 %v7986_v62  ;;  %v8096_v61 = vmul.f32 %v7881_v3, %v520_v49 }
 0x193   :  { %6102 = vmatmul.mubr.msk.f32.gmra.mxu0 %vm176_vm0, %v593_v59  ;;  %6150 = vmatmul.mubr.msk.f32.gmra.mxu1 %vm176_vm0, %v593_v59  ;;  %v790_v59 = vmul.f32 %v7895_v20, %v525_v43 }
 0x194   :  { %6103 = vmatprep.mubr.msk.f32.mxu0 %vm176_vm0, %v594_v63  ;;  %6151 = vmatprep.mubr.msk.f32.mxu1 %vm176_vm0, %v594_v63 }
 0x195   :  { %6166 = vmatpush3.msra.mxu0 %v797_v46  ;;  %7024 = vmatpush3.msra.mxu1 %v7995_v2  ;;  %v8101_v46 = vmul.f32 %v7904_v27, %v520_v49 }
 0x196   :  { %6167 = vmatprep.subr.mxu0 %v812_v4  ;;  %7009 = vmatprep.subr.mxu1 %v8002_v6  ;;  %v8111_v4 = vmul.f32 %v7904_v27, %v515_v55 }
 0x197   :  { %6104 = vmatmul.mubr.msk.f32.gmra.mxu0 %vm176_vm0, %v594_v63  ;;  %6152 = vmatmul.mubr.msk.f32.gmra.mxu1 %vm176_vm0, %v594_v63  ;;  %v789_v63 = vmul.f32 %v7895_v20, %v520_v49 }
 0x198   :  { %6105 = vmatprep.mubr.msk.f32.mxu0 %vm176_vm0, %v595_v7  ;;  %6153 = vmatprep.mubr.msk.f32.mxu1 %vm176_vm0, %v595_v7  ;;  %9504 = vst [vmem:[#allocation28_spill] sm:$0xff] %v8111_v4 }
 0x199   :  { %6168 = vmatpush3.msra.mxu0 %v796_v13  ;;  %7025 = vmatpush3.msra.mxu1 %v8013_v14  ;;  %v787_v13 = vmul.f32 %v7895_v20, %v510_v60  ;;  %v606_v20 = vld [vmem:[#allocation10 + $0x50] sm:$0xff] }
 0x19a   :  { %6169 = vmatprep.subr.mxu0 %v811_v18  ;;  %7010 = vmatprep.subr.mxu1 %v8018_v19  ;;  %v8121_v18 = vmul.f32 %v7904_v27, %v510_v60 }
 0x19b   :  { %6106 = vmatmul.mubr.msk.f32.gmra.mxu0 %vm176_vm0, %v595_v7  ;;  %6154 = vmatmul.mubr.msk.f32.gmra.mxu1 %vm176_vm0, %v595_v7  ;;  %v803_v7 = vmul.f32 %v7878_v12, %v510_v60  ;;  %v601_v60 = vld [vmem:[#allocation10 + $0x28] sm:$0xff] }
 0x19c   :  { %6170 = vmatpush3.msra.mxu0 %v795_v9  ;;  %7026 = vmatpush3.msra.mxu1 %v8028_v26  ;;  %9506 = vst [vmem:[#allocation30_spill] sm:$0xff] %v8121_v18 }
 0x19d   :  { %6171 = vmatprep.subr.mxu0 %v810_v29  ;;  %7011 = vmatprep.subr.mxu1 %v8035_v31 }
 0x19e   :  { %6172 = vmatpush3.msra.mxu0 %v794_v45  ;;  %7027 = vmatpush3.msra.mxu1 %v8040_v21  ;;  %v597_v45 = vld [vmem:[#allocation10 + $0x8] sm:$0xff] }
 0x19f   :  { %6173 = vmatprep.subr.mxu0 %v809_v32  ;;  %7012 = vmatprep.subr.mxu1 %v8048_v34 }
 0x1a0   :  { %6174 = vmatpush3.msra.mxu0 %v793_v22  ;;  %7028 = vmatpush3.msra.mxu1 %v8053_v41 }
 0x1a1   :  { %6175 = vmatprep.subr.mxu0 %v808_v35  ;;  %7013 = vmatprep.subr.mxu1 %v8060_v8 }
 0x1a2   :  { %6176 = vmatpush3.msra.mxu0 %v792_v16  ;;  %7029 = vmatpush3.msra.mxu1 %v8065_v47 }
 0x1a3   :  { %6177 = vmatprep.subr.mxu0 %v807_v15  ;;  %7014 = vmatprep.subr.mxu1 %v8072_v50 }
 0x1a4   :  { %6178 = vmatpush3.msra.mxu0 %v791_v53  ;;  %7030 = vmatpush3.msra.mxu1 %v8077_v52  ;;  %v600_v53 = vld [vmem:[#allocation10 + $0x20] sm:$0xff] }
 0x1a5   :  { %6179 = vmatprep.subr.mxu0 %v806_v25  ;;  %7015 = vmatprep.subr.mxu1 %v8084_v56 }
 0x1a6   :  { %6180 = vmatpush3.msra.mxu0 %v790_v59  ;;  %7031 = vmatpush3.msra.mxu1 %v8089_v57 }
 0x1a7   :  { %6181 = vmatprep.subr.mxu0 %v805_v0  ;;  %7016 = vmatprep.subr.mxu1 %v8096_v61 }
 0x1a8   :  { %6182 = vmatpush3.msra.mxu0 %v789_v63  ;;  %7032 = vmatpush3.msra.mxu1 %v8101_v46 }
 0x1a9   :  { %6183 = vmatprep.subr.mxu0 %v804_v5  ;;  %7017 = vmatprep.subr.mxu1 %v8106_v1 }
 0x1aa   :  { %6184 = vmatpush3.msra.mxu0 %v788_v24  ;;  %7033 = vmatpush3.msra.mxu1 %v8111_v4  ;;  %v604_v24 = vld [vmem:[#allocation10 + $0x40] sm:$0xff] }
 0x1ab   :  { %6185 = vmatprep.subr.mxu0 %v803_v7  ;;  %7018 = vmatprep.subr.mxu1 %v8116_v51 }
 0x1ac   :  { %6186 = vmatpush3.msra.mxu0 %v787_v13  ;;  %7034 = vmatpush3.msra.mxu1 %v8121_v18 }
 0x1ad   :  { %6211 = vmatprep.subr.mxu0 %v7901_v23 }
 0x23f   :  { %v1133_v9 = vpop.f32.mrf.mxu0  ;;  %v1246_v28 = vpop.f32.mrf.mxu1 }
 0x240   :  { %v5743_v29 = vclamps-f32 %v1133_v9, 5.0 }
 0x241   :  { %v1135_v30 = vpop.f32.mrf.mxu0  ;;  %v8128_v32 = vpop.f32.mrf.mxu1 }
 0x242   :  { %v1357_v22 = vadd.f32 %v5743_v29, %v596_v40  ;;  %v5744_v43 = vclamps-f32 %v1135_v30, 5.0 }
 0x243   :  { %v1139_v35 = vpop.f32.mrf.mxu0  ;;  %v8130_v16 = vpop.f32.mrf.mxu1 }
 0x244   :  { %v1389_v49 = vmin.f32 %v1357_v22, 5.0  ;;  %v1358_v15 = vadd.f32 %v5744_v43, %v597_v45  ;;  %v5747_v55 = vclamps-f32 %v1139_v35, 5.0  ;;  %v5745_v43 = vclamps-f32 %v1246_v28, 5.0 }
 0x245   :  { %v1141_v25 = vpop.f32.mrf.mxu0  ;;  %v8132_v59 = vpop.f32.mrf.mxu1 }
 0x246   :  { %v1390_v23 = vmin.f32 %v1358_v15, 5.0  ;;  %v1421_v0 = vmul.f32 1.442695, %v1389_v49  ;;  %v1361_v63 = vadd.f32 %v5747_v55, %v600_v53  ;;  %v5748_v5 = vclamps-f32 %v1141_v25, 5.0  ;;  %v598_v15 = vld [vmem:[#allocation10 + $0x10] sm:$0xff]  ;;  %v605_v49 = vld [vmem:[#allocation10 + $0x48] sm:$0xff] }
 0x247   :  { %v1145_v7 = vpop.f32.mrf.mxu0  ;;  %v1258_v13 = vpop.f32.mrf.mxu1 }
 0x248   :  { %v1423_v40 = vmul.f32 1.442695, %v1390_v23  ;;  %v5751_v9 = vclamps-f32 %v1145_v7, 5.0  ;;  %v1393_v29 = vmin.f32 %v1361_v63, 5.0  ;;  %v1362_v30 = vadd.f32 %v5748_v5, %v601_v60  ;;  %v607_v7 = vld [vmem:[#allocation10 + $0x58] sm:$0xff]  ;;  %v608_v63 = vld [vmem:[#allocation10 + $0x60] sm:$0xff] }
 0x249   :  { %v1147_v22 = vpop.f32.mrf.mxu0  ;;  %v1260_v45 = vpop.f32.mrf.mxu1  ;;  %v5753_v27 = vclamps-f32 %v1258_v13, 5.0 }
 0x24a   :  { %7052 = vpow2.f32 %v1423_v40  ;;  %v1365_v35 = vadd.f32 %v5751_v9, %v604_v24  ;;  %v1394_v12 = vmin.f32 %v1362_v30, 5.0  ;;  %v1429_v25 = vmul.f32 1.442695, %v1393_v29 }
 0x24b   :  { %7054 = vpow2.f32 %v1421_v0  ;;  %v1151_v53 = vpop.f32.mrf.mxu0  ;;  %v1264_v55 = vpop.f32.mrf.mxu1  ;;  %v1367_v38 = vadd.f32 %v5753_v27, %v606_v20  ;;  %v5752_v23 = vclamps-f32 %v1147_v22, 5.0  ;;  %v5754_v5 = vclamps-f32 %v1260_v45, 5.0  ;;  %v609_v20 = vld [vmem:[#allocation10 + $0x68] sm:$0xff]  ;;  %v611_v0 = vld [vmem:[#allocation10 + $0x78] sm:$0xff] }
 0x24c   :  { %v1397_v3 = vmin.f32 %v1365_v35, 5.0  ;;  %v1431_v60 = vmul.f32 1.442695, %v1394_v12  ;;  %v5755_v39 = vclamps-f32 %v1151_v53, 5.0  ;;  %v8134_v40 = vadd.f32 %v5745_v43, %v598_v15  ;;  %v610_v35 = vld [vmem:[#allocation10 + $0x70] sm:$0xff] }
 0x24d   :  { %v1153_v36 = vpop.f32.mrf.mxu0  ;;  %v1266_v28 = vpop.f32.mrf.mxu1  ;;  %v1399_v13 = vmin.f32 %v1367_v38, 5.0  ;;  %v1366_v9 = vadd.f32 %v5752_v23, %v605_v49  ;;  %v1368_v30 = vadd.f32 %v5754_v5, %v607_v7  ;;  %v5757_v45 = vclamps-f32 %v1264_v55, 5.0 }
 0x24e   :  { %v1437_v24 = vmul.f32 1.442695, %v1397_v3  ;;  %7056 = vpow2.f32 %v1431_v60  ;;  %v1369_v29 = vadd.f32 %v5755_v39, %v608_v63  ;;  %v5756_v53 = vclamps-f32 %v1153_v36, 5.0 }
 0x24f   :  { %v1157_v27 = vpop.f32.mrf.mxu0  ;;  %v1270_v22 = vpop.f32.mrf.mxu1  ;;  %7058 = vpow2.f32 %v1429_v25  ;;  %v1441_v12 = vmul.f32 1.442695, %v1399_v13  ;;  %v1398_v43 = vmin.f32 %v1366_v9, 5.0  ;;  %v1400_v15 = vmin.f32 %v1368_v30, 5.0  ;;  %v614_v30 = vld [vmem:[#allocation10 + $0x90] sm:$0xff] }
 0x250   :  { %v1401_v18 = vmin.f32 %v1369_v29, 5.0  ;;  %7060 = vpow2.f32 %v1437_v24  ;;  %v1371_v49 = vadd.f32 %v5757_v45, %v610_v35  ;;  %v1370_v23 = vadd.f32 %v5756_v53, %v609_v20  ;;  %v613_v29 = vld [vmem:[#allocation10 + $0x88] sm:$0xff]  ;;  %v615_v24 = vld [vmem:[#allocation10 + $0x98] sm:$0xff] }
 0x251   :  { %v1159_v3 = vpop.f32.mrf.mxu0  ;;  %v1272_v38 = vpop.f32.mrf.mxu1  ;;  %v5758_v39 = vclamps-f32 %v1266_v28, 5.0  ;;  %7062 = vpow2.f32 %v1441_v12  ;;  %v1439_v7 = vmul.f32 1.442695, %v1398_v43  ;;  %v1443_v63 = vmul.f32 1.442695, %v1400_v15 }
 0x252   :  { %v1445_v60 = vmul.f32 1.442695, %v1401_v18  ;;  %v1403_v55 = vmin.f32 %v1371_v49, 5.0  ;;  %v1402_v36 = vmin.f32 %v1370_v23, 5.0  ;;  %v5759_v9 = vclamps-f32 %v1157_v27, 5.0  ;;  %v616_v27 = vld [vmem:[#allocation10 + $0xa0] sm:$0xff] }
 0x253   :  { %v1163_v25 = vpop.f32.mrf.mxu0  ;;  %v1276_v5 = vpop.f32.mrf.mxu1  ;;  %v1372_v13 = vadd.f32 %v5758_v39, %v611_v0  ;;  %7064 = vpow2.f32 %v1439_v7  ;;  %v5761_v51 = vclamps-f32 %v1270_v22, 5.0  ;;  %v5760_v4 = vclamps-f32 %v1159_v3, 5.0  ;;  %v599_v22 = vld [vmem:[#allocation10 + $0x18] sm:$0xff] }
 0x254   :  { %v5762_v35 = vclamps-f32 %v1272_v38, 5.0  ;;  %7066 = vpow2.f32 %v1443_v63  ;;  %v1449_v12 = vmul.f32 1.442695, %v1403_v55  ;;  %v1447_v18 = vmul.f32 1.442695, %v1402_v36 }
 0x255   :  { %v1165_v20 = vpop.f32.mrf.mxu0  ;;  %v8138_v28 = vpop.f32.mrf.mxu1  ;;  %v1404_v45 = vmin.f32 %v1372_v13, 5.0  ;;  %7068 = vpow2.f32 %v1445_v60  ;;  %v1373_v43 = vadd.f32 %v5759_v9, %v612_v37  ;;  %v1375_v0 = vadd.f32 %v5761_v51, %v614_v30  ;;  %v618_v13 = vld [vmem:[#allocation10 + $0xb0] sm:$0xff]  ;;  %v617_v60 = vld [vmem:[#allocation10 + $0xa8] sm:$0xff]  ;;  %v619_v9 = vld [vmem:[#allocation10 + $0xb8] sm:$0xff] }
 0x256   :  { %v1374_v15 = vadd.f32 %v5760_v4, %v613_v29  ;;  %7070 = vpow2.f32 %v1449_v12  ;;  %v1376_v38 = vadd.f32 %v5762_v35, %v615_v24  ;;  %v5763_v7 = vclamps-f32 %v1163_v25, 5.0 }
 0x257   :  { %v7053_v53 = vpop.eup %7052  ;;  %v1169_v49 = vpop.f32.mrf.mxu0  ;;  %v1451_v3 = vmul.f32 1.442695, %v1404_v45  ;;  %7072 = vpow2.f32 %v1447_v18  ;;  %v1405_v63 = vmin.f32 %v1373_v43, 5.0  ;;  %v1407_v55 = vmin.f32 %v1375_v0, 5.0 }
 0x258   :  { %v1282_v23 = vpop.f32.mrf.mxu1  ;;  %v7055_v39 = vpop.eup %7054  ;;  %1549 = vmatprep.mubr.f32.mxu0 %v7053_v53  ;;  %v1406_v36 = vmin.f32 %v1374_v15, 5.0  ;;  %v1408_v37 = vmin.f32 %v1376_v38, 5.0  ;;  %v1377_v51 = vadd.f32 %v5763_v7, %v616_v27  ;;  %v5765_v4 = vclamps-f32 %v1276_v5, 5.0  ;;  %v620_v15 = vld [vmem:[#allocation10 + $0xc0] sm:$0xff]  ;;  %v622_v27 = vld [vmem:[#allocation10 + $0xd0] sm:$0xff] }
 0x259   :  { %1550 = vmatmul.mubr.f32.vlgmr.msra.gmra.mxu0 %v7055_v39  ;;  %7074 = vpow2.f32 %v1451_v3  ;;  %v1171_v30 = vpop.f32.mrf.mxu0  ;;  %v9507_v25 = vclamps-f32 %v8128_v32, 5.0  ;;  %v1453_v35 = vmul.f32 1.442695, %v1405_v63  ;;  %v1457_v12 = vmul.f32 1.442695, %v1407_v55 }
 0x25a   :  { %v8140_v29 = vpop.f32.mrf.mxu1  ;;  %6212 = vmatpush3.msra.mxu0 %v7916_v33  ;;  %v1455_v18 = vmul.f32 1.442695, %v1406_v36  ;;  %v1459_v53 = vmul.f32 1.442695, %v1408_v37  ;;  %v1409_v43 = vmin.f32 %v1377_v51, 5.0  ;;  %v1379_v5 = vadd.f32 %v5765_v4, %v618_v13  ;;  %v621_v13 = vld [vmem:[#allocation10 + $0xc8] sm:$0xff] }
 0x25b   :  { %v8145_v24 = vadd.f32 %v9507_v25, %v599_v22  ;;  %6213 = vmatprep.subr.mxu0 %v7921_v10  ;;  %v7057_v45 = vpop.eup %7056  ;;  %v5764_v0 = vclamps-f32 %v1165_v20, 5.0  ;;  %7076 = vpow2.f32 %v1453_v35  ;;  %v5766_v33 = vclamps-f32 %v8138_v28, 5.0  ;;  %v1175_v7 = vpop.f32.mrf.mxu0  ;;  %v623_v25 = vld [vmem:[#allocation10 + $0xd8] sm:$0xff] }
 0x25c   :  { %6214 = vmatpush3.msra.mxu0 %v7932_v42  ;;  %v7059_v39 = vpop.eup %7058  ;;  %v5767_v32 = vclamps-f32 %v1169_v49, 5.0  ;;  %v5769_v22 = vclamps-f32 %v1282_v23, 5.0  ;;  %1554 = vmatprep.mubr.f32.mxu0 %v7057_v45  ;;  %7078 = vpow2.f32 %v1457_v12  ;;  %v1461_v10 = vmul.f32 1.442695, %v1409_v43  ;;  %v8151_v63 = vpop.f32.mrf.mxu1 }
 0x25d   :  { %6215 = vmatprep.subr.mxu0 %v7938_v44  ;;  %v1411_v3 = vmin.f32 %v1379_v5, 5.0  ;;  %v1378_v38 = vadd.f32 %v5764_v0, %v617_v60  ;;  %1555 = vmatmul.mubr.f32.gmra.mxu0 %v7059_v39  ;;  %v7061_v20 = vpop.eup %7060  ;;  %7080 = vpow2.f32 %v1455_v18  ;;  %v1380_v42 = vadd.f32 %v5766_v33, %v619_v9  ;;  %v624_v18 = vld [vmem:[#allocation10 + $0xe0] sm:$0xff]  ;;  %v1177_v45 = vpop.f32.mrf.mxu0  ;;  %v627_v39 = vld [vmem:[#allocation10 + $0xf8] sm:$0xff] }
 0x25e   :  { %v1381_v55 = vadd.f32 %v5767_v32, %v620_v15  ;;  %v1383_v36 = vadd.f32 %v5769_v22, %v622_v27  ;;  %6216 = vmatpush3.msra.mxu0 %v7947_v48  ;;  %v7063_v28 = vpop.eup %7062  ;;  %7082 = vpow2.f32 %v1459_v53  ;;  %v5768_v23 = vclamps-f32 %v1171_v30, 5.0  ;;  %v1290_v53 = vpop.f32.mrf.mxu1  ;;  %v626_v27 = vld [vmem:[#allocation10 + $0xf0] sm:$0xff] }
 0x25f   :  { %v1465_v49 = vmul.f32 1.442695, %v1411_v3  ;;  %v1410_v44 = vmin.f32 %v1378_v38, 5.0  ;;  %6217 = vmatprep.subr.mxu0 %v7954_v17  ;;  %v5750_v37 = vclamps-f32 %v8132_v59, 5.0  ;;  %v1412_v51 = vmin.f32 %v1380_v42, 5.0 }
 0x260   :  { %v1413_v4 = vmin.f32 %v1381_v55, 5.0  ;;  %v1415_v60 = vmin.f32 %v1383_v36, 5.0  ;;  %6218 = vmatpush3.msra.mxu0 %v7963_v54  ;;  %v7065_v9 = vpop.eup %7064  ;;  %7084 = vpow2.f32 %v1461_v10  ;;  %v1382_v12 = vadd.f32 %v5768_v23, %v621_v13 }
 0x261   :  { %v1463_v35 = vmul.f32 1.442695, %v1410_v44  ;;  %v5770_v48 = vclamps-f32 %v8140_v29, 5.0  ;;  %6219 = vmatprep.subr.mxu0 %v7970_v58  ;;  %v7067_v17 = vpop.eup %7066  ;;  %7086 = vpow2.f32 %v1465_v49  ;;  %v1467_v59 = vmul.f32 1.442695, %v1412_v51  ;;  %1559 = vmatprep.mubr.f32.mxu0 %v7065_v9  ;;  %v625_v29 = vld [vmem:[#allocation10 + $0xe8] sm:$0xff] }
 0x262   :  { %v1469_v30 = vmul.f32 1.442695, %v1413_v4  ;;  %v1473_v43 = vmul.f32 1.442695, %v1415_v60  ;;  %6220 = vmatpush3.msra.mxu0 %v7979_v11  ;;  %v7069_v54 = vpop.eup %7068  ;;  %v1414_v5 = vmin.f32 %v1382_v12, 5.0  ;;  %v5771_v15 = vclamps-f32 %v1175_v7, 5.0  ;;  %1664 = vmatprep.mubr.f32.mxu1 %v7067_v17 }
 0x263   :  { %7088 = vpow2.f32 %v1463_v35  ;;  %v1384_v0 = vadd.f32 %v5770_v48, %v623_v25  ;;  %1560 = vmatmul.mubr.f32.gmra.mxu0 %v7061_v20  ;;  %v7071_v33 = vpop.eup %7070  ;;  %v603_v58 = vld [vmem:[#allocation10 + $0x38] sm:$0xff]  ;;  %v5773_v32 = vclamps-f32 %v8151_v63, 5.0  ;;  %v5772_v22 = vclamps-f32 %v1177_v45, 5.0  ;;  %1665 = vmatmul.mubr.f32.vlgmr.msra.gmra.mxu1 %v7063_v28  ;;  %v602_v63 = vld [vmem:[#allocation10 + $0x30] sm:$0xff] }
 0x264   :  { %7090 = vpow2.f32 %v1467_v59  ;;  %v5774_v10 = vclamps-f32 %v1290_v53, 5.0  ;;  %6221 = vmatprep.subr.mxu0 %v7986_v62  ;;  %v7073_v11 = vpop.eup %7072  ;;  %v1392_v3 = vmin.f32 %v8145_v24, 5.0  ;;  %v1471_v38 = vmul.f32 1.442695, %v1414_v5 }
 0x265   :  { %v1416_v7 = vmin.f32 %v1384_v0, 5.0  ;;  %v1385_v42 = vadd.f32 %v5771_v15, %v624_v18  ;;  %6222 = vmatpush3.msra.mxu0 %v7995_v2  ;;  %7092 = vpow2.f32 %v1469_v30  ;;  %v1387_v20 = vadd.f32 %v5773_v32, %v626_v27  ;;  %1564 = vmatprep.mubr.f32.mxu0 %v7073_v11  ;;  %v9509_v30 = vld [vmem:[#allocation28_spill] sm:$0xff] }
 0x266   :  { %v7075_v55 = vpop.eup %7074  ;;  %v1386_v36 = vadd.f32 %v5772_v22, %v625_v29  ;;  %v1388_v13 = vadd.f32 %v5774_v10, %v627_v39  ;;  %6223 = vmatprep.subr.mxu0 %v8002_v6  ;;  %v1364_v28 = vadd.f32 %v5750_v37, %v603_v58  ;;  %7094 = vpow2.f32 %v1471_v38 }
 0x267   :  { %v1475_v62 = vmul.f32 1.442695, %v1416_v7  ;;  %v1417_v49 = vmin.f32 %v1385_v42, 5.0  ;;  %1669 = vmatprep.mubr.f32.mxu1 %v7075_v55  ;;  %1565 = vmatmul.mubr.f32.gmra.mxu0 %v7069_v54  ;;  %7096 = vpow2.f32 %v1473_v43  ;;  %v1419_v24 = vmin.f32 %v1387_v20, 5.0  ;;  %v9510_v43 = vld [vmem:[#allocation29_spill] sm:$0xff] }
 0x268   :  { %v1418_v44 = vmin.f32 %v1386_v36, 5.0  ;;  %v1420_v23 = vmin.f32 %v1388_v13, 5.0  ;;  %6224 = vmatpush3.msra.mxu0 %v8013_v14  ;;  %1670 = vmatmul.mubr.f32.gmra.mxu1 %v7071_v33  ;;  %v7077_v2 = vpop.eup %7076  ;;  %v1391_v51 = vmin.f32 %v8134_v40, 5.0  ;;  %v9508_v37 = vclamps-f32 %v8130_v16, 5.0 }
 0x269   :  { %7098 = vpow2.f32 %v1475_v62  ;;  %v1477_v4 = vmul.f32 1.442695, %v1417_v49  ;;  %6225 = vmatprep.subr.mxu0 %v8018_v19  ;;  %v7079_v6 = vpop.eup %7078  ;;  %v1481_v25 = vmul.f32 1.442695, %v1419_v24  ;;  %v1396_v48 = vmin.f32 %v1364_v28, 5.0 }
 0x26a   :  { %v1363_v60 = vadd.f32 %v9508_v37, %v602_v63  ;;  %v1479_v9 = vmul.f32 1.442695, %v1418_v44  ;;  %v1483_v35 = vmul.f32 1.442695, %v1420_v23  ;;  %6226 = vmatpush3.msra.mxu0 %v8028_v26  ;;  %v7081_v12 = vpop.eup %7080  ;;  %v1427_v40 = vmul.f32 1.442695, %v1392_v3 }
 0x26b   :  { %7100 = vpow2.f32 %v1477_v4  ;;  %6227 = vmatprep.subr.mxu0 %v8035_v31  ;;  %v7083_v14 = vpop.eup %7082  ;;  %1569 = vmatprep.mubr.f32.mxu0 %v7081_v12  ;;  %v1425_v16 = vmul.f32 1.442695, %v1391_v51  ;;  %v1435_v45 = vmul.f32 1.442695, %v1396_v48 }
 0x26c   :  { %7102 = vpow2.f32 %v1481_v25  ;;  %6228 = vmatpush3.msra.mxu0 %v8040_v21  ;;  %1674 = vmatprep.mubr.f32.mxu1 %v7083_v14  ;;  %v1395_v18 = vmin.f32 %v1363_v60, 5.0 }
 0x26d   :  { %7104 = vpow2.f32 %v1479_v9  ;;  %1570 = vmatmul.mubr.f32.gmra.mxu0 %v7077_v2  ;;  %v7085_v19 = vpop.eup %7084  ;;  %1675 = vmatmul.mubr.f32.gmra.mxu1 %v7079_v6 }
 0x26e   :  { %7106 = vpow2.f32 %v1483_v35  ;;  %6229 = vmatprep.subr.mxu0 %v8048_v34  ;;  %v7087_v26 = vpop.eup %7086  ;;  %v1433_v21 = vmul.f32 1.442695, %v1395_v18 }
 0x26f   :  { %6230 = vmatpush3.msra.mxu0 %v8053_v41  ;;  %7108 = vpow2.f32 %v1427_v40 }
 0x270   :  { %v7089_v31 = vpop.eup %7088  ;;  %6231 = vmatprep.subr.mxu0 %v8060_v8  ;;  %7110 = vpow2.f32 %v1425_v16 }
 0x271   :  { %v7091_v53 = vpop.eup %7090  ;;  %1574 = vmatprep.mubr.f32.mxu0 %v7089_v31  ;;  %6232 = vmatpush3.msra.mxu0 %v8065_v47  ;;  %7112 = vpow2.f32 %v1435_v45 }
 0x272   :  { %1679 = vmatprep.mubr.f32.mxu1 %v7091_v53  ;;  %1575 = vmatmul.mubr.f32.gmra.mxu0 %v7085_v19  ;;  %v7093_v17 = vpop.eup %7092  ;;  %7114 = vpow2.f32 %v1433_v21  ;;  %v631_v21 = vld [vmem:[#allocation8 + $0x118] sm:$0xff] }
 0x273   :  { %1680 = vmatmul.mubr.f32.gmra.mxu1 %v7087_v26  ;;  %6233 = vmatprep.subr.mxu0 %v8072_v50  ;;  %v7095_v34 = vpop.eup %7094 }
 0x274   :  { %6234 = vmatpush3.msra.mxu0 %v8077_v52  ;;  %v7097_v41 = vpop.eup %7096  ;;  %1579 = vmatprep.mubr.f32.mxu0 %v7095_v34 }
 0x275   :  { %6235 = vmatprep.subr.mxu0 %v8084_v56 }
 0x276   :  { %v7099_v8 = vpop.eup %7098  ;;  %1580 = vmatmul.mubr.f32.gmra.mxu0 %v7093_v17  ;;  %v630_v17 = vld [vmem:[#allocation8 + $0x110] sm:$0xff] }
 0x277   :  { %1684 = vmatprep.mubr.f32.mxu1 %v7099_v8  ;;  %6236 = vmatpush3.msra.mxu0 %v8089_v57  ;;  %v9511_v57 = vld [vmem:[#allocation30_spill] sm:$0xff] }
 0x278   :  { %v7101_v47 = vpop.eup %7100  ;;  %1685 = vmatmul.mubr.f32.gmra.mxu1 %v7097_v41  ;;  %6237 = vmatprep.subr.mxu0 %v8096_v61 }
 0x279   :  { %v7103_v59 = vpop.eup %7102  ;;  %6238 = vmatpush3.msra.mxu0 %v8101_v46 }
 0x27a   :  { %v7105_v50 = vpop.eup %7104  ;;  %6239 = vmatprep.subr.mxu0 %v8106_v1 }
 0x27b   :  { %v7107_v52 = vpop.eup %7106  ;;  %1584 = vmatprep.mubr.f32.mxu0 %v7105_v50  ;;  %6240 = vmatpush3.msra.mxu0 %v9509_v30 }
 0x27c   :  { %1689 = vmatprep.mubr.f32.mxu1 %v7107_v52  ;;  %1585 = vmatmul.mubr.f32.gmra.mxu0 %v7101_v47  ;;  %v7109_v56 = vpop.eup %7108  ;;  %v629_v52 = vld [vmem:[#allocation8 + $0x108] sm:$0xff] }
 0x27d   :  { %1690 = vmatmul.mubr.f32.gmra.mxu1 %v7103_v59  ;;  %6241 = vmatprep.subr.mxu0 %v9510_v43  ;;  %v7111_v61 = vpop.eup %7110 }
 0x27e   :  { %1654 = vmatprep.mubr.f32.mxu0 %v7109_v56  ;;  %6242 = vmatpush3.msra.mxu0 %v9511_v57  ;;  %v7113_v54 = vpop.eup %7112  ;;  %v628_v56 = vld [vmem:[#allocation8 + $0x100] sm:$0xff] }
 0x27f   :  { %v7115_v46 = vpop.eup %7114  ;;  %6739 = vmatprep.subr.mxu0 %v631_v21 }
 0x280   :  { %1655 = vmatmul.mubr.f32.vlgmr.msra.gmra.mxu0 %v7111_v61 }
 0x281   :  { %1659 = vmatprep.mubr.f32.mxu0 %v7113_v54  ;;  %6740 = vmatpush3.msra.mxu0 %v631_v21 }
 0x282   :  { %6741 = vmatprep.subr.mxu0 %v630_v17 }
 0x283   :  { %6742 = vmatpush3.msra.mxu0 %v630_v17 }
 0x284   :  { %1660 = vmatmul.mubr.f32.gmra.mxu0 %v7115_v46  ;;  %6743 = vmatprep.subr.mxu0 %v629_v52 }
 0x285   :  { %6744 = vmatpush3.msra.mxu0 %v629_v52 }
 0x286   :  { %6745 = vmatprep.subr.mxu0 %v628_v56 }
 0x287   :  { %6746 = vmatpush3.msra.mxu0 %v628_v56 }
 0x319   :  { %v6187_v1 = vpop.f32.mrf.mxu0 }
 0x31b   :  { %v6188_v5 = vpop.f32.mrf.mxu0 }
 0x31c   :  { %v6189_v26 = vadd.f32 %v6188_v5, %v6187_v1  ;;  %v9512_v5 = vld [vmem:[#allocation21_spill] sm:$0xff] }
 0x31d   :  { %v6190_v0 = vpop.f32.mrf.mxu0 }
 0x31f   :  { %v6191_v15 = vpop.f32.mrf.mxu0 }
 0x320   :  { %v6192_v34 = vadd.f32 %v6191_v15, %v6190_v0  ;;  %v1879_v15 = vld [vmem:[#allocation8 + $0x140] sm:$0xff] }
 0x321   :  { %6759 = vmatprep.subr.mxu1 %v1879_v15 }
 0x322   :  { %6760 = vmatpush3.msra.mxu1 %v1879_v15 }
 0x323   :  { %v6193_v27 = vpop.f32.mrf.mxu0  ;;  %v6249_v29 = vpop.f32.mrf.mxu1 }
 0x325   :  { %v6194_v39 = vpop.f32.mrf.mxu0  ;;  %v6250_v58 = vpop.f32.mrf.mxu1 }
 0x326   :  { %v6195_v33 = vadd.f32 %v6194_v39, %v6193_v27  ;;  %v6251_v32 = vadd.f32 %v6250_v58, %v6249_v29  ;;  %v1878_v27 = vld [vmem:[#allocation8 + $0x138] sm:$0xff]  ;;  %v1876_v58 = vld [vmem:[#allocation8 + $0x128] sm:$0xff] }
 0x327   :  { %v6196_v22 = vpop.f32.mrf.mxu0  ;;  %v9513_v29 = vld [vmem:[#allocation20_spill] sm:$0xff]  ;;  %6761 = vmatprep.subr.mxu1 %v1878_v27 }
 0x328   :  { %v6252_v10 = vpop.f32.mrf.mxu1  ;;  %v8187_v11 = vadd.f32 %v6251_v32, %v6195_v33  ;;  %v1877_v33 = vld [vmem:[#allocation8 + $0x130] sm:$0xff]  ;;  %6762 = vmatpush3.msra.mxu1 %v1878_v27 }
 0x329   :  { %v6197_v3 = vpop.f32.mrf.mxu0  ;;  %6763 = vmatprep.subr.mxu1 %v1877_v33 }
 0x32a   :  { %v6198_v38 = vadd.f32 %v6197_v3, %v6196_v22  ;;  %v6253_v7 = vpop.f32.mrf.mxu1  ;;  %7116 = vrcp.f32 %v8187_v11  ;;  %6764 = vmatpush3.msra.mxu1 %v1877_v33  ;;  %v9514_v22 = vld [vmem:[#allocation23_spill] sm:$0xff] }
 0x32b   :  { %v6254_v42 = vadd.f32 %v6253_v7, %v6252_v10  ;;  %6765 = vmatprep.subr.mxu1 %v1876_v58  ;;  %v9515_v10 = vld [vmem:[#allocation22_spill] sm:$0xff] }
 0x32c   :  { %6766 = vmatpush3.msra.mxu1 %v1876_v58 }
 0x32d   :  { %v8190_v55 = vadd.f32 %v6254_v42, %v6198_v38  ;;  %v6199_v20 = vpop.f32.mrf.mxu0  ;;  %v6255_v36 = vpop.f32.mrf.mxu1 }
 0x32f   :  { %7118 = vrcp.f32 %v8190_v55  ;;  %v6200_v13 = vpop.f32.mrf.mxu0  ;;  %v6256_v63 = vpop.f32.mrf.mxu1 }
 0x330   :  { %v6201_v47 = vadd.f32 %v6200_v13, %v6199_v20  ;;  %v6257_v59 = vadd.f32 %v6256_v63, %v6255_v36 }
 0x332   :  { %v6202_v28 = vpop.f32.mrf.mxu0  ;;  %v1677_v43 = vadd.f32 %v6257_v59, %v6201_v47 }
 0x333   :  { %v6258_v62 = vpop.f32.mrf.mxu1 }
 0x334   :  { %v6203_v49 = vpop.f32.mrf.mxu0 }
 0x335   :  { %v6204_v24 = vadd.f32 %v6203_v49, %v6202_v28  ;;  %v6259_v44 = vpop.f32.mrf.mxu1 }
 0x336   :  { %v6260_v23 = vadd.f32 %v6259_v44, %v6258_v62  ;;  %v6205_v2 = vpop.f32.mrf.mxu0 }
 0x337   :  { %v7117_v51 = vpop.eup %7116 }
 0x338   :  { %v8193_v4 = vadd.f32 %v6260_v23, %v6204_v24  ;;  %v6261_v6 = vpop.f32.mrf.mxu1  ;;  %v6206_v37 = vpop.f32.mrf.mxu0  ;;  %1715 = vrot.lane.b32.xlu1 %v7117_v51, %s7540_s4  ;;  %v5775_v51 = vld [vmem:[#allocation8 + $0x120] ss:$0 sm:$0xff] }
 0x339   :  { %v6207_v57 = vadd.f32 %v6206_v37, %v6205_v2 }
 0x33a   :  { %7120 = vrcp.f32 %v8193_v4  ;;  %v6262_v60 = vpop.f32.mrf.mxu1 }
 0x33b   :  { %v6263_v61 = vadd.f32 %v6262_v60, %v6261_v6 }
 0x33c   :  { %v7119_v25 = vpop.eup %7118  ;;  %v6208_v9 = vpop.f32.mrf.mxu0 }
 0x33d   :  { %v6264_v35 = vpop.f32.mrf.mxu1  ;;  %1717 = vrot.lane.b32.xlu1 %v7119_v25, %s7540_s4  ;;  %v1687_v54 = vadd.f32 %v6263_v61, %v6207_v57 }
 0x33e   :  { %v6209_v12 = vpop.f32.mrf.mxu0 }
 0x33f   :  { %v6210_v48 = vadd.f32 %v6209_v12, %v6208_v9  ;;  %v6265_v14 = vpop.f32.mrf.mxu1 }
 0x340   :  { %v6266_v40 = vadd.f32 %v6265_v14, %v6264_v35  ;;  %v6243_v19 = vpop.f32.mrf.mxu0 }
 0x342   :  { %v8198_v16 = vadd.f32 %v6266_v40, %v6210_v48  ;;  %v6244_v18 = vpop.f32.mrf.mxu0 }
 0x343   :  { %v6245_v45 = vadd.f32 %v6244_v18, %v6243_v19 }
 0x344   :  { %7122 = vrcp.f32 %v8198_v16  ;;  %v6246_v31 = vpop.f32.mrf.mxu0 }
 0x345   :  { %v1657_v53 = vadd.f32 %v6245_v45, %v6189_v26 }
 0x346   :  { %v6247_v41 = vpop.f32.mrf.mxu0 }
 0x347   :  { %v7121_v8 = vpop.eup %7120  ;;  %7124 = vrcp.f32 %v1657_v53  ;;  %v6248_v50 = vadd.f32 %v6247_v41, %v6246_v31  ;;  %v5784_v31 = vld [vmem:[#allocation8 + $0x148] ss:$0 sm:$0xff] }
 0x348   :  { %1721 = vrot.lane.b32.xlu1 %v7121_v8, %s7540_s4 }
 0x349   :  { %v1662_v30 = vadd.f32 %v6248_v50, %v6192_v34 }
 0x34b   :  { %7126 = vrcp.f32 %v1662_v30 }
 0x34c   :  { %7128 = vrcp.f32 %v1677_v43 }
 0x34d   :  { %7130 = vrcp.f32 %v1687_v54 }
 0x351   :  { %v7123_v46 = vpop.eup %7122 }
 0x352   :  { %1725 = vrot.lane.b32.xlu1 %v7123_v46, %s7540_s4 }
 0x354   :  { %v7125_v1 = vpop.eup %7124 }
 0x355   :  { %1711 = vrot.lane.b32.xlu0 %v7125_v1, %s7540_s4 }
 0x356   :  { %2037 = vrot.lane.b32.xlu1 %v9512_v5, %s7537_s9 }
 0x358   :  { %v7127_v0 = vpop.eup %7126 }
 0x359   :  { %1713 = vrot.lane.b32.xlu0 %v7127_v0, %s7540_s4  ;;  %v7129_v39 = vpop.eup %7128 }
 0x35a   :  { %2035 = vrot.lane.b32.xlu1 %v9513_v29, %s7537_s9  ;;  %v7131_v32 = vpop.eup %7130 }
 0x35d   :  { %1719 = vrot.lane.b32.xlu0 %v7129_v39, %s7540_s4 }
 0x361   :  { %1723 = vrot.lane.b32.xlu0 %v7131_v32, %s7540_s4 }
 0x365   :  { %2041 = vrot.lane.b32.xlu0 %v9514_v22, %s7537_s9 }
 0x369   :  { %2039 = vrot.lane.b32.xlu0 %v9515_v10, %s7537_s9 }
 0x3aa   :  { %v1716_v3 = vpop.permute.xlu1 %1715 }
 0x3ab   :  { %v1737_v36 = vmul.f32 %v1716_v3, %v8187_v11 }
 0x3af   :  { %v1718_v13 = vpop.permute.xlu1 %1717 }
 0x3b0   :  { %v1738_v28 = vmul.f32 %v1718_v13, %v8190_v55 }
 0x3ba   :  { %v1722_v49 = vpop.permute.xlu1 %1721 }
 0x3bb   :  { %v1740_v44 = vmul.f32 %v1722_v49, %v8193_v4 }
 0x3c4   :  { %v1726_v2 = vpop.permute.xlu1 %1725 }
 0x3c5   :  { %v1742_v11 = vmul.f32 %v1726_v2, %v8198_v16 }
 0x3c7   :  { %v1712_v38 = vpop.permute.xlu0 %1711 }
 0x3c8   :  { %v1735_v7 = vmul.f32 %v1712_v38, %v1657_v53  ;;  %v2038_v52 = vpop.permute.xlu1 %2037 }
 0x3ca   :  { %6747 = vmatprep.mubr.msk.f32.mxu0 %vm176_vm0, %v1735_v7 }
 0x3cb   :  { %v1714_v42 = vpop.permute.xlu0 %1713 }
 0x3cc   :  { %v1736_v20 = vmul.f32 %v1714_v42, %v1662_v30 }
 0x3ce   :  { %6748 = vmatmul.mubr.msk.f32.vlgmr.msra.gmra.mxu0 %vm176_vm0, %v1736_v20 }
 0x3cf   :  { %v1720_v63 = vpop.permute.xlu0 %1719  ;;  %6750 = vmatprep.mubr.msk.f32.mxu0 %vm176_vm0, %v1737_v36 }
 0x3d0   :  { %v1739_v62 = vmul.f32 %v1720_v63, %v1677_v43 }
 0x3d2   :  { %6751 = vmatmul.mubr.msk.f32.gmra.mxu0 %vm176_vm0, %v1738_v28 }
 0x3d3   :  { %v1724_v24 = vpop.permute.xlu0 %1723  ;;  %6753 = vmatprep.mubr.msk.f32.mxu0 %vm176_vm0, %v1739_v62  ;;  %v2036_v62 = vpop.permute.xlu1 %2035 }
 0x3d4   :  { %v1741_v23 = vmul.f32 %v1724_v24, %v1687_v54 }
 0x3d6   :  { %6754 = vmatmul.mubr.msk.f32.gmra.mxu0 %vm176_vm0, %v1740_v44 }
 0x3d7   :  { %6756 = vmatprep.mubr.msk.f32.mxu0 %vm176_vm0, %v1741_v23  ;;  %v2042_v59 = vpop.permute.xlu0 %2041 }
 0x3da   :  { %6757 = vmatmul.mubr.msk.f32.gmra.mxu0 %vm176_vm0, %v1742_v11 }
 0x3db   :  { %v2040_v28 = vpop.permute.xlu0 %2039 }
 0x48e   :  { %v6749_v55 = vpop.f32.mrf.mxu0 }
 0x48f   :  { %v1843_v60 = vadd.f32 %v6749_v55, %v5775_v51 }
 0x490   :  { %v1837_v6 = vpop.f32.mrf.mxu0 }
 0x491   :  { %v1838_v37 = vadd.f32 %v5775_v51, %v1837_v6 }
 0x492   :  { %v6752_v25 = vpop.f32.mrf.mxu0 }
 0x493   :  { %6767 = vmatprep.mubr.msk.f32.mxu1 %vm176_vm0, %v1838_v37  ;;  %v1853_v35 = vadd.f32 %v6752_v25, %v5775_v51 }
 0x494   :  { %v1847_v9 = vpop.f32.mrf.mxu0  ;;  %6768 = vmatmul.mubr.msk.f32.vlgmr.msra.gmra.mxu1 %vm176_vm0, %v1843_v60 }
 0x495   :  { %v1848_v4 = vadd.f32 %v5775_v51, %v1847_v9 }
 0x496   :  { %v6755_v12 = vpop.f32.mrf.mxu0 }
 0x497   :  { %6770 = vmatprep.mubr.msk.f32.mxu1 %vm176_vm0, %v1848_v4  ;;  %v1863_v40 = vadd.f32 %v6755_v12, %v5775_v51 }
 0x498   :  { %v1857_v48 = vpop.f32.mrf.mxu0  ;;  %6771 = vmatmul.mubr.msk.f32.gmra.mxu1 %vm176_vm0, %v1853_v35 }
 0x499   :  { %v1858_v14 = vadd.f32 %v5775_v51, %v1857_v48  ;;  %v9516_v48 = vld [vmem:[#allocation25_spill] sm:$0xff] }
 0x49a   :  { %v6758_v19 = vpop.f32.mrf.mxu0 }
 0x49b   :  { %6773 = vmatprep.mubr.msk.f32.mxu1 %vm176_vm0, %v1858_v14  ;;  %v1873_v26 = vadd.f32 %v6758_v19, %v5775_v51  ;;  %v9517_v14 = vld [vmem:[#allocation24_spill] sm:$0xff]  ;;  %v9519_v19 = vld [vmem:[#allocation26_spill] sm:$0xff] }
 0x49c   :  { %v1867_v16 = vpop.f32.mrf.mxu0  ;;  %6774 = vmatmul.mubr.msk.f32.gmra.mxu1 %vm176_vm0, %v1863_v40  ;;  %v9518_v40 = vld [vmem:[#allocation27_spill] sm:$0xff] }
 0x49d   :  { %v1868_v18 = vadd.f32 %v5775_v51, %v1867_v16 }
 0x49f   :  { %6776 = vmatprep.mubr.msk.f32.mxu1 %vm176_vm0, %v1868_v18 }
 0x4a0   :  { %6777 = vmatmul.mubr.msk.f32.gmra.mxu1 %vm176_vm0, %v1873_v26 }
 0x554   :  { %v6769_v45 = vpop.f32.mrf.mxu1 }
 0x555   :  { %v8271_v38 = vadd.f32 %v6769_v45, %v5784_v31 }
 0x556   :  { %v1975_v53 = vpop.f32.mrf.mxu1 }
 0x557   :  { %v8235_v21 = vadd.f32 %v5784_v31, %v1975_v53  ;;  %v2072_v20 = vmul.f32 %v2042_v59, %v8271_v38  ;;  %v2056_v36 = vmul.f32 %v2038_v52, %v8271_v38  ;;  %v2064_v9 = vmul.f32 %v2040_v28, %v8271_v38 }
 0x558   :  { %v6772_v17 = vpop.f32.mrf.mxu1  ;;  %v2048_v4 = vmul.f32 %v2036_v62, %v8271_v38 }
 0x559   :  { %6323 = vmatprep.mubr.msk.f32.mxu0 %vm176_vm0, %v8235_v21  ;;  %v8259_v27 = vadd.f32 %v6772_v17, %v5784_v31  ;;  %v2071_v13 = vmul.f32 %v2042_v59, %v8235_v21  ;;  %v2055_v63 = vmul.f32 %v2038_v52, %v8235_v21  ;;  %v2063_v35 = vmul.f32 %v2040_v28, %v8235_v21 }
 0x55a   :  { %v1985_v34 = vpop.f32.mrf.mxu1  ;;  %v2047_v12 = vmul.f32 %v2036_v62, %v8235_v21 }
 0x55b   :  { %v8265_v58 = vadd.f32 %v5784_v31, %v1985_v34  ;;  %v2074_v32 = vmul.f32 %v2042_v59, %v8259_v27  ;;  %v2058_v3 = vmul.f32 %v2038_v52, %v8259_v27  ;;  %v2066_v6 = vmul.f32 %v2040_v28, %v8259_v27 }
 0x55c   :  { %v6775_v41 = vpop.f32.mrf.mxu1  ;;  %v2050_v37 = vmul.f32 %v2036_v62, %v8259_v27 }
 0x55d   :  { %v8247_v61 = vadd.f32 %v6775_v41, %v5784_v31  ;;  %v2073_v7 = vmul.f32 %v2042_v59, %v8265_v58  ;;  %v2057_v42 = vmul.f32 %v2038_v52, %v8265_v58  ;;  %v2065_v60 = vmul.f32 %v2040_v28, %v8265_v58 }
 0x55e   :  { %v1995_v8 = vpop.f32.mrf.mxu1  ;;  %v2049_v25 = vmul.f32 %v2036_v62, %v8265_v58 }
 0x55f   :  { %v8253_v1 = vadd.f32 %v5784_v31, %v1995_v8  ;;  %v2076_v0 = vmul.f32 %v2042_v59, %v8247_v61  ;;  %v2060_v15 = vmul.f32 %v2038_v52, %v8247_v61  ;;  %v2068_v2 = vmul.f32 %v2040_v28, %v8247_v61 }
 0x560   :  { %v6778_v47 = vpop.f32.mrf.mxu1  ;;  %v2052_v11 = vmul.f32 %v2036_v62, %v8247_v61 }
 0x561   :  { %v8239_v50 = vadd.f32 %v6778_v47, %v5784_v31  ;;  %v2075_v39 = vmul.f32 %v2042_v59, %v8253_v1  ;;  %v2059_v33 = vmul.f32 %v2038_v52, %v8253_v1  ;;  %v2067_v55 = vmul.f32 %v2040_v28, %v8253_v1 }
 0x562   :  { %v2005_v30 = vpop.f32.mrf.mxu1  ;;  %v2051_v51 = vmul.f32 %v2036_v62, %v8253_v1 }
 0x563   :  { %v8241_v56 = vadd.f32 %v5784_v31, %v2005_v30  ;;  %v2078_v43 = vmul.f32 %v2042_v59, %v8239_v50  ;;  %v2062_v57 = vmul.f32 %v2038_v52, %v8239_v50  ;;  %v2070_v49 = vmul.f32 %v2040_v28, %v8239_v50 }
 0x564   :  { %v2054_v24 = vmul.f32 %v2036_v62, %v8239_v50 }
 0x565   :  { %2217 = vrot.lane.b32.xlu0 %v2078_v43, %s7540_s4  ;;  %2185 = vrot.lane.b32.xlu1 %v2062_v57, %s7540_s4  ;;  %v2077_v54 = vmul.f32 %v2042_v59, %v8241_v56  ;;  %v2061_v46 = vmul.f32 %v2038_v52, %v8241_v56  ;;  %v2069_v44 = vmul.f32 %v2040_v28, %v8241_v56 }
 0x566   :  { %v2053_v23 = vmul.f32 %v2036_v62, %v8241_v56 }
 0x569   :  { %2215 = vrot.lane.b32.xlu0 %v2077_v54, %s7540_s4  ;;  %2183 = vrot.lane.b32.xlu1 %v2061_v46, %s7540_s4 }
 0x56d   :  { %2213 = vrot.lane.b32.xlu0 %v2076_v0, %s7540_s4  ;;  %2181 = vrot.lane.b32.xlu1 %v2060_v15, %s7540_s4 }
 0x571   :  { %2211 = vrot.lane.b32.xlu0 %v2075_v39, %s7540_s4  ;;  %2179 = vrot.lane.b32.xlu1 %v2059_v33, %s7540_s4 }
 0x575   :  { %2209 = vrot.lane.b32.xlu0 %v2074_v32, %s7540_s4  ;;  %2177 = vrot.lane.b32.xlu1 %v2058_v3, %s7540_s4 }
 0x579   :  { %2207 = vrot.lane.b32.xlu0 %v2073_v7, %s7540_s4  ;;  %2175 = vrot.lane.b32.xlu1 %v2057_v42, %s7540_s4 }
 0x57d   :  { %2205 = vrot.lane.b32.xlu0 %v2072_v20, %s7540_s4  ;;  %2173 = vrot.lane.b32.xlu1 %v2056_v36, %s7540_s4 }
 0x581   :  { %2203 = vrot.lane.b32.xlu0 %v2071_v13, %s7540_s4  ;;  %2171 = vrot.lane.b32.xlu1 %v2055_v63, %s7540_s4 }
 0x585   :  { %2201 = vrot.lane.b32.xlu0 %v2070_v49, %s7540_s4  ;;  %2169 = vrot.lane.b32.xlu1 %v2054_v24, %s7540_s4 }
 0x589   :  { %2199 = vrot.lane.b32.xlu0 %v2069_v44, %s7540_s4  ;;  %2167 = vrot.lane.b32.xlu1 %v2053_v23, %s7540_s4 }
 0x58d   :  { %2197 = vrot.lane.b32.xlu0 %v2068_v2, %s7540_s4  ;;  %2165 = vrot.lane.b32.xlu1 %v2052_v11, %s7540_s4 }
 0x591   :  { %2195 = vrot.lane.b32.xlu0 %v2067_v55, %s7540_s4  ;;  %2163 = vrot.lane.b32.xlu1 %v2051_v51, %s7540_s4 }
 0x595   :  { %2193 = vrot.lane.b32.xlu0 %v2066_v6, %s7540_s4  ;;  %2161 = vrot.lane.b32.xlu1 %v2050_v37, %s7540_s4 }
 0x599   :  { %2191 = vrot.lane.b32.xlu0 %v2065_v60, %s7540_s4  ;;  %2159 = vrot.lane.b32.xlu1 %v2049_v25, %s7540_s4 }
 0x59d   :  { %2189 = vrot.lane.b32.xlu0 %v2064_v9, %s7540_s4  ;;  %2157 = vrot.lane.b32.xlu1 %v2048_v4, %s7540_s4 }
 0x5a1   :  { %2187 = vrot.lane.b32.xlu0 %v2063_v35, %s7540_s4  ;;  %2155 = vrot.lane.b32.xlu1 %v2047_v12, %s7540_s4 }
 0x5a5   :  { %2085 = vrot.lane.b32.xlu0 %v9516_v48, %s7541_s6  ;;  %2081 = vrot.lane.b32.xlu1 %v9517_v14, %s7541_s6 }
 0x5a9   :  { %2083 = vrot.lane.b32.xlu0 %v9518_v40, %s7541_s6  ;;  %2079 = vrot.lane.b32.xlu1 %v9519_v19, %s7541_s6 }
 0x5d7   :  { %v2218_v16 = vpop.permute.xlu0 %2217  ;;  %v2186_v18 = vpop.permute.xlu1 %2185 }
 0x5d8   :  { %6291 = vmatprep.subr.msk.mxu0 %vm176_vm0, %v2218_v16 }
 0x5d9   :  { %6292 = vmatpush3.xpose.msk.msra.mxu0 %vm176_vm0, %v2186_v18 }
 0x5db   :  { %v2216_v26 = vpop.permute.xlu0 %2215  ;;  %v2184_v45 = vpop.permute.xlu1 %2183 }
 0x5dc   :  { %6293 = vmatprep.subr.msk.mxu0 %vm176_vm0, %v2216_v26 }
 0x5dd   :  { %6294 = vmatpush3.xpose.msk.msra.mxu0 %vm176_vm0, %v2184_v45 }
 0x5df   :  { %v2214_v31 = vpop.permute.xlu0 %2213  ;;  %v2182_v53 = vpop.permute.xlu1 %2181 }
 0x5e0   :  { %6295 = vmatprep.subr.msk.mxu0 %vm176_vm0, %v2214_v31 }
 0x5e1   :  { %6296 = vmatpush3.xpose.msk.msra.mxu0 %vm176_vm0, %v2182_v53 }
 0x5e3   :  { %v2212_v17 = vpop.permute.xlu0 %2211  ;;  %v2180_v34 = vpop.permute.xlu1 %2179 }
 0x5e4   :  { %6297 = vmatprep.subr.msk.mxu0 %vm176_vm0, %v2212_v17 }
 0x5e5   :  { %6298 = vmatpush3.xpose.msk.msra.mxu0 %vm176_vm0, %v2180_v34 }
 0x5e7   :  { %v2210_v41 = vpop.permute.xlu0 %2209  ;;  %v2178_v8 = vpop.permute.xlu1 %2177 }
 0x5e8   :  { %6299 = vmatprep.subr.msk.mxu0 %vm176_vm0, %v2210_v41 }
 0x5e9   :  { %6300 = vmatpush3.xpose.msk.msra.mxu0 %vm176_vm0, %v2178_v8 }
 0x5eb   :  { %v2208_v47 = vpop.permute.xlu0 %2207  ;;  %v2176_v59 = vpop.permute.xlu1 %2175 }
 0x5ec   :  { %6301 = vmatprep.subr.msk.mxu0 %vm176_vm0, %v2208_v47 }
 0x5ed   :  { %6302 = vmatpush3.xpose.msk.msra.mxu0 %vm176_vm0, %v2176_v59 }
 0x5ef   :  { %v2206_v52 = vpop.permute.xlu0 %2205  ;;  %v2174_v30 = vpop.permute.xlu1 %2173 }
 0x5f0   :  { %6303 = vmatprep.subr.msk.mxu0 %vm176_vm0, %v2206_v52 }
 0x5f1   :  { %6304 = vmatpush3.xpose.msk.msra.mxu0 %vm176_vm0, %v2174_v30 }
 0x5f3   :  { %v2204_v43 = vpop.permute.xlu0 %2203  ;;  %v2172_v57 = vpop.permute.xlu1 %2171 }
 0x5f4   :  { %6305 = vmatprep.subr.msk.mxu0 %vm176_vm0, %v2204_v43 }
 0x5f5   :  { %6306 = vmatpush3.xpose.msk.msra.mxu0 %vm176_vm0, %v2172_v57 }
 0x5f7   :  { %v2202_v54 = vpop.permute.xlu0 %2201  ;;  %v2170_v46 = vpop.permute.xlu1 %2169 }
 0x5f8   :  { %6307 = vmatprep.subr.msk.mxu0 %vm176_vm0, %v2202_v54 }
 0x5f9   :  { %6308 = vmatpush3.xpose.msk.msra.mxu0 %vm176_vm0, %v2170_v46 }
 0x5fb   :  { %v2200_v0 = vpop.permute.xlu0 %2199  ;;  %v2168_v15 = vpop.permute.xlu1 %2167 }
 0x5fc   :  { %6309 = vmatprep.subr.msk.mxu0 %vm176_vm0, %v2200_v0 }
 0x5fd   :  { %6310 = vmatpush3.xpose.msk.msra.mxu0 %vm176_vm0, %v2168_v15 }
 0x5ff   :  { %v2198_v39 = vpop.permute.xlu0 %2197  ;;  %v2166_v33 = vpop.permute.xlu1 %2165 }
 0x600   :  { %6311 = vmatprep.subr.msk.mxu0 %vm176_vm0, %v2198_v39 }
 0x601   :  { %6312 = vmatpush3.xpose.msk.msra.mxu0 %vm176_vm0, %v2166_v33 }
 0x603   :  { %v2196_v32 = vpop.permute.xlu0 %2195  ;;  %v2164_v3 = vpop.permute.xlu1 %2163 }
 0x604   :  { %6313 = vmatprep.subr.msk.mxu0 %vm176_vm0, %v2196_v32 }
 0x605   :  { %6314 = vmatpush3.xpose.msk.msra.mxu0 %vm176_vm0, %v2164_v3 }
 0x607   :  { %v2194_v7 = vpop.permute.xlu0 %2193  ;;  %v2162_v42 = vpop.permute.xlu1 %2161 }
 0x608   :  { %6315 = vmatprep.subr.msk.mxu0 %vm176_vm0, %v2194_v7 }
 0x609   :  { %6316 = vmatpush3.xpose.msk.msra.mxu0 %vm176_vm0, %v2162_v42 }
 0x60b   :  { %v2192_v20 = vpop.permute.xlu0 %2191  ;;  %v2160_v36 = vpop.permute.xlu1 %2159 }
 0x60c   :  { %6317 = vmatprep.subr.msk.mxu0 %vm176_vm0, %v2192_v20 }
 0x60d   :  { %6318 = vmatpush3.xpose.msk.msra.mxu0 %vm176_vm0, %v2160_v36 }
 0x60f   :  { %v2190_v13 = vpop.permute.xlu0 %2189  ;;  %v2158_v63 = vpop.permute.xlu1 %2157 }
 0x610   :  { %6319 = vmatprep.subr.msk.mxu0 %vm176_vm0, %v2190_v13 }
 0x611   :  { %6320 = vmatpush3.xpose.msk.msra.mxu0 %vm176_vm0, %v2158_v63 }
 0x613   :  { %v2188_v28 = vpop.permute.xlu0 %2187  ;;  %v2156_v62 = vpop.permute.xlu1 %2155 }
 0x614   :  { %6321 = vmatprep.subr.msk.mxu0 %vm176_vm0, %v2188_v28 }
 0x615   :  { %6322 = vmatpush3.xpose.msk.msra.mxu0 %vm176_vm0, %v2156_v62 }
 0x617   :  { %v2086_v49 = vpop.permute.xlu0 %2085  ;;  %v2082_v24 = vpop.permute.xlu1 %2081 }
 0x618   :  { %6324 = vmatmul.mubr.msk.f32.vlgmr.msra.gmra.mxu0 %vm176_vm0, %v8235_v21  ;;  %v2122_v44 = vmul.f32 %v2086_v49, %v8239_v50  ;;  %v2106_v23 = vmul.f32 %v2082_v24, %v8239_v50  ;;  %v2120_v2 = vmul.f32 %v2086_v49, %v8247_v61  ;;  %v2104_v11 = vmul.f32 %v2082_v24, %v8247_v61 }
 0x619   :  { %6325 = vmatprep.mubr.msk.f32.mxu0 %vm176_vm0, %v8271_v38  ;;  %v2119_v55 = vmul.f32 %v2086_v49, %v8253_v1  ;;  %v2103_v51 = vmul.f32 %v2082_v24, %v8253_v1  ;;  %v2118_v6 = vmul.f32 %v2086_v49, %v8259_v27  ;;  %v2102_v37 = vmul.f32 %v2082_v24, %v8259_v27 }
 0x61a   :  { %2610 = vrot.lane.b32.xlu0 %v2122_v44, %s7541_s6  ;;  %2578 = vrot.lane.b32.xlu1 %v2106_v23, %s7541_s6  ;;  %v2117_v60 = vmul.f32 %v2086_v49, %v8265_v58  ;;  %v2101_v25 = vmul.f32 %v2082_v24, %v8265_v58  ;;  %v2116_v9 = vmul.f32 %v2086_v49, %v8271_v38 }
 0x61b   :  { %v2100_v4 = vmul.f32 %v2082_v24, %v8271_v38  ;;  %v2115_v35 = vmul.f32 %v2086_v49, %v8235_v21  ;;  %v2099_v12 = vmul.f32 %v2082_v24, %v8235_v21  ;;  %v2084_v16 = vpop.permute.xlu0 %2083  ;;  %v2080_v18 = vpop.permute.xlu1 %2079  ;;  %v2121_v31 = vmul.f32 %v2086_v49, %v8241_v56 }
 0x61c   :  { %6326 = vmatmul.mubr.msk.f32.gmra.mxu0 %vm176_vm0, %v8271_v38  ;;  %v2114_v26 = vmul.f32 %v2084_v16, %v8239_v50  ;;  %v2098_v45 = vmul.f32 %v2080_v18, %v8239_v50  ;;  %v2105_v53 = vmul.f32 %v2082_v24, %v8241_v56  ;;  %v2112_v17 = vmul.f32 %v2084_v16, %v8247_v61 }
 0x61d   :  { %6327 = vmatprep.mubr.msk.f32.mxu0 %vm176_vm0, %v8265_v58  ;;  %v2096_v34 = vmul.f32 %v2080_v18, %v8247_v61  ;;  %v2095_v41 = vmul.f32 %v2080_v18, %v8253_v1  ;;  %v2110_v8 = vmul.f32 %v2084_v16, %v8259_v27  ;;  %v2094_v47 = vmul.f32 %v2080_v18, %v8259_v27 }
 0x61e   :  { %2606 = vrot.lane.b32.xlu0 %v2120_v2, %s7541_s6  ;;  %2574 = vrot.lane.b32.xlu1 %v2104_v11, %s7541_s6  ;;  %v2097_v59 = vmul.f32 %v2080_v18, %v8241_v56  ;;  %v2093_v52 = vmul.f32 %v2080_v18, %v8265_v58  ;;  %v2092_v30 = vmul.f32 %v2080_v18, %v8271_v38 }
 0x61f   :  { %v2091_v43 = vmul.f32 %v2080_v18, %v8235_v21 }
 0x620   :  { %6328 = vmatmul.mubr.msk.f32.gmra.mxu0 %vm176_vm0, %v8265_v58 }
 0x621   :  { %6329 = vmatprep.mubr.msk.f32.mxu0 %vm176_vm0, %v8259_v27 }
 0x622   :  { %2604 = vrot.lane.b32.xlu0 %v2119_v55, %s7541_s6  ;;  %2572 = vrot.lane.b32.xlu1 %v2103_v51, %s7541_s6 }
 0x624   :  { %6330 = vmatmul.mubr.msk.f32.gmra.mxu0 %vm176_vm0, %v8259_v27  ;;  %v2108_v27 = vmul.f32 %v2084_v16, %v8271_v38 }
 0x625   :  { %6331 = vmatprep.mubr.msk.f32.mxu0 %vm176_vm0, %v8253_v1 }
 0x626   :  { %2602 = vrot.lane.b32.xlu0 %v2118_v6, %s7541_s6  ;;  %2570 = vrot.lane.b32.xlu1 %v2102_v37, %s7541_s6 }
 0x628   :  { %6332 = vmatmul.mubr.msk.f32.gmra.mxu0 %vm176_vm0, %v8253_v1 }
 0x629   :  { %6333 = vmatprep.mubr.msk.f32.mxu0 %vm176_vm0, %v8247_v61 }
 0x62a   :  { %2600 = vrot.lane.b32.xlu0 %v2117_v60, %s7541_s6  ;;  %2568 = vrot.lane.b32.xlu1 %v2101_v25, %s7541_s6 }
 0x62c   :  { %6334 = vmatmul.mubr.msk.f32.gmra.mxu0 %vm176_vm0, %v8247_v61  ;;  %v2113_v61 = vmul.f32 %v2084_v16, %v8241_v56 }
 0x62d   :  { %6335 = vmatprep.mubr.msk.f32.mxu0 %vm176_vm0, %v8241_v56 }
 0x62e   :  { %2598 = vrot.lane.b32.xlu0 %v2116_v9, %s7541_s6  ;;  %2566 = vrot.lane.b32.xlu1 %v2100_v4, %s7541_s6  ;;  %v2014_v9 = vld [vmem:[#allocation11] sm:$0xff] }
 0x630   :  { %6336 = vmatmul.mubr.msk.f32.gmra.mxu0 %vm176_vm0, %v8241_v56  ;;  %v2107_v56 = vmul.f32 %v2084_v16, %v8235_v21 }
 0x631   :  { %6337 = vmatprep.mubr.msk.f32.mxu0 %vm176_vm0, %v8239_v50 }
 0x632   :  { %2596 = vrot.lane.b32.xlu0 %v2115_v35, %s7541_s6  ;;  %2564 = vrot.lane.b32.xlu1 %v2099_v12, %s7541_s6  ;;  %v2015_v12 = vld [vmem:[#allocation11 + $0x8] sm:$0xff] }
 0x634   :  { %6338 = vmatmul.mubr.msk.f32.gmra.mxu0 %vm176_vm0, %v8239_v50  ;;  %v2111_v50 = vmul.f32 %v2084_v16, %v8253_v1  ;;  %v2109_v1 = vmul.f32 %v2084_v16, %v8265_v58 }
 0x636   :  { %2594 = vrot.lane.b32.xlu0 %v2114_v26, %s7541_s6  ;;  %2562 = vrot.lane.b32.xlu1 %v2098_v45, %s7541_s6  ;;  %v2016_v45 = vld [vmem:[#allocation11 + $0x10] sm:$0xff] }
 0x63a   :  { %2608 = vrot.lane.b32.xlu0 %v2121_v31, %s7541_s6  ;;  %2576 = vrot.lane.b32.xlu1 %v2105_v53, %s7541_s6 }
 0x63e   :  { %2590 = vrot.lane.b32.xlu0 %v2112_v17, %s7541_s6  ;;  %2558 = vrot.lane.b32.xlu1 %v2096_v34, %s7541_s6 }
 0x642   :  { %2588 = vrot.lane.b32.xlu0 %v2111_v50, %s7541_s6  ;;  %2556 = vrot.lane.b32.xlu1 %v2095_v41, %s7541_s6  ;;  %v2017_v50 = vld [vmem:[#allocation11 + $0x18] sm:$0xff] }
 0x646   :  { %2586 = vrot.lane.b32.xlu0 %v2110_v8, %s7541_s6  ;;  %2554 = vrot.lane.b32.xlu1 %v2094_v47, %s7541_s6 }
 0x64a   :  { %2592 = vrot.lane.b32.xlu0 %v2113_v61, %s7541_s6  ;;  %2560 = vrot.lane.b32.xlu1 %v2097_v59, %s7541_s6 }
 0x64e   :  { %2584 = vrot.lane.b32.xlu0 %v2109_v1, %s7541_s6  ;;  %2552 = vrot.lane.b32.xlu1 %v2093_v52, %s7541_s6 }
 0x652   :  { %2582 = vrot.lane.b32.xlu0 %v2108_v27, %s7541_s6  ;;  %2550 = vrot.lane.b32.xlu1 %v2092_v30, %s7541_s6 }
 0x656   :  { %2580 = vrot.lane.b32.xlu0 %v2107_v56, %s7541_s6  ;;  %2548 = vrot.lane.b32.xlu1 %v2091_v43, %s7541_s6  ;;  %v2018_v56 = vld [vmem:[#allocation11 + $0x20] sm:$0xff] }
 0x68c   :  { %v2611_v58 = vpop.permute.xlu0 %2610  ;;  %v2579_v57 = vpop.permute.xlu1 %2578 }
 0x68d   :  { %6339 = vmatprep.subr.mxu1 %v2611_v58  ;;  %v2019_v58 = vld [vmem:[#allocation11 + $0x28] sm:$0xff] }
 0x68e   :  { %6340 = vmatpush3.msra.mxu1 %v2579_v57 }
 0x690   :  { %v2607_v54 = vpop.permute.xlu0 %2606  ;;  %v2575_v46 = vpop.permute.xlu1 %2574 }
 0x694   :  { %v2605_v0 = vpop.permute.xlu0 %2604  ;;  %v2573_v38 = vpop.permute.xlu1 %2572 }
 0x698   :  { %v2603_v15 = vpop.permute.xlu0 %2602  ;;  %v2571_v39 = vpop.permute.xlu1 %2570 }
 0x69c   :  { %v2601_v33 = vpop.permute.xlu0 %2600  ;;  %v2569_v32 = vpop.permute.xlu1 %2568 }
 0x6a0   :  { %v2599_v3 = vpop.permute.xlu0 %2598  ;;  %v2567_v7 = vpop.permute.xlu1 %2566 }
 0x6a4   :  { %v2597_v42 = vpop.permute.xlu0 %2596  ;;  %v2565_v21 = vpop.permute.xlu1 %2564 }
 0x6a8   :  { %v2595_v20 = vpop.permute.xlu0 %2594  ;;  %v2563_v36 = vpop.permute.xlu1 %2562 }
 0x6ac   :  { %v2609_v13 = vpop.permute.xlu0 %2608  ;;  %v2577_v63 = vpop.permute.xlu1 %2576 }
 0x6ad   :  { %6341 = vmatprep.subr.mxu1 %v2609_v13 }
 0x6ae   :  { %6342 = vmatpush3.msra.mxu1 %v2577_v63 }
 0x6af   :  { %6343 = vmatprep.subr.mxu1 %v2607_v54 }
 0x6b0   :  { %v2591_v28 = vpop.permute.xlu0 %2590  ;;  %6344 = vmatpush3.msra.mxu1 %v2575_v46  ;;  %v2559_v62 = vpop.permute.xlu1 %2558 }
 0x6b1   :  { %6345 = vmatprep.subr.mxu1 %v2605_v0 }
 0x6b2   :  { %6346 = vmatpush3.msra.mxu1 %v2573_v38 }
 0x6b3   :  { %6347 = vmatprep.subr.mxu1 %v2603_v15  ;;  %v2020_v15 = vld [vmem:[#allocation11 + $0x30] sm:$0xff] }
 0x6b4   :  { %v2589_v49 = vpop.permute.xlu0 %2588  ;;  %6348 = vmatpush3.msra.mxu1 %v2571_v39  ;;  %v2557_v24 = vpop.permute.xlu1 %2556 }
 0x6b5   :  { %6349 = vmatprep.subr.mxu1 %v2601_v33 }
 0x6b6   :  { %6350 = vmatpush3.msra.mxu1 %v2569_v32 }
 0x6b7   :  { %6351 = vmatprep.subr.mxu1 %v2599_v3 }
 0x6b8   :  { %v2587_v44 = vpop.permute.xlu0 %2586  ;;  %6352 = vmatpush3.msra.mxu1 %v2567_v7  ;;  %v2555_v23 = vpop.permute.xlu1 %2554 }
 0x6b9   :  { %6353 = vmatprep.subr.mxu1 %v2597_v42  ;;  %v2021_v42 = vld [vmem:[#allocation11 + $0x38] sm:$0xff] }
 0x6ba   :  { %6354 = vmatpush3.msra.mxu1 %v2565_v21 }
 0x6bb   :  { %6355 = vmatprep.subr.mxu1 %v2595_v20 }
 0x6bc   :  { %v2593_v2 = vpop.permute.xlu0 %2592  ;;  %6356 = vmatpush3.msra.mxu1 %v2563_v36  ;;  %v2561_v11 = vpop.permute.xlu1 %2560 }
 0x6bd   :  { %6357 = vmatprep.subr.mxu1 %v2593_v2 }
 0x6be   :  { %6358 = vmatpush3.msra.mxu1 %v2561_v11 }
 0x6bf   :  { %6359 = vmatprep.subr.mxu1 %v2591_v28  ;;  %v2022_v28 = vld [vmem:[#allocation11 + $0x40] sm:$0xff] }
 0x6c0   :  { %v2585_v55 = vpop.permute.xlu0 %2584  ;;  %6360 = vmatpush3.msra.mxu1 %v2559_v62  ;;  %v2553_v51 = vpop.permute.xlu1 %2552 }
 0x6c1   :  { %6361 = vmatprep.subr.mxu1 %v2589_v49 }
 0x6c2   :  { %6362 = vmatpush3.msra.mxu1 %v2557_v24 }
 0x6c3   :  { %6363 = vmatprep.subr.mxu1 %v2587_v44 }
 0x6c4   :  { %v2583_v6 = vpop.permute.xlu0 %2582  ;;  %6364 = vmatpush3.msra.mxu1 %v2555_v23  ;;  %v2551_v37 = vpop.permute.xlu1 %2550 }
 0x6c5   :  { %6365 = vmatprep.subr.mxu1 %v2585_v55 }
 0x6c6   :  { %6366 = vmatpush3.msra.mxu1 %v2553_v51  ;;  %v2023_v51 = vld [vmem:[#allocation11 + $0x48] sm:$0xff] }
 0x6c7   :  { %6367 = vmatprep.subr.mxu1 %v2583_v6 }
 0x6c8   :  { %v2581_v60 = vpop.permute.xlu0 %2580  ;;  %6368 = vmatpush3.msra.mxu1 %v2551_v37  ;;  %v2549_v25 = vpop.permute.xlu1 %2548 }
 0x6c9   :  { %6369 = vmatprep.subr.mxu1 %v2581_v60  ;;  %v2024_v60 = vld [vmem:[#allocation11 + $0x50] sm:$0xff] }
 0x6ca   :  { %6370 = vmatpush3.msra.mxu1 %v2549_v25 }
 0x6d8   :  { %v2373_v4 = vpop.f32.mrf.mxu0 }
 0x6d9   :  { %v5833_v35 = vclamps-f32 %v2373_v4, 5.0 }
 0x6da   :  { %v2375_v16 = vpop.f32.mrf.mxu0 }
 0x6db   :  { %v2452_v18 = vadd.f32 %v5833_v35, %v2014_v9  ;;  %v5834_v26 = vclamps-f32 %v2375_v16, 5.0  ;;  %v2025_v16 = vld [vmem:[#allocation11 + $0x58] sm:$0xff] }
 0x6dc   :  { %v2379_v31 = vpop.f32.mrf.mxu0 }
 0x6dd   :  { %v2468_v53 = vmin.f32 %v2452_v18, 5.0  ;;  %v2453_v17 = vadd.f32 %v5834_v26, %v2015_v12  ;;  %v5835_v34 = vclamps-f32 %v2379_v31, 5.0 }
 0x6de   :  { %v2381_v41 = vpop.f32.mrf.mxu0 }
 0x6df   :  { %v2469_v8 = vmin.f32 %v2453_v17, 5.0  ;;  %v2454_v47 = vadd.f32 %v5835_v34, %v2016_v45  ;;  %v5836_v61 = vclamps-f32 %v2381_v41, 5.0  ;;  %v2484_v59 = vmul.f32 1.442695, %v2468_v53  ;;  %v2026_v34 = vld [vmem:[#allocation11 + $0x60] sm:$0xff] }
 0x6e0   :  { %v2385_v1 = vpop.f32.mrf.mxu0 }
 0x6e1   :  { %v2486_v52 = vmul.f32 1.442695, %v2469_v8  ;;  %v2470_v27 = vmin.f32 %v2454_v47, 5.0  ;;  %v2455_v30 = vadd.f32 %v5836_v61, %v2017_v50  ;;  %v5837_v43 = vclamps-f32 %v2385_v1, 5.0  ;;  %v2027_v1 = vld [vmem:[#allocation11 + $0x68] sm:$0xff] }
 0x6e2   :  { %v2387_v57 = vpop.f32.mrf.mxu0 }
 0x6e3   :  { %7132 = vpow2.f32 %v2486_v52  ;;  %v2471_v54 = vmin.f32 %v2455_v30, 5.0  ;;  %v5838_v46 = vclamps-f32 %v2387_v57, 5.0  ;;  %v2488_v0 = vmul.f32 1.442695, %v2470_v27 }
 0x6e4   :  { %7134 = vpow2.f32 %v2484_v59  ;;  %v2456_v38 = vadd.f32 %v5837_v43, %v2018_v56  ;;  %v2391_v39 = vpop.f32.mrf.mxu0 }
 0x6e5   :  { %v2490_v33 = vmul.f32 1.442695, %v2471_v54  ;;  %v2457_v32 = vadd.f32 %v5838_v46, %v2019_v58  ;;  %v5839_v3 = vclamps-f32 %v2391_v39, 5.0 }
 0x6e6   :  { %v2472_v7 = vmin.f32 %v2456_v38, 5.0  ;;  %v2393_v21 = vpop.f32.mrf.mxu0 }
 0x6e7   :  { %7136 = vpow2.f32 %v2490_v33  ;;  %v2473_v20 = vmin.f32 %v2457_v32, 5.0  ;;  %v2458_v36 = vadd.f32 %v5839_v3, %v2020_v15  ;;  %v5840_v13 = vclamps-f32 %v2393_v21, 5.0  ;;  %v2028_v15 = vld [vmem:[#allocation11 + $0x70] sm:$0xff]  ;;  %v2029_v33 = vld [vmem:[#allocation11 + $0x78] sm:$0xff] }
 0x6e8   :  { %7138 = vpow2.f32 %v2488_v0  ;;  %v2492_v63 = vmul.f32 1.442695, %v2472_v7  ;;  %v2397_v62 = vpop.f32.mrf.mxu0 }
 0x6e9   :  { %v2494_v49 = vmul.f32 1.442695, %v2473_v20  ;;  %v2474_v24 = vmin.f32 %v2458_v36, 5.0  ;;  %v2459_v44 = vadd.f32 %v5840_v13, %v2021_v42  ;;  %v5841_v23 = vclamps-f32 %v2397_v62, 5.0 }
 0x6ea   :  { %v2399_v2 = vpop.f32.mrf.mxu0 }
 0x6eb   :  { %7140 = vpow2.f32 %v2494_v49  ;;  %v2475_v11 = vmin.f32 %v2459_v44, 5.0  ;;  %v2460_v55 = vadd.f32 %v5841_v23, %v2022_v28  ;;  %v2496_v6 = vmul.f32 1.442695, %v2474_v24 }
 0x6ec   :  { %7142 = vpow2.f32 %v2492_v63  ;;  %v5842_v37 = vclamps-f32 %v2399_v2, 5.0  ;;  %v2403_v25 = vpop.f32.mrf.mxu0 }
 0x6ed   :  { %v2498_v9 = vmul.f32 1.442695, %v2475_v11  ;;  %v2476_v4 = vmin.f32 %v2460_v55, 5.0  ;;  %v5843_v35 = vclamps-f32 %v2403_v25, 5.0 }
 0x6ee   :  { %v2461_v12 = vadd.f32 %v5842_v37, %v2023_v51  ;;  %v2405_v18 = vpop.f32.mrf.mxu0 }
 0x6ef   :  { %7144 = vpow2.f32 %v2498_v9  ;;  %v2500_v26 = vmul.f32 1.442695, %v2476_v4  ;;  %v2462_v45 = vadd.f32 %v5843_v35, %v2024_v60  ;;  %v5844_v31 = vclamps-f32 %v2405_v18, 5.0  ;;  %v2033_v9 = vld [vmem:[#allocation8 + $0x168] sm:$0xff]  ;;  %v2032_v4 = vld [vmem:[#allocation8 + $0x160] sm:$0xff] }
 0x6f0   :  { %v7133_v53 = vpop.eup %7132  ;;  %7146 = vpow2.f32 %v2496_v6  ;;  %v2477_v17 = vmin.f32 %v2461_v12, 5.0  ;;  %v2409_v50 = vpop.f32.mrf.mxu0  ;;  %6779 = vmatprep.subr.mxu1 %v2033_v9 }
 0x6f1   :  { %v7135_v41 = vpop.eup %7134  ;;  %v2478_v8 = vmin.f32 %v2462_v45, 5.0  ;;  %v2463_v47 = vadd.f32 %v5844_v31, %v2025_v16  ;;  %v5845_v61 = vclamps-f32 %v2409_v50, 5.0  ;;  %2708 = vmatprep.mubr.f32.mxu1 %v7133_v53  ;;  %7148 = vpow2.f32 %v2500_v26  ;;  %v2031_v45 = vld [vmem:[#allocation8 + $0x158] sm:$0xff] }
 0x6f2   :  { %v2502_v59 = vmul.f32 1.442695, %v2477_v17  ;;  %v2411_v52 = vpop.f32.mrf.mxu0  ;;  %2709 = vmatmul.mubr.f32.vlgmr.msra.gmra.mxu1 %v7135_v41 }
 0x6f3   :  { %v2479_v27 = vmin.f32 %v2463_v47, 5.0  ;;  %v2464_v30 = vadd.f32 %v5845_v61, %v2026_v34  ;;  %v5846_v56 = vclamps-f32 %v2411_v52, 5.0  ;;  %v2504_v54 = vmul.f32 1.442695, %v2478_v8  ;;  %6780 = vmatpush3.msra.mxu1 %v2033_v9  ;;  %v2030_v34 = vld [vmem:[#allocation8 + $0x150] sm:$0xff]  ;;  %v2964_v9 = vld [vmem:[#allocation8 + $0x188] sm:$0xff] }
 0x6f4   :  { %v7137_v43 = vpop.eup %7136  ;;  %7150 = vpow2.f32 %v2502_v59  ;;  %v2415_v58 = vpop.f32.mrf.mxu0  ;;  %6781 = vmatprep.subr.mxu1 %v2032_v4 }
 0x6f5   :  { %v7139_v57 = vpop.eup %7138  ;;  %v2506_v46 = vmul.f32 1.442695, %v2479_v27  ;;  %v2480_v0 = vmin.f32 %v2464_v30, 5.0  ;;  %v2465_v38 = vadd.f32 %v5846_v56, %v2027_v1  ;;  %2713 = vmatprep.mubr.f32.mxu1 %v7137_v43  ;;  %v5847_v39 = vclamps-f32 %v2415_v58, 5.0  ;;  %6782 = vmatpush3.msra.mxu1 %v2032_v4  ;;  %v2931_v4 = vld [vmem:[#allocation7 + $0x8] sm:$0xff] }
 0x6f6   :  { %v2417_v32 = vpop.f32.mrf.mxu0  ;;  %2714 = vmatmul.mubr.f32.gmra.mxu1 %v7139_v57  ;;  %6783 = vmatprep.subr.mxu1 %v2031_v45 }
 0x6f7   :  { %7152 = vpow2.f32 %v2506_v46  ;;  %v2481_v3 = vmin.f32 %v2465_v38, 5.0  ;;  %v5848_v7 = vclamps-f32 %v2417_v32, 5.0  ;;  %v2466_v21 = vadd.f32 %v5847_v39, %v2028_v15  ;;  %6784 = vmatpush3.msra.mxu1 %v2031_v45  ;;  %v3162_v32 = vld [vmem:[#allocation8 + $0x1b0] sm:$0xff] }
 0x6f8   :  { %v7141_v42 = vpop.eup %7140  ;;  %7154 = vpow2.f32 %v2504_v54  ;;  %v2508_v36 = vmul.f32 1.442695, %v2480_v0  ;;  %6785 = vmatprep.subr.mxu1 %v2030_v34  ;;  %6831 = vmatprep.subr.mxu0 %v3162_v32  ;;  %v7342_v45 = vld [vmem:[#allocation8 + $0x10] sm:$0xff] }
 0x6f9   :  { %v7143_v20 = vpop.eup %7142  ;;  %v2510_v13 = vmul.f32 1.442695, %v2481_v3  ;;  %v2467_v63 = vadd.f32 %v5848_v7, %v2029_v33  ;;  %2718 = vmatprep.mubr.f32.mxu1 %v7141_v42  ;;  %v2482_v28 = vmin.f32 %v2466_v21, 5.0  ;;  %6786 = vmatpush3.msra.mxu1 %v2030_v34  ;;  %v3161_v3 = vld [vmem:[#allocation8 + $0x1a8] sm:$0xff]  ;;  %v7343_v34 = vld [vmem:[#allocation8 + $0x18] sm:$0xff] }
 0x6fa   :  { %2719 = vmatmul.mubr.f32.gmra.mxu1 %v7143_v20  ;;  %6832 = vmatpush3.msra.mxu0 %v3162_v32  ;;  %v2941_v32 = vld [vmem:[#allocation7 + $0x58] sm:$0xff] }
 0x6fb   :  { %7156 = vpow2.f32 %v2510_v13  ;;  %v2483_v62 = vmin.f32 %v2467_v63, 5.0  ;;  %v2512_v44 = vmul.f32 1.442695, %v2482_v28  ;;  %6833 = vmatprep.subr.mxu0 %v3161_v3 }
 0x6fc   :  { %v7145_v49 = vpop.eup %7144  ;;  %7158 = vpow2.f32 %v2508_v36  ;;  %6834 = vmatpush3.msra.mxu0 %v3161_v3  ;;  %v2942_v3 = vld [vmem:[#allocation7 + $0x60] sm:$0xff] }
 0x6fd   :  { %v7147_v24 = vpop.eup %7146  ;;  %v2514_v23 = vmul.f32 1.442695, %v2483_v62  ;;  %2723 = vmatprep.mubr.f32.mxu1 %v7145_v49 }
 0x6fe   :  { %2724 = vmatmul.mubr.f32.gmra.mxu1 %v7147_v24  ;;  %v7149_v2 = vpop.eup %7148 }
 0x6ff   :  { %7160 = vpow2.f32 %v2514_v23  ;;  %v2930_v23 = vld [vmem:[#allocation7] sm:$0xff] }
 0x700   :  { %7162 = vpow2.f32 %v2512_v44 }
 0x701   :  { %v7151_v11 = vpop.eup %7150 }
 0x702   :  { %2728 = vmatprep.mubr.f32.mxu1 %v7151_v11  ;;  %v7340_v11 = vld [vmem:[#allocation8] sm:$0xff] }
 0x703   :  { %2729 = vmatmul.mubr.f32.gmra.mxu1 %v7149_v2 }
 0x704   :  { %v7153_v55 = vpop.eup %7152 }
 0x705   :  { %2733 = vmatprep.mubr.f32.mxu1 %v7153_v55  ;;  %v7155_v51 = vpop.eup %7154  ;;  %v8478_v55 = vadd.f32 %v7340_v11, %v2930_v23 }
 0x707   :  { %2734 = vmatmul.mubr.f32.gmra.mxu1 %v7155_v51 }
 0x708   :  { %v7157_v6 = vpop.eup %7156 }
 0x709   :  { %2738 = vmatprep.mubr.f32.mxu1 %v7157_v6  ;;  %v7159_v37 = vpop.eup %7158 }
 0x70b   :  { %2739 = vmatmul.mubr.f32.gmra.mxu1 %v7159_v37  ;;  %v3160_v37 = vld [vmem:[#allocation8 + $0x1a0] sm:$0xff] }
 0x70c   :  { %v7161_v60 = vpop.eup %7160  ;;  %6835 = vmatprep.subr.mxu0 %v3160_v37 }
 0x70d   :  { %2743 = vmatprep.mubr.f32.mxu1 %v7161_v60  ;;  %v7163_v25 = vpop.eup %7162  ;;  %6836 = vmatpush3.msra.mxu0 %v3160_v37  ;;  %v3159_v60 = vld [vmem:[#allocation8 + $0x198] sm:$0xff] }
 0x70e   :  { %6837 = vmatprep.subr.mxu0 %v3159_v60 }
 0x70f   :  { %2744 = vmatmul.mubr.f32.gmra.mxu1 %v7163_v25  ;;  %6838 = vmatpush3.msra.mxu0 %v3159_v60  ;;  %v2965_v25 = vld [vmem:[#allocation8 + $0x190] sm:$0xff] }
 0x710   :  { %6799 = vmatprep.subr.mxu1 %v2965_v25 }
 0x7b2   :  { %v6371_v35 = vpop.f32.mrf.mxu1 }
 0x7b4   :  { %v6372_v12 = vpop.f32.mrf.mxu1 }
 0x7b5   :  { %v8451_v16 = vadd.f32 %v6372_v12, %v6371_v35  ;;  %v2963_v35 = vld [vmem:[#allocation8 + $0x180] sm:$0xff]  ;;  %v2932_v12 = vld [vmem:[#allocation7 + $0x10] sm:$0xff] }
 0x7b6   :  { %v6374_v18 = vpop.f32.mrf.mxu1 }
 0x7b7   :  { %7164 = vrcp.f32 %v8451_v16 }
 0x7b8   :  { %v6375_v26 = vpop.f32.mrf.mxu1 }
 0x7b9   :  { %v6376_v31 = vadd.f32 %v6375_v26, %v6374_v18  ;;  %v7341_v18 = vld [vmem:[#allocation8 + $0x8] sm:$0xff] }
 0x7ba   :  { %v6377_v53 = vpop.f32.mrf.mxu1  ;;  %v8483_v26 = vadd.f32 %v7341_v18, %v2931_v4 }
 0x7bb   :  { %7166 = vrcp.f32 %v6376_v31 }
 0x7bc   :  { %v6378_v17 = vpop.f32.mrf.mxu1 }
 0x7bd   :  { %v6379_v50 = vadd.f32 %v6378_v17, %v6377_v53  ;;  %v2933_v53 = vld [vmem:[#allocation7 + $0x18] sm:$0xff]  ;;  %v2934_v17 = vld [vmem:[#allocation7 + $0x20] sm:$0xff] }
 0x7be   :  { %v6380_v41 = vpop.f32.mrf.mxu1 }
 0x7bf   :  { %7168 = vrcp.f32 %v6379_v50 }
 0x7c0   :  { %v6381_v8 = vpop.f32.mrf.mxu1 }
 0x7c1   :  { %v6382_v47 = vadd.f32 %v6381_v8, %v6380_v41  ;;  %v7344_v41 = vld [vmem:[#allocation8 + $0x20] sm:$0xff] }
 0x7c2   :  { %v8493_v8 = vadd.f32 %v7344_v41, %v2934_v17  ;;  %v5874_v17 = vld [vmem:[#allocation8 + $0x1b8] ss:$0 sm:$0xff] }
 0x7c3   :  { %7170 = vrcp.f32 %v6382_v47  ;;  %v6383_v61 = vpop.f32.mrf.mxu1 }
 0x7c4   :  { %v7165_v59 = vpop.eup %7164 }
 0x7c5   :  { %v6384_v1 = vpop.f32.mrf.mxu1  ;;  %2765 = vrot.lane.b32.xlu0 %v7165_v59, %s7540_s4  ;;  %v7345_v59 = vld [vmem:[#allocation8 + $0x28] sm:$0xff] }
 0x7c6   :  { %v6385_v52 = vadd.f32 %v6384_v1, %v6383_v61  ;;  %v2936_v61 = vld [vmem:[#allocation7 + $0x30] sm:$0xff] }
 0x7c7   :  { %v6386_v27 = vpop.f32.mrf.mxu1 }
 0x7c8   :  { %v7167_v30 = vpop.eup %7166  ;;  %7172 = vrcp.f32 %v6385_v52 }
 0x7c9   :  { %v6387_v56 = vpop.f32.mrf.mxu1  ;;  %2767 = vrot.lane.b32.xlu1 %v7167_v30, %s7540_s4  ;;  %v2937_v30 = vld [vmem:[#allocation7 + $0x38] sm:$0xff] }
 0x7ca   :  { %v6388_v43 = vadd.f32 %v6387_v56, %v6386_v27  ;;  %v2938_v56 = vld [vmem:[#allocation7 + $0x40] sm:$0xff] }
 0x7cb   :  { %v6389_v58 = vpop.f32.mrf.mxu1 }
 0x7cc   :  { %v7169_v57 = vpop.eup %7168  ;;  %7174 = vrcp.f32 %v6388_v43 }
 0x7cd   :  { %v6390_v54 = vpop.f32.mrf.mxu1  ;;  %2769 = vrot.lane.b32.xlu0 %v7169_v57, %s7540_s4  ;;  %v7348_v57 = vld [vmem:[#allocation8 + $0x40] sm:$0xff] }
 0x7ce   :  { %v6391_v46 = vadd.f32 %v6390_v54, %v6389_v58  ;;  %v8509_v54 = vadd.f32 %v7348_v57, %v2938_v56 }
 0x7cf   :  { %v6392_v0 = vpop.f32.mrf.mxu1 }
 0x7d0   :  { %v7171_v38 = vpop.eup %7170  ;;  %7176 = vrcp.f32 %v6391_v46 }
 0x7d1   :  { %v6393_v15 = vpop.f32.mrf.mxu1  ;;  %2771 = vrot.lane.b32.xlu1 %v7171_v38, %s7540_s4  ;;  %v7349_v38 = vld [vmem:[#allocation8 + $0x48] sm:$0xff] }
 0x7d2   :  { %v6394_v39 = vadd.f32 %v6393_v15, %v6392_v0  ;;  %v2940_v0 = vld [vmem:[#allocation7 + $0x50] sm:$0xff] }
 0x7d4   :  { %7178 = vrcp.f32 %v6394_v39 }
 0x7d5   :  { %v7173_v33 = vpop.eup %7172 }
 0x7d6   :  { %2773 = vrot.lane.b32.xlu0 %v7173_v33, %s7540_s4 }
 0x7d9   :  { %v7175_v7 = vpop.eup %7174 }
 0x7da   :  { %2775 = vrot.lane.b32.xlu1 %v7175_v7, %s7540_s4  ;;  %v7351_v7 = vld [vmem:[#allocation8 + $0x58] sm:$0xff] }
 0x7dd   :  { %v7177_v42 = vpop.eup %7176 }
 0x7de   :  { %2777 = vrot.lane.b32.xlu0 %v7177_v42, %s7540_s4  ;;  %v8521_v42 = vadd.f32 %v7351_v7, %v2941_v32 }
 0x7e1   :  { %v7179_v21 = vpop.eup %7178 }
 0x7e2   :  { %2779 = vrot.lane.b32.xlu1 %v7179_v21, %s7540_s4  ;;  %3372 = vrot.lane.b32.xlu0 %v9516_v48, %s7537_s9  ;;  %v7352_v21 = vld [vmem:[#allocation8 + $0x60] sm:$0xff] }
 0x7e6   :  { %3368 = vrot.lane.b32.xlu1 %v9517_v14, %s7537_s9  ;;  %3370 = vrot.lane.b32.xlu0 %v9518_v40, %s7537_s9 }
 0x7ea   :  { %3366 = vrot.lane.b32.xlu1 %v9519_v19, %s7537_s9 }
 0x837   :  { %v2766_v20 = vpop.permute.xlu0 %2765 }
 0x838   :  { %v2789_v36 = vmul.f32 %v8451_v16, %v2766_v20  ;;  %v2962_v16 = vld [vmem:[#allocation8 + $0x178] sm:$0xff]  ;;  %v8525_v20 = vadd.f32 %v7352_v21, %v2942_v3 }
 0x83a   :  { %6787 = vmatprep.mubr.msk.f32.mxu1 %vm176_vm0, %v2789_v36  ;;  %v2943_v36 = vld [vmem:[#allocation7 + $0x68] sm:$0xff] }
 0x83b   :  { %v2768_v13 = vpop.permute.xlu1 %2767 }
 0x83c   :  { %v2790_v63 = vmul.f32 %v6376_v31, %v2768_v13  ;;  %v8485_v31 = vadd.f32 %v7342_v45, %v2932_v12  ;;  %v2944_v13 = vld [vmem:[#allocation7 + $0x70] sm:$0xff] }
 0x83e   :  { %6788 = vmatmul.mubr.msk.f32.vlgmr.msra.gmra.mxu1 %vm176_vm0, %v2790_v63  ;;  %v7353_v63 = vld [vmem:[#allocation8 + $0x68] sm:$0xff] }
 0x83f   :  { %v2770_v28 = vpop.permute.xlu0 %2769  ;;  %6800 = vmatpush3.msra.mxu1 %v2965_v25 }
 0x840   :  { %v2791_v48 = vmul.f32 %v6379_v50, %v2770_v28  ;;  %6801 = vmatprep.subr.mxu1 %v2964_v9  ;;  %v8489_v50 = vadd.f32 %v7343_v34, %v2933_v53  ;;  %v8529_v28 = vadd.f32 %v7353_v63, %v2943_v36 }
 0x841   :  { %6802 = vmatpush3.msra.mxu1 %v2964_v9 }
 0x842   :  { %6790 = vmatprep.mubr.msk.f32.mxu1 %vm176_vm0, %v2791_v48  ;;  %6803 = vmatprep.subr.mxu1 %v2963_v35  ;;  %v7354_v48 = vld [vmem:[#allocation8 + $0x70] sm:$0xff] }
 0x843   :  { %v2772_v14 = vpop.permute.xlu1 %2771  ;;  %6804 = vmatpush3.msra.mxu1 %v2963_v35 }
 0x844   :  { %v2792_v62 = vmul.f32 %v6382_v47, %v2772_v14  ;;  %6805 = vmatprep.subr.mxu1 %v2962_v16  ;;  %v2935_v47 = vld [vmem:[#allocation7 + $0x28] sm:$0xff]  ;;  %v8533_v14 = vadd.f32 %v7354_v48, %v2944_v13 }
 0x845   :  { %6806 = vmatpush3.msra.mxu1 %v2962_v16  ;;  %v8497_v1 = vadd.f32 %v7345_v59, %v2935_v47 }
 0x846   :  { %6791 = vmatmul.mubr.msk.f32.gmra.mxu1 %vm176_vm0, %v2792_v62  ;;  %v2945_v62 = vld [vmem:[#allocation7 + $0x78] sm:$0xff] }
 0x848   :  { %v2774_v40 = vpop.permute.xlu0 %2773 }
 0x849   :  { %v2793_v49 = vmul.f32 %v6385_v52, %v2774_v40  ;;  %v7346_v52 = vld [vmem:[#allocation8 + $0x30] sm:$0xff]  ;;  %v7355_v40 = vld [vmem:[#allocation8 + $0x78] sm:$0xff] }
 0x84a   :  { %v8501_v27 = vadd.f32 %v7346_v52, %v2936_v61 }
 0x84b   :  { %6793 = vmatprep.mubr.msk.f32.mxu1 %vm176_vm0, %v2793_v49  ;;  %v8537_v49 = vadd.f32 %v7355_v40, %v2945_v62 }
 0x84c   :  { %v2776_v19 = vpop.permute.xlu1 %2775 }
 0x84d   :  { %v2794_v24 = vmul.f32 %v6388_v43, %v2776_v19  ;;  %v7347_v43 = vld [vmem:[#allocation8 + $0x38] sm:$0xff] }
 0x84e   :  { %v8505_v58 = vadd.f32 %v7347_v43, %v2937_v30 }
 0x84f   :  { %6794 = vmatmul.mubr.msk.f32.gmra.mxu1 %vm176_vm0, %v2794_v24  ;;  %v5849_v24 = vld [vmem:[#allocation8 + $0x170] ss:$0 sm:$0xff] }
 0x850   :  { %v2778_v44 = vpop.permute.xlu0 %2777 }
 0x851   :  { %v2795_v2 = vmul.f32 %v6391_v46, %v2778_v44  ;;  %v2939_v46 = vld [vmem:[#allocation7 + $0x48] sm:$0xff] }
 0x852   :  { %v8513_v15 = vadd.f32 %v7349_v38, %v2939_v46 }
 0x853   :  { %6796 = vmatprep.mubr.msk.f32.mxu1 %vm176_vm0, %v2795_v2 }
 0x854   :  { %v2780_v51 = vpop.permute.xlu1 %2779  ;;  %v3373_v61 = vpop.permute.xlu0 %3372 }
 0x855   :  { %v2796_v6 = vmul.f32 %v6394_v39, %v2780_v51  ;;  %v7350_v39 = vld [vmem:[#allocation8 + $0x50] sm:$0xff] }
 0x856   :  { %v8517_v33 = vadd.f32 %v7350_v39, %v2940_v0 }
 0x857   :  { %6797 = vmatmul.mubr.msk.f32.gmra.mxu1 %vm176_vm0, %v2796_v6 }
 0x858   :  { %6807 = vmatprep.mubr.msk.f32.mxu1 %vm176_vm0, %v8478_v55  ;;  %v3369_v41 = vpop.permute.xlu1 %3368 }
 0x85b   :  { %6808 = vmatmul.mubr.msk.f32.vlgmr.msra.gmra.mxu1 %vm176_vm0, %v8483_v26 }
 0x85c   :  { %6810 = vmatprep.mubr.msk.f32.mxu1 %vm176_vm0, %v8485_v31 }
 0x85f   :  { %6811 = vmatmul.mubr.msk.f32.gmra.mxu1 %vm176_vm0, %v8489_v50 }
 0x860   :  { %6813 = vmatprep.mubr.msk.f32.mxu1 %vm176_vm0, %v8493_v8 }
 0x863   :  { %6814 = vmatmul.mubr.msk.f32.gmra.mxu1 %vm176_vm0, %v8497_v1 }
 0x864   :  { %6816 = vmatprep.mubr.msk.f32.mxu1 %vm176_vm0, %v8501_v27 }
 0x867   :  { %6817 = vmatmul.mubr.msk.f32.gmra.mxu1 %vm176_vm0, %v8505_v58 }
 0x868   :  { %6819 = vmatprep.mubr.msk.f32.mxu1 %vm176_vm0, %v8509_v54 }
 0x86b   :  { %6820 = vmatmul.mubr.msk.f32.gmra.mxu1 %vm176_vm0, %v8513_v15 }
 0x86c   :  { %6822 = vmatprep.mubr.msk.f32.mxu1 %vm176_vm0, %v8517_v33 }
 0x86f   :  { %6823 = vmatmul.mubr.msk.f32.gmra.mxu1 %vm176_vm0, %v8521_v42 }
 0x870   :  { %6825 = vmatprep.mubr.msk.f32.mxu1 %vm176_vm0, %v8525_v20 }
 0x873   :  { %6826 = vmatmul.mubr.msk.f32.gmra.mxu1 %vm176_vm0, %v8529_v28 }
 0x874   :  { %6828 = vmatprep.mubr.msk.f32.mxu1 %vm176_vm0, %v8533_v14 }
 0x877   :  { %6829 = vmatmul.mubr.msk.f32.gmra.mxu1 %vm176_vm0, %v8537_v49 }
 0x8fe   :  { %v6789_v19 = vpop.f32.mrf.mxu1 }
 0x8ff   :  { %v2897_v2 = vadd.f32 %v6789_v19, %v5849_v24 }
 0x900   :  { %v2891_v44 = vpop.f32.mrf.mxu1 }
 0x901   :  { %v2892_v23 = vadd.f32 %v5849_v24, %v2891_v44 }
 0x903   :  { %6839 = vmatprep.mubr.msk.f32.mxu0 %vm176_vm0, %v2892_v23 }
 0x904   :  { %6840 = vmatmul.mubr.msk.f32.vlgmr.msra.gmra.mxu0 %vm176_vm0, %v2897_v2 }
 0x906   :  { %v6792_v11 = vpop.f32.mrf.mxu1 }
 0x907   :  { %v2907_v37 = vadd.f32 %v6792_v11, %v5849_v24 }
 0x908   :  { %v2901_v51 = vpop.f32.mrf.mxu1 }
 0x909   :  { %v2902_v6 = vadd.f32 %v5849_v24, %v2901_v51 }
 0x90b   :  { %6842 = vmatprep.mubr.msk.f32.mxu0 %vm176_vm0, %v2902_v6 }
 0x90c   :  { %6843 = vmatmul.mubr.msk.f32.gmra.mxu0 %vm176_vm0, %v2907_v37 }
 0x90f   :  { %v6795_v60 = vpop.f32.mrf.mxu1 }
 0x910   :  { %v2917_v4 = vadd.f32 %v6795_v60, %v5849_v24 }
 0x911   :  { %v2911_v25 = vpop.f32.mrf.mxu1 }
 0x912   :  { %v2912_v9 = vadd.f32 %v5849_v24, %v2911_v25 }
 0x914   :  { %6845 = vmatprep.mubr.msk.f32.mxu0 %vm176_vm0, %v2912_v9  ;;  %v8607_v9 = vpop.permute.xlu1 %3366 }
 0x915   :  { %6846 = vmatmul.mubr.msk.f32.gmra.mxu0 %vm176_vm0, %v2917_v4  ;;  %v8611_v4 = vpop.permute.xlu0 %3370 }
 0x917   :  { %v6798_v35 = vpop.f32.mrf.mxu1 }
 0x918   :  { %v2927_v18 = vadd.f32 %v6798_v35, %v5849_v24 }
 0x919   :  { %v2921_v12 = vpop.f32.mrf.mxu1 }
 0x91a   :  { %v2922_v16 = vadd.f32 %v5849_v24, %v2921_v12 }
 0x91b   :  { %v8551_v45 = vpop.f32.mrf.mxu1 }
 0x91c   :  { %6848 = vmatprep.mubr.msk.f32.mxu0 %vm176_vm0, %v2922_v16 }
 0x91d   :  { %6849 = vmatmul.mubr.msk.f32.gmra.mxu0 %vm176_vm0, %v2927_v18  ;;  %v8553_v53 = vpop.f32.mrf.mxu1 }
 0x91e   :  { %6471 = vmatprep.mubr.msk.f32.mxu1 %vm176_vm0, %v8553_v53 }
 0x9c4   :  { %v6841_v34 = vpop.f32.mrf.mxu0 }
 0x9c5   :  { %v8557_v47 = vadd.f32 %v6841_v34, %v5874_v17 }
 0x9c6   :  { %v3258_v59 = vpop.f32.mrf.mxu0 }
 0x9c7   :  { %v8559_v52 = vadd.f32 %v5874_v17, %v3258_v59  ;;  %v3387_v30 = vmul.f32 %v3369_v41, %v8557_v47  ;;  %v3403_v56 = vmul.f32 %v3373_v61, %v8557_v47 }
 0x9c9   :  { %3957 = vrot.lane.b32.xlu1 %v3387_v30, %s7540_s4  ;;  %3989 = vrot.lane.b32.xlu0 %v3403_v56, %s7540_s4  ;;  %v3386_v43 = vmul.f32 %v3369_v41, %v8559_v52  ;;  %v3402_v57 = vmul.f32 %v3373_v61, %v8559_v52 }
 0x9cc   :  { %v6844_v46 = vpop.f32.mrf.mxu0 }
 0x9cd   :  { %v8567_v0 = vadd.f32 %v6844_v46, %v5874_v17  ;;  %3955 = vrot.lane.b32.xlu1 %v3386_v43, %s7540_s4  ;;  %3987 = vrot.lane.b32.xlu0 %v3402_v57, %s7540_s4 }
 0x9ce   :  { %v3268_v38 = vpop.f32.mrf.mxu0 }
 0x9cf   :  { %v8571_v39 = vadd.f32 %v5874_v17, %v3268_v38  ;;  %v3389_v32 = vmul.f32 %v3369_v41, %v8567_v0  ;;  %v3405_v3 = vmul.f32 %v3373_v61, %v8567_v0  ;;  %v3361_v43 = vmul.f32 %v8567_v0, %v9514_v22 }
 0x9d0   :  { %v3345_v38 = vmul.f32 %v8567_v0, %v9512_v5 }
 0x9d1   :  { %3961 = vrot.lane.b32.xlu1 %v3389_v32, %s7540_s4  ;;  %3993 = vrot.lane.b32.xlu0 %v3405_v3, %s7540_s4  ;;  %v3388_v7 = vmul.f32 %v3369_v41, %v8571_v39  ;;  %v3404_v21 = vmul.f32 %v3373_v61, %v8571_v39  ;;  %v3360_v32 = vmul.f32 %v8571_v39, %v9514_v22 }
 0x9d2   :  { %v3381_v3 = vmul.f32 %v8607_v9, %v8567_v0 }
 0x9d5   :  { %v6847_v36 = vpop.f32.mrf.mxu0  ;;  %3959 = vrot.lane.b32.xlu1 %v3388_v7, %s7540_s4  ;;  %3991 = vrot.lane.b32.xlu0 %v3404_v21, %s7540_s4  ;;  %v3397_v7 = vmul.f32 %v8611_v4, %v8567_v0  ;;  %v3344_v21 = vmul.f32 %v8571_v39, %v9512_v5 }
 0x9d6   :  { %v8581_v13 = vadd.f32 %v6847_v36, %v5874_v17  ;;  %v3359_v36 = vmul.f32 %v8557_v47, %v9514_v22 }
 0x9d7   :  { %v3278_v63 = vpop.f32.mrf.mxu0 }
 0x9d8   :  { %v8583_v48 = vadd.f32 %v5874_v17, %v3278_v63  ;;  %v3391_v62 = vmul.f32 %v3369_v41, %v8581_v13  ;;  %v3407_v40 = vmul.f32 %v3373_v61, %v8581_v13  ;;  %v3363_v18 = vmul.f32 %v8581_v13, %v9514_v22 }
 0x9d9   :  { %v3347_v59 = vmul.f32 %v8581_v13, %v9512_v5  ;;  %v3383_v56 = vmul.f32 %v8607_v9, %v8581_v13 }
 0x9da   :  { %3965 = vrot.lane.b32.xlu1 %v3391_v62, %s7540_s4  ;;  %3997 = vrot.lane.b32.xlu0 %v3407_v40, %s7540_s4  ;;  %v3390_v19 = vmul.f32 %v3369_v41, %v8583_v48  ;;  %v3406_v24 = vmul.f32 %v3373_v61, %v8583_v48  ;;  %v3362_v30 = vmul.f32 %v8583_v48, %v9514_v22 }
 0x9db   :  { %v3382_v57 = vmul.f32 %v8607_v9, %v8583_v48  ;;  %v3398_v46 = vmul.f32 %v8611_v4, %v8583_v48  ;;  %v3343_v40 = vmul.f32 %v8557_v47, %v9512_v5 }
 0x9dd   :  { %v6850_v44 = vpop.f32.mrf.mxu0 }
 0x9de   :  { %v8591_v23 = vadd.f32 %v6850_v44, %v5874_v17  ;;  %3963 = vrot.lane.b32.xlu1 %v3390_v19, %s7540_s4  ;;  %3995 = vrot.lane.b32.xlu0 %v3406_v24, %s7540_s4  ;;  %v3358_v19 = vmul.f32 %v8559_v52, %v9514_v22  ;;  %v3380_v24 = vmul.f32 %v8607_v9, %v8571_v39 }
 0x9df   :  { %v3288_v2 = vpop.f32.mrf.mxu0  ;;  %v3396_v44 = vmul.f32 %v8611_v4, %v8571_v39 }
 0x9e0   :  { %v8595_v11 = vadd.f32 %v5874_v17, %v3288_v2  ;;  %v3393_v51 = vmul.f32 %v3369_v41, %v8591_v23  ;;  %v3365_v6 = vmul.f32 %v8591_v23, %v9514_v22  ;;  %v3409_v37 = vmul.f32 %v3373_v61, %v8591_v23 }
 0x9e1   :  { %v3349_v60 = vmul.f32 %v8591_v23, %v9512_v5  ;;  %v3385_v35 = vmul.f32 %v8607_v9, %v8591_v23  ;;  %v3401_v12 = vmul.f32 %v8611_v4, %v8591_v23  ;;  %v3342_v2 = vmul.f32 %v8559_v52, %v9512_v5 }
 0x9e2   :  { %3969 = vrot.lane.b32.xlu1 %v3393_v51, %s7540_s4  ;;  %6439 = vmatprep.subr.msk.mxu1 %vm176_vm0, %v3365_v6  ;;  %v3364_v25 = vmul.f32 %v8595_v11, %v9514_v22  ;;  %v3348_v16 = vmul.f32 %v8595_v11, %v9512_v5  ;;  %v3392_v17 = vmul.f32 %v3369_v41, %v8595_v11 }
 0x9e3   :  { %4001 = vrot.lane.b32.xlu0 %v3409_v37, %s7540_s4  ;;  %6440 = vmatpush3.xpose.msk.msra.mxu1 %vm176_vm0, %v3349_v60  ;;  %v3408_v34 = vmul.f32 %v3373_v61, %v8595_v11  ;;  %v3399_v41 = vmul.f32 %v8611_v4, %v8581_v13  ;;  %v3346_v61 = vmul.f32 %v8583_v48, %v9512_v5 }
 0x9e4   :  { %6441 = vmatprep.subr.msk.mxu1 %vm176_vm0, %v3364_v25  ;;  %v3384_v63 = vmul.f32 %v8607_v9, %v8595_v11  ;;  %v3400_v62 = vmul.f32 %v8611_v4, %v8595_v11  ;;  %v3357_v22 = vmul.f32 %v8591_v23, %v9515_v10  ;;  %v3379_v51 = vmul.f32 %v8607_v9, %v8557_v47 }
 0x9e5   :  { %v3395_v6 = vmul.f32 %v8611_v4, %v8557_v47  ;;  %v3341_v5 = vmul.f32 %v8591_v23, %v9513_v29  ;;  %v3356_v37 = vmul.f32 %v8595_v11, %v9515_v10  ;;  %v3378_v60 = vmul.f32 %v8607_v9, %v8559_v52 }
 0x9e6   :  { %3953 = vrot.lane.b32.xlu1 %v3385_v35, %s7540_s4  ;;  %v3394_v25 = vmul.f32 %v8611_v4, %v8559_v52  ;;  %v3340_v23 = vmul.f32 %v8595_v11, %v9513_v29  ;;  %v3355_v35 = vmul.f32 %v8581_v13, %v9515_v10  ;;  %v3339_v9 = vmul.f32 %v8581_v13, %v9513_v29 }
 0x9e7   :  { %3985 = vrot.lane.b32.xlu0 %v3401_v12, %s7540_s4  ;;  %6442 = vmatpush3.xpose.msk.msra.mxu1 %vm176_vm0, %v3348_v16  ;;  %v3354_v4 = vmul.f32 %v8583_v48, %v9515_v10  ;;  %v3338_v11 = vmul.f32 %v8583_v48, %v9513_v29  ;;  %v3353_v12 = vmul.f32 %v8567_v0, %v9515_v10 }
 0x9e8   :  { %6443 = vmatprep.subr.msk.mxu1 %vm176_vm0, %v3363_v18  ;;  %v3337_v13 = vmul.f32 %v8567_v0, %v9513_v29  ;;  %v3352_v16 = vmul.f32 %v8571_v39, %v9515_v10  ;;  %v3336_v48 = vmul.f32 %v8571_v39, %v9513_v29  ;;  %v3351_v18 = vmul.f32 %v8557_v47, %v9515_v10 }
 0x9e9   :  { %v3335_v0 = vmul.f32 %v8557_v47, %v9513_v29  ;;  %v3334_v39 = vmul.f32 %v8559_v52, %v9513_v29 }
 0x9ea   :  { %3967 = vrot.lane.b32.xlu1 %v3392_v17, %s7540_s4  ;;  %v3350_v17 = vmul.f32 %v8559_v52, %v9515_v10 }
 0x9eb   :  { %3999 = vrot.lane.b32.xlu0 %v3408_v34, %s7540_s4  ;;  %6444 = vmatpush3.xpose.msk.msra.mxu1 %vm176_vm0, %v3347_v59  ;;  %v6812_v34 = vpop.f32.mrf.mxu1 }
 0x9ec   :  { %6445 = vmatprep.subr.msk.mxu1 %vm176_vm0, %v3362_v30 }
 0x9ed   :  { %v3090_v47 = vpop.f32.mrf.mxu1 }
 0x9ee   :  { %3949 = vrot.lane.b32.xlu1 %v3383_v56, %s7540_s4 }
 0x9ef   :  { %3981 = vrot.lane.b32.xlu0 %v3399_v41, %s7540_s4  ;;  %6446 = vmatpush3.xpose.msk.msra.mxu1 %vm176_vm0, %v3346_v61  ;;  %v6815_v10 = vpop.f32.mrf.mxu1 }
 0x9f0   :  { %6447 = vmatprep.subr.msk.mxu1 %vm176_vm0, %v3361_v43 }
 0x9f1   :  { %v3100_v29 = vpop.f32.mrf.mxu1 }
 0x9f2   :  { %3947 = vrot.lane.b32.xlu1 %v3382_v57, %s7540_s4 }
 0x9f3   :  { %3979 = vrot.lane.b32.xlu0 %v3398_v46, %s7540_s4  ;;  %6448 = vmatpush3.xpose.msk.msra.mxu1 %vm176_vm0, %v3345_v38 }
 0x9f4   :  { %6449 = vmatprep.subr.msk.mxu1 %vm176_vm0, %v3360_v32 }
 0x9f6   :  { %3945 = vrot.lane.b32.xlu1 %v3381_v3, %s7540_s4 }
 0x9f7   :  { %3977 = vrot.lane.b32.xlu0 %v3397_v7, %s7540_s4  ;;  %6450 = vmatpush3.xpose.msk.msra.mxu1 %vm176_vm0, %v3344_v21 }
 0x9f8   :  { %6451 = vmatprep.subr.msk.mxu1 %vm176_vm0, %v3359_v36 }
 0x9fa   :  { %3951 = vrot.lane.b32.xlu1 %v3384_v63, %s7540_s4 }
 0x9fb   :  { %3983 = vrot.lane.b32.xlu0 %v3400_v62, %s7540_s4  ;;  %6452 = vmatpush3.xpose.msk.msra.mxu1 %vm176_vm0, %v3343_v40 }
 0x9fc   :  { %6453 = vmatprep.subr.msk.mxu1 %vm176_vm0, %v3358_v19 }
 0x9fe   :  { %3943 = vrot.lane.b32.xlu1 %v3380_v24, %s7540_s4 }
 0x9ff   :  { %3975 = vrot.lane.b32.xlu0 %v3396_v44, %s7540_s4  ;;  %6454 = vmatpush3.xpose.msk.msra.mxu1 %vm176_vm0, %v3342_v2 }
 0xa00   :  { %6455 = vmatprep.subr.msk.mxu1 %vm176_vm0, %v3357_v22 }
 0xa02   :  { %3941 = vrot.lane.b32.xlu1 %v3379_v51, %s7540_s4 }
 0xa03   :  { %3973 = vrot.lane.b32.xlu0 %v3395_v6, %s7540_s4  ;;  %6456 = vmatpush3.xpose.msk.msra.mxu1 %vm176_vm0, %v3341_v5 }
 0xa04   :  { %6457 = vmatprep.subr.msk.mxu1 %vm176_vm0, %v3356_v37 }
 0xa06   :  { %3939 = vrot.lane.b32.xlu1 %v3378_v60, %s7540_s4 }
 0xa07   :  { %3971 = vrot.lane.b32.xlu0 %v3394_v25, %s7540_s4  ;;  %6458 = vmatpush3.xpose.msk.msra.mxu1 %vm176_vm0, %v3340_v23 }
 0xa08   :  { %6459 = vmatprep.subr.msk.mxu1 %vm176_vm0, %v3355_v35 }
 0xa0b   :  { %6460 = vmatpush3.xpose.msk.msra.mxu1 %vm176_vm0, %v3339_v9 }
 0xa0c   :  { %6461 = vmatprep.subr.msk.mxu1 %vm176_vm0, %v3354_v4 }
 0xa0f   :  { %6462 = vmatpush3.xpose.msk.msra.mxu1 %vm176_vm0, %v3338_v11 }
 0xa10   :  { %6463 = vmatprep.subr.msk.mxu1 %vm176_vm0, %v3353_v12 }
 0xa13   :  { %6464 = vmatpush3.xpose.msk.msra.mxu1 %vm176_vm0, %v3337_v13 }
 0xa14   :  { %6465 = vmatprep.subr.msk.mxu1 %vm176_vm0, %v3352_v16 }
 0xa17   :  { %6466 = vmatpush3.xpose.msk.msra.mxu1 %vm176_vm0, %v3336_v48 }
 0xa18   :  { %6467 = vmatprep.subr.msk.mxu1 %vm176_vm0, %v3351_v18 }
 0xa1b   :  { %6468 = vmatpush3.xpose.msk.msra.mxu1 %vm176_vm0, %v3335_v0 }
 0xa1c   :  { %6469 = vmatprep.subr.msk.mxu1 %vm176_vm0, %v3350_v17  ;;  %v3297_v17 = vld [vmem:[#allocation13] sm:$0xff] }
 0xa1f   :  { %6470 = vmatpush3.xpose.msk.msra.mxu1 %vm176_vm0, %v3334_v39 }
 0xa22   :  { %6472 = vmatmul.mubr.msk.f32.vlgmr.msra.gmra.mxu1 %vm176_vm0, %v8553_v53  ;;  %v6818_v53 = vpop.f32.mrf.mxu1 }
 0xa23   :  { %6473 = vmatprep.mubr.msk.f32.mxu1 %vm176_vm0, %v8551_v45 }
 0xa24   :  { %v3110_v52 = vpop.f32.mrf.mxu1 }
 0xa26   :  { %6474 = vmatmul.mubr.msk.f32.gmra.mxu1 %vm176_vm0, %v8551_v45  ;;  %v6821_v45 = vpop.f32.mrf.mxu1 }
 0xa27   :  { %6475 = vmatprep.mubr.msk.f32.mxu1 %vm176_vm0, %v3090_v47 }
 0xa28   :  { %v3120_v56 = vpop.f32.mrf.mxu1 }
 0xa2a   :  { %6476 = vmatmul.mubr.msk.f32.gmra.mxu1 %vm176_vm0, %v3090_v47  ;;  %v6824_v43 = vpop.f32.mrf.mxu1  ;;  %v3298_v47 = vld [vmem:[#allocation13 + $0x8] sm:$0xff] }
 0xa2b   :  { %6477 = vmatprep.mubr.msk.f32.mxu1 %vm176_vm0, %v6812_v34 }
 0xa2c   :  { %v3130_v38 = vpop.f32.mrf.mxu1 }
 0xa2e   :  { %6478 = vmatmul.mubr.msk.f32.gmra.mxu1 %vm176_vm0, %v6812_v34  ;;  %v6827_v32 = vpop.f32.mrf.mxu1 }
 0xa2f   :  { %6479 = vmatprep.mubr.msk.f32.mxu1 %vm176_vm0, %v3100_v29 }
 0xa30   :  { %v3140_v21 = vpop.f32.mrf.mxu1 }
 0xa32   :  { %6480 = vmatmul.mubr.msk.f32.gmra.mxu1 %vm176_vm0, %v3100_v29  ;;  %v6830_v62 = vpop.f32.mrf.mxu1 }
 0xa33   :  { %6481 = vmatprep.mubr.msk.f32.mxu1 %vm176_vm0, %v6815_v10 }
 0xa34   :  { %v3150_v44 = vpop.f32.mrf.mxu1 }
 0xa36   :  { %6482 = vmatmul.mubr.msk.f32.gmra.mxu1 %vm176_vm0, %v6815_v10 }
 0xa37   :  { %6483 = vmatprep.mubr.msk.f32.mxu1 %vm176_vm0, %v3110_v52 }
 0xa3a   :  { %6484 = vmatmul.mubr.msk.f32.gmra.mxu1 %vm176_vm0, %v3110_v52  ;;  %v3299_v52 = vld [vmem:[#allocation13 + $0x10] sm:$0xff] }
 0xa3b   :  { %6485 = vmatprep.mubr.msk.f32.mxu1 %vm176_vm0, %v6818_v53  ;;  %v3958_v59 = vpop.permute.xlu1 %3957  ;;  %v3990_v30 = vpop.permute.xlu0 %3989 }
 0xa3e   :  { %6486 = vmatmul.mubr.msk.f32.gmra.mxu1 %vm176_vm0, %v6818_v53 }
 0xa3f   :  { %6487 = vmatprep.mubr.msk.f32.mxu1 %vm176_vm0, %v3120_v56  ;;  %v3956_v41 = vpop.permute.xlu1 %3955  ;;  %v3988_v61 = vpop.permute.xlu0 %3987 }
 0xa42   :  { %6488 = vmatmul.mubr.msk.f32.gmra.mxu1 %vm176_vm0, %v3120_v56 }
 0xa43   :  { %6489 = vmatprep.mubr.msk.f32.mxu1 %vm176_vm0, %v6821_v45  ;;  %v3962_v57 = vpop.permute.xlu1 %3961  ;;  %v3994_v46 = vpop.permute.xlu0 %3993 }
 0xa46   :  { %6490 = vmatmul.mubr.msk.f32.gmra.mxu1 %vm176_vm0, %v6821_v45 }
 0xa47   :  { %6491 = vmatprep.mubr.msk.f32.mxu1 %vm176_vm0, %v3130_v38  ;;  %v3960_v3 = vpop.permute.xlu1 %3959  ;;  %v3992_v7 = vpop.permute.xlu0 %3991 }
 0xa4a   :  { %6492 = vmatmul.mubr.msk.f32.gmra.mxu1 %vm176_vm0, %v3130_v38 }
 0xa4b   :  { %6493 = vmatprep.mubr.msk.f32.mxu1 %vm176_vm0, %v6824_v43 }
 0xa4c   :  { %v3966_v36 = vpop.permute.xlu1 %3965  ;;  %v3998_v63 = vpop.permute.xlu0 %3997 }
 0xa4e   :  { %6494 = vmatmul.mubr.msk.f32.gmra.mxu1 %vm176_vm0, %v6824_v43 }
 0xa4f   :  { %6495 = vmatprep.mubr.msk.f32.mxu1 %vm176_vm0, %v3140_v21 }
 0xa50   :  { %v3964_v40 = vpop.permute.xlu1 %3963  ;;  %v3996_v19 = vpop.permute.xlu0 %3995 }
 0xa52   :  { %6496 = vmatmul.mubr.msk.f32.gmra.mxu1 %vm176_vm0, %v3140_v21 }
 0xa53   :  { %6497 = vmatprep.mubr.msk.f32.mxu1 %vm176_vm0, %v6827_v32 }
 0xa54   :  { %v3970_v24 = vpop.permute.xlu1 %3969 }
 0xa55   :  { %v4002_v2 = vpop.permute.xlu0 %4001 }
 0xa56   :  { %6503 = vmatprep.subr.mxu0 %v4002_v2  ;;  %6498 = vmatmul.mubr.msk.f32.gmra.mxu1 %vm176_vm0, %v6827_v32 }
 0xa57   :  { %6504 = vmatpush3.msra.mxu0 %v3970_v24  ;;  %6499 = vmatprep.mubr.msk.f32.mxu1 %vm176_vm0, %v3150_v44 }
 0xa58   :  { %v3954_v22 = vpop.permute.xlu1 %3953 }
 0xa59   :  { %v3986_v51 = vpop.permute.xlu0 %3985 }
 0xa5a   :  { %6500 = vmatmul.mubr.msk.f32.gmra.mxu1 %vm176_vm0, %v3150_v44 }
 0xa5b   :  { %6501 = vmatprep.mubr.msk.f32.mxu1 %vm176_vm0, %v6830_v62 }
 0xa5c   :  { %v3968_v6 = vpop.permute.xlu1 %3967 }
 0xa5d   :  { %v4000_v5 = vpop.permute.xlu0 %3999 }
 0xa5e   :  { %6505 = vmatprep.subr.mxu0 %v4000_v5  ;;  %6502 = vmatmul.mubr.msk.f32.gmra.mxu1 %vm176_vm0, %v6830_v62  ;;  %v3302_v62 = vld [vmem:[#allocation13 + $0x28] sm:$0xff] }
 0xa5f   :  { %6506 = vmatpush3.msra.mxu0 %v3968_v6 }
 0xa60   :  { %6507 = vmatprep.subr.mxu0 %v3998_v63  ;;  %v3950_v37 = vpop.permute.xlu1 %3949 }
 0xa61   :  { %6508 = vmatpush3.msra.mxu0 %v3966_v36  ;;  %v3982_v60 = vpop.permute.xlu0 %3981  ;;  %v3301_v36 = vld [vmem:[#allocation13 + $0x20] sm:$0xff] }
 0xa62   :  { %6509 = vmatprep.subr.mxu0 %v3996_v19 }
 0xa63   :  { %6510 = vmatpush3.msra.mxu0 %v3964_v40 }
 0xa64   :  { %6511 = vmatprep.subr.mxu0 %v3994_v46  ;;  %v3948_v25 = vpop.permute.xlu1 %3947 }
 0xa65   :  { %6512 = vmatpush3.msra.mxu0 %v3962_v57  ;;  %v3980_v23 = vpop.permute.xlu0 %3979 }
 0xa66   :  { %6513 = vmatprep.subr.mxu0 %v3992_v7 }
 0xa67   :  { %6514 = vmatpush3.msra.mxu0 %v3960_v3 }
 0xa68   :  { %6515 = vmatprep.subr.mxu0 %v3990_v30  ;;  %v3946_v35 = vpop.permute.xlu1 %3945 }
 0xa69   :  { %6516 = vmatpush3.msra.mxu0 %v3958_v59  ;;  %v3978_v9 = vpop.permute.xlu0 %3977 }
 0xa6a   :  { %6517 = vmatprep.subr.mxu0 %v3988_v61 }
 0xa6b   :  { %6518 = vmatpush3.msra.mxu0 %v3956_v41  ;;  %v3300_v41 = vld [vmem:[#allocation13 + $0x18] sm:$0xff] }
 0xa6c   :  { %6519 = vmatprep.subr.mxu0 %v3986_v51  ;;  %v3952_v4 = vpop.permute.xlu1 %3951 }
 0xa6d   :  { %6520 = vmatpush3.msra.mxu0 %v3954_v22  ;;  %v3984_v11 = vpop.permute.xlu0 %3983  ;;  %v3303_v22 = vld [vmem:[#allocation13 + $0x30] sm:$0xff] }
 0xa6e   :  { %6521 = vmatprep.subr.mxu0 %v3984_v11 }
 0xa6f   :  { %6522 = vmatpush3.msra.mxu0 %v3952_v4 }
 0xa70   :  { %6523 = vmatprep.subr.mxu0 %v3982_v60  ;;  %v3944_v12 = vpop.permute.xlu1 %3943 }
 0xa71   :  { %6524 = vmatpush3.msra.mxu0 %v3950_v37  ;;  %v3976_v13 = vpop.permute.xlu0 %3975 }
 0xa72   :  { %6525 = vmatprep.subr.mxu0 %v3980_v23 }
 0xa73   :  { %6526 = vmatpush3.msra.mxu0 %v3948_v25  ;;  %v3304_v25 = vld [vmem:[#allocation13 + $0x38] sm:$0xff] }
 0xa74   :  { %6527 = vmatprep.subr.mxu0 %v3978_v9  ;;  %v3942_v16 = vpop.permute.xlu1 %3941 }
 0xa75   :  { %6528 = vmatpush3.msra.mxu0 %v3946_v35  ;;  %v3974_v48 = vpop.permute.xlu0 %3973 }
 0xa76   :  { %6529 = vmatprep.subr.mxu0 %v3976_v13 }
 0xa77   :  { %6530 = vmatpush3.msra.mxu0 %v3944_v12  ;;  %v3305_v12 = vld [vmem:[#allocation13 + $0x40] sm:$0xff] }
 0xa78   :  { %6531 = vmatprep.subr.mxu0 %v3974_v48  ;;  %v3940_v18 = vpop.permute.xlu1 %3939 }
 0xa79   :  { %6532 = vmatpush3.msra.mxu0 %v3942_v16  ;;  %v3972_v0 = vpop.permute.xlu0 %3971 }
 0xa7a   :  { %6533 = vmatprep.subr.mxu0 %v3972_v0 }
 0xa7b   :  { %6534 = vmatpush3.msra.mxu0 %v3940_v18 }
 0xae2   :  { %v3620_v39 = vpop.f32.mrf.mxu1 }
 0xae3   :  { %v5931_v34 = vclamps-f32 %v3620_v39, 5.0 }
 0xae4   :  { %v3622_v10 = vpop.f32.mrf.mxu1 }
 0xae5   :  { %v3779_v29 = vadd.f32 %v5931_v34, %v3297_v17  ;;  %v5932_v53 = vclamps-f32 %v3622_v10, 5.0 }
 0xae6   :  { %v3626_v45 = vpop.f32.mrf.mxu1 }
 0xae7   :  { %v3811_v59 = vmin.f32 %v3779_v29, 5.0  ;;  %v3780_v30 = vadd.f32 %v5932_v53, %v3298_v47  ;;  %v5933_v56 = vclamps-f32 %v3626_v45, 5.0  ;;  %v3306_v47 = vld [vmem:[#allocation13 + $0x48] sm:$0xff]  ;;  %v3307_v53 = vld [vmem:[#allocation13 + $0x50] sm:$0xff] }
 0xae8   :  { %v3628_v61 = vpop.f32.mrf.mxu1 }
 0xae9   :  { %v3812_v43 = vmin.f32 %v3780_v30, 5.0  ;;  %v3781_v57 = vadd.f32 %v5933_v56, %v3299_v52  ;;  %v5934_v46 = vclamps-f32 %v3628_v61, 5.0  ;;  %v3843_v38 = vmul.f32 1.442695, %v3811_v59 }
 0xaea   :  { %v3632_v32 = vpop.f32.mrf.mxu1 }
 0xaeb   :  { %v3845_v3 = vmul.f32 1.442695, %v3812_v43  ;;  %v3813_v7 = vmin.f32 %v3781_v57, 5.0  ;;  %v3782_v21 = vadd.f32 %v5934_v46, %v3300_v41  ;;  %v5935_v63 = vclamps-f32 %v3632_v32, 5.0  ;;  %v3308_v41 = vld [vmem:[#allocation13 + $0x58] sm:$0xff] }
 0xaec   :  { %v3634_v40 = vpop.f32.mrf.mxu1 }
 0xaed   :  { %7180 = vpow2.f32 %v3845_v3  ;;  %v3814_v19 = vmin.f32 %v3782_v21, 5.0  ;;  %v5936_v24 = vclamps-f32 %v3634_v40, 5.0  ;;  %v3847_v44 = vmul.f32 1.442695, %v3813_v7  ;;  %v3309_v3 = vld [vmem:[#allocation13 + $0x60] sm:$0xff] }
 0xaee   :  { %7182 = vpow2.f32 %v3843_v38  ;;  %v3783_v2 = vadd.f32 %v5935_v63, %v3301_v36  ;;  %v3638_v51 = vpop.f32.mrf.mxu1 }
 0xaef   :  { %v3849_v6 = vmul.f32 1.442695, %v3814_v19  ;;  %v3784_v5 = vadd.f32 %v5936_v24, %v3302_v62  ;;  %v5937_v37 = vclamps-f32 %v3638_v51, 5.0  ;;  %v3310_v19 = vld [vmem:[#allocation13 + $0x68] sm:$0xff] }
 0xaf0   :  { %v3815_v60 = vmin.f32 %v3783_v2, 5.0  ;;  %v3640_v23 = vpop.f32.mrf.mxu1 }
 0xaf1   :  { %7184 = vpow2.f32 %v3849_v6  ;;  %v3816_v35 = vmin.f32 %v3784_v5, 5.0  ;;  %v3785_v9 = vadd.f32 %v5937_v37, %v3303_v22  ;;  %v5938_v4 = vclamps-f32 %v3640_v23, 5.0 }
 0xaf2   :  { %7186 = vpow2.f32 %v3847_v44  ;;  %v3851_v11 = vmul.f32 1.442695, %v3815_v60  ;;  %v3644_v13 = vpop.f32.mrf.mxu1 }
 0xaf3   :  { %v3853_v16 = vmul.f32 1.442695, %v3816_v35  ;;  %v3817_v48 = vmin.f32 %v3785_v9, 5.0  ;;  %v3786_v18 = vadd.f32 %v5938_v4, %v3304_v25  ;;  %v5939_v0 = vclamps-f32 %v3644_v13, 5.0  ;;  %v3311_v35 = vld [vmem:[#allocation13 + $0x70] sm:$0xff]  ;;  %v3312_v4 = vld [vmem:[#allocation13 + $0x78] sm:$0xff] }
 0xaf4   :  { %v3646_v17 = vpop.f32.mrf.mxu1 }
 0xaf5   :  { %7188 = vpow2.f32 %v3853_v16  ;;  %v3818_v39 = vmin.f32 %v3786_v18, 5.0  ;;  %v3787_v34 = vadd.f32 %v5939_v0, %v3305_v12  ;;  %v3855_v10 = vmul.f32 1.442695, %v3817_v48  ;;  %v3313_v0 = vld [vmem:[#allocation13 + $0x80] sm:$0xff] }
 0xaf6   :  { %7190 = vpow2.f32 %v3851_v11  ;;  %v5940_v29 = vclamps-f32 %v3646_v17, 5.0  ;;  %v3650_v52 = vpop.f32.mrf.mxu1 }
 0xaf7   :  { %v3857_v45 = vmul.f32 1.442695, %v3818_v39  ;;  %v3819_v59 = vmin.f32 %v3787_v34, 5.0  ;;  %v5941_v30 = vclamps-f32 %v3650_v52, 5.0 }
 0xaf8   :  { %v3788_v56 = vadd.f32 %v5940_v29, %v3306_v47  ;;  %v3652_v61 = vpop.f32.mrf.mxu1 }
 0xaf9   :  { %7192 = vpow2.f32 %v3857_v45  ;;  %v3859_v43 = vmul.f32 1.442695, %v3819_v59  ;;  %v3789_v57 = vadd.f32 %v5941_v30, %v3307_v53  ;;  %v5942_v46 = vclamps-f32 %v3652_v61, 5.0  ;;  %v3314_v53 = vld [vmem:[#allocation13 + $0x88] sm:$0xff]  ;;  %v3315_v61 = vld [vmem:[#allocation13 + $0x90] sm:$0xff] }
 0xafa   :  { %v7181_v38 = vpop.eup %7180  ;;  %7194 = vpow2.f32 %v3855_v10  ;;  %v3820_v32 = vmin.f32 %v3788_v56, 5.0  ;;  %v3656_v7 = vpop.f32.mrf.mxu1 }
 0xafb   :  { %v7183_v21 = vpop.eup %7182  ;;  %v3821_v36 = vmin.f32 %v3789_v57, 5.0  ;;  %v3790_v63 = vadd.f32 %v5942_v46, %v3308_v41  ;;  %v5943_v62 = vclamps-f32 %v3656_v7, 5.0  ;;  %4099 = vmatprep.mubr.f32.mxu0 %v7181_v38  ;;  %7196 = vpow2.f32 %v3859_v43 }
 0xafc   :  { %v3861_v40 = vmul.f32 1.442695, %v3820_v32  ;;  %v3658_v24 = vpop.f32.mrf.mxu1  ;;  %4100 = vmatmul.mubr.f32.vlgmr.msra.gmra.mxu0 %v7183_v21 }
 0xafd   :  { %v3822_v44 = vmin.f32 %v3790_v63, 5.0  ;;  %v3791_v2 = vadd.f32 %v5943_v62, %v3309_v3  ;;  %v5944_v22 = vclamps-f32 %v3658_v24, 5.0  ;;  %v3863_v37 = vmul.f32 1.442695, %v3821_v36  ;;  %v3316_v63 = vld [vmem:[#allocation13 + $0x98] sm:$0xff] }
 0xafe   :  { %v7185_v51 = vpop.eup %7184  ;;  %7198 = vpow2.f32 %v3861_v40  ;;  %v3662_v6 = vpop.f32.mrf.mxu1 }
 0xaff   :  { %v7187_v5 = vpop.eup %7186  ;;  %v3865_v60 = vmul.f32 1.442695, %v3822_v44  ;;  %v3823_v25 = vmin.f32 %v3791_v2, 5.0  ;;  %v3792_v23 = vadd.f32 %v5944_v22, %v3310_v19  ;;  %4104 = vmatprep.mubr.f32.mxu0 %v7185_v51  ;;  %v5945_v9 = vclamps-f32 %v3662_v6, 5.0  ;;  %v3317_v19 = vld [vmem:[#allocation13 + $0xa0] sm:$0xff] }
 0xb00   :  { %v3664_v11 = vpop.f32.mrf.mxu1  ;;  %4105 = vmatmul.mubr.f32.gmra.mxu0 %v7187_v5 }
 0xb01   :  { %7200 = vpow2.f32 %v3865_v60  ;;  %v3824_v12 = vmin.f32 %v3792_v23, 5.0  ;;  %v5946_v13 = vclamps-f32 %v3664_v11, 5.0  ;;  %v3867_v48 = vmul.f32 1.442695, %v3823_v25  ;;  %v3319_v11 = vld [vmem:[#allocation13 + $0xb0] sm:$0xff] }
 0xb02   :  { %v7189_v16 = vpop.eup %7188  ;;  %v3793_v18 = vadd.f32 %v5945_v9, %v3311_v35  ;;  %v3668_v17 = vpop.f32.mrf.mxu1  ;;  %7202 = vpow2.f32 %v3863_v37  ;;  %v3318_v37 = vld [vmem:[#allocation13 + $0xa8] sm:$0xff] }
 0xb03   :  { %v7191_v39 = vpop.eup %7190  ;;  %v3869_v34 = vmul.f32 1.442695, %v3824_v12  ;;  %v3794_v47 = vadd.f32 %v5946_v13, %v3312_v4  ;;  %v5947_v10 = vclamps-f32 %v3668_v17, 5.0  ;;  %4109 = vmatprep.mubr.f32.mxu0 %v7189_v16  ;;  %v3320_v17 = vld [vmem:[#allocation13 + $0xb8] sm:$0xff] }
 0xb04   :  { %v3825_v29 = vmin.f32 %v3793_v18, 5.0  ;;  %v3670_v52 = vpop.f32.mrf.mxu1  ;;  %4110 = vmatmul.mubr.f32.gmra.mxu0 %v7191_v39 }
 0xb05   :  { %7204 = vpow2.f32 %v3869_v34  ;;  %v3826_v45 = vmin.f32 %v3794_v47, 5.0  ;;  %v3795_v59 = vadd.f32 %v5947_v10, %v3313_v0  ;;  %v5948_v30 = vclamps-f32 %v3670_v52, 5.0 }
 0xb06   :  { %v7193_v56 = vpop.eup %7192  ;;  %7206 = vpow2.f32 %v3867_v48  ;;  %v3871_v41 = vmul.f32 1.442695, %v3825_v29  ;;  %v3674_v43 = vpop.f32.mrf.mxu1 }
 0xb07   :  { %v7195_v57 = vpop.eup %7194  ;;  %v3873_v46 = vmul.f32 1.442695, %v3826_v45  ;;  %v3827_v38 = vmin.f32 %v3795_v59, 5.0  ;;  %v3796_v32 = vadd.f32 %v5948_v30, %v3314_v53  ;;  %v5949_v3 = vclamps-f32 %v3674_v43, 5.0  ;;  %4114 = vmatprep.mubr.f32.mxu0 %v7193_v56  ;;  %v3322_v43 = vld [vmem:[#allocation13 + $0xc8] sm:$0xff] }
 0xb08   :  { %v3676_v7 = vpop.f32.mrf.mxu1  ;;  %4115 = vmatmul.mubr.f32.gmra.mxu0 %v7195_v57  ;;  %v7197_v62 = vpop.eup %7196 }
 0xb09   :  { %7208 = vpow2.f32 %v3873_v46  ;;  %v3828_v21 = vmin.f32 %v3796_v32, 5.0  ;;  %v3797_v36 = vadd.f32 %v5949_v3, %v3315_v61  ;;  %v5950_v40 = vclamps-f32 %v3676_v7, 5.0 }
 0xb0a   :  { %7210 = vpow2.f32 %v3871_v41  ;;  %v3680_v24 = vpop.f32.mrf.mxu1  ;;  %v3875_v2 = vmul.f32 1.442695, %v3827_v38  ;;  %v3321_v41 = vld [vmem:[#allocation13 + $0xc0] sm:$0xff] }
 0xb0b   :  { %v7199_v44 = vpop.eup %7198  ;;  %v3877_v22 = vmul.f32 1.442695, %v3828_v21  ;;  %v3829_v51 = vmin.f32 %v3797_v36, 5.0  ;;  %v5951_v6 = vclamps-f32 %v3680_v24, 5.0  ;;  %v3798_v5 = vadd.f32 %v5950_v40, %v3316_v63  ;;  %v3323_v21 = vld [vmem:[#allocation13 + $0xd0] sm:$0xff] }
 0xb0c   :  { %4119 = vmatprep.mubr.f32.mxu0 %v7199_v44  ;;  %v3682_v60 = vpop.f32.mrf.mxu1  ;;  %v3324_v44 = vld [vmem:[#allocation13 + $0xd8] sm:$0xff] }
 0xb0d   :  { %7212 = vpow2.f32 %v3877_v22  ;;  %v3879_v25 = vmul.f32 1.442695, %v3829_v51  ;;  %v3799_v23 = vadd.f32 %v5951_v6, %v3317_v19  ;;  %v5952_v35 = vclamps-f32 %v3682_v60, 5.0  ;;  %4120 = vmatmul.mubr.f32.gmra.mxu0 %v7197_v62  ;;  %v3325_v60 = vld [vmem:[#allocation13 + $0xe0] sm:$0xff] }
 0xb0e   :  { %v7201_v9 = vpop.eup %7200  ;;  %v3830_v4 = vmin.f32 %v3798_v5, 5.0  ;;  %v3686_v12 = vpop.f32.mrf.mxu1  ;;  %7214 = vpow2.f32 %v3875_v2 }
 0xb0f   :  { %v3831_v13 = vmin.f32 %v3799_v23, 5.0  ;;  %v3800_v16 = vadd.f32 %v5952_v35, %v3318_v37  ;;  %v5953_v48 = vclamps-f32 %v3686_v12, 5.0  ;;  %4124 = vmatprep.mubr.f32.mxu0 %v7201_v9  ;;  %v7203_v18 = vpop.eup %7202  ;;  %7216 = vpow2.f32 %v3879_v25 }
 0xb10   :  { %v3881_v0 = vmul.f32 1.442695, %v3830_v4  ;;  %v3688_v39 = vpop.f32.mrf.mxu1 }
 0xb11   :  { %v3832_v34 = vmin.f32 %v3800_v16, 5.0  ;;  %v3801_v47 = vadd.f32 %v5953_v48, %v3319_v11  ;;  %v5954_v10 = vclamps-f32 %v3688_v39, 5.0  ;;  %4125 = vmatmul.mubr.f32.gmra.mxu0 %v7203_v18  ;;  %v3883_v45 = vmul.f32 1.442695, %v3831_v13  ;;  %v3326_v48 = vld [vmem:[#allocation13 + $0xe8] sm:$0xff] }
 0xb12   :  { %v7205_v29 = vpop.eup %7204  ;;  %7218 = vpow2.f32 %v3881_v0  ;;  %v3692_v53 = vpop.f32.mrf.mxu1 }
 0xb13   :  { %v7207_v52 = vpop.eup %7206  ;;  %v3885_v59 = vmul.f32 1.442695, %v3832_v34  ;;  %v3833_v30 = vmin.f32 %v3801_v47, 5.0  ;;  %v3802_v56 = vadd.f32 %v5954_v10, %v3320_v17  ;;  %4129 = vmatprep.mubr.f32.mxu0 %v7205_v29  ;;  %v5955_v61 = vclamps-f32 %v3692_v53, 5.0  ;;  %v3327_v17 = vld [vmem:[#allocation13 + $0xf0] sm:$0xff] }
 0xb14   :  { %v3694_v57 = vpop.f32.mrf.mxu1 }
 0xb15   :  { %7220 = vpow2.f32 %v3885_v59  ;;  %v3834_v46 = vmin.f32 %v3802_v56, 5.0  ;;  %v5956_v38 = vclamps-f32 %v3694_v57, 5.0  ;;  %4130 = vmatmul.mubr.f32.gmra.mxu0 %v7207_v52  ;;  %v3887_v3 = vmul.f32 1.442695, %v3833_v30 }
 0xb16   :  { %v7209_v32 = vpop.eup %7208  ;;  %v3803_v7 = vadd.f32 %v5955_v61, %v3321_v41  ;;  %v3698_v36 = vpop.f32.mrf.mxu1  ;;  %7222 = vpow2.f32 %v3883_v45  ;;  %v3328_v45 = vld [vmem:[#allocation13 + $0xf8] sm:$0xff] }
 0xb17   :  { %v7211_v63 = vpop.eup %7210  ;;  %v3889_v62 = vmul.f32 1.442695, %v3834_v46  ;;  %v3804_v40 = vadd.f32 %v5956_v38, %v3322_v43  ;;  %v5957_v19 = vclamps-f32 %v3698_v36, 5.0  ;;  %4134 = vmatprep.mubr.f32.mxu0 %v7209_v32 }
 0xb18   :  { %v3835_v24 = vmin.f32 %v3803_v7, 5.0  ;;  %v3700_v2 = vpop.f32.mrf.mxu1 }
 0xb19   :  { %7224 = vpow2.f32 %v3889_v62  ;;  %v3836_v22 = vmin.f32 %v3804_v40, 5.0  ;;  %v3805_v51 = vadd.f32 %v5957_v19, %v3323_v21  ;;  %v5958_v6 = vclamps-f32 %v3700_v2, 5.0  ;;  %4135 = vmatmul.mubr.f32.gmra.mxu0 %v7211_v63 }
 0xb1a   :  { %v7213_v5 = vpop.eup %7212  ;;  %7226 = vpow2.f32 %v3887_v3  ;;  %v3891_v37 = vmul.f32 1.442695, %v3835_v24  ;;  %v3704_v25 = vpop.f32.mrf.mxu1 }
 0xb1b   :  { %v3893_v23 = vmul.f32 1.442695, %v3836_v22  ;;  %v3837_v35 = vmin.f32 %v3805_v51, 5.0  ;;  %v3806_v9 = vadd.f32 %v5958_v6, %v3324_v44  ;;  %v5959_v4 = vclamps-f32 %v3704_v25, 5.0  ;;  %4139 = vmatprep.mubr.f32.mxu0 %v7213_v5  ;;  %v7215_v11 = vpop.eup %7214  ;;  %v3332_v6 = vld [vmem:[#allocation8 + $0x1d8] sm:$0xff]  ;;  %v3331_v5 = vld [vmem:[#allocation8 + $0x1d0] sm:$0xff] }
 0xb1c   :  { %v3706_v12 = vpop.f32.mrf.mxu1  ;;  %v7217_v18 = vpop.eup %7216  ;;  %6851 = vmatprep.subr.mxu0 %v3332_v6 }
 0xb1d   :  { %7228 = vpow2.f32 %v3893_v23  ;;  %v3838_v13 = vmin.f32 %v3806_v9, 5.0  ;;  %v3807_v16 = vadd.f32 %v5959_v4, %v3325_v60  ;;  %4140 = vmatmul.mubr.f32.gmra.mxu0 %v7215_v11  ;;  %v5960_v0 = vclamps-f32 %v3706_v12, 5.0 }
 0xb1e   :  { %7230 = vpow2.f32 %v3891_v37  ;;  %v3710_v39 = vpop.f32.mrf.mxu1  ;;  %v3895_v47 = vmul.f32 1.442695, %v3837_v35  ;;  %6852 = vmatpush3.msra.mxu0 %v3332_v6  ;;  %v3330_v37 = vld [vmem:[#allocation8 + $0x1c8] sm:$0xff] }
 0xb1f   :  { %v7219_v34 = vpop.eup %7218  ;;  %v3897_v10 = vmul.f32 1.442695, %v3838_v13  ;;  %v3839_v29 = vmin.f32 %v3807_v16, 5.0  ;;  %v5961_v53 = vclamps-f32 %v3710_v39, 5.0  ;;  %v3808_v52 = vadd.f32 %v5960_v0, %v3326_v48  ;;  %6853 = vmatprep.subr.mxu0 %v3331_v5  ;;  %v3329_v13 = vld [vmem:[#allocation8 + $0x1c0] sm:$0xff] }
 0xb20   :  { %4144 = vmatprep.mubr.f32.mxu0 %v7219_v34  ;;  %v3712_v59 = vpop.f32.mrf.mxu1  ;;  %6854 = vmatpush3.msra.mxu0 %v3331_v5 }
 0xb21   :  { %7232 = vpow2.f32 %v3897_v10  ;;  %v3809_v30 = vadd.f32 %v5961_v53, %v3327_v17  ;;  %v5962_v56 = vclamps-f32 %v3712_v59, 5.0  ;;  %4145 = vmatmul.mubr.f32.gmra.mxu0 %v7217_v18  ;;  %v3840_v61 = vmin.f32 %v3808_v52, 5.0  ;;  %6855 = vmatprep.subr.mxu0 %v3330_v37 }
 0xb22   :  { %v7221_v41 = vpop.eup %7220  ;;  %7234 = vpow2.f32 %v3895_v47  ;;  %v3899_v43 = vmul.f32 1.442695, %v3839_v29  ;;  %6856 = vmatpush3.msra.mxu0 %v3330_v37 }
 0xb23   :  { %v3841_v57 = vmin.f32 %v3809_v30, 5.0  ;;  %v3810_v46 = vadd.f32 %v5962_v56, %v3328_v45  ;;  %4149 = vmatprep.mubr.f32.mxu0 %v7221_v41  ;;  %v7223_v38 = vpop.eup %7222  ;;  %v3901_v32 = vmul.f32 1.442695, %v3840_v61  ;;  %6857 = vmatprep.subr.mxu0 %v3329_v13 }
 0xb24   :  { %6858 = vmatpush3.msra.mxu0 %v3329_v13 }
 0xb25   :  { %v3842_v3 = vmin.f32 %v3810_v46, 5.0  ;;  %4150 = vmatmul.mubr.f32.gmra.mxu0 %v7223_v38  ;;  %7236 = vpow2.f32 %v3901_v32  ;;  %v3903_v36 = vmul.f32 1.442695, %v3841_v57 }
 0xb26   :  { %v7225_v7 = vpop.eup %7224  ;;  %7238 = vpow2.f32 %v3899_v43 }
 0xb27   :  { %v7227_v21 = vpop.eup %7226  ;;  %v3905_v63 = vmul.f32 1.442695, %v3842_v3  ;;  %4154 = vmatprep.mubr.f32.mxu0 %v7225_v7 }
 0xb29   :  { %7240 = vpow2.f32 %v3905_v63  ;;  %4155 = vmatmul.mubr.f32.gmra.mxu0 %v7227_v21 }
 0xb2a   :  { %v7229_v62 = vpop.eup %7228  ;;  %7242 = vpow2.f32 %v3903_v36 }
 0xb2b   :  { %v7231_v40 = vpop.eup %7230  ;;  %4159 = vmatprep.mubr.f32.mxu0 %v7229_v62 }
 0xb2d   :  { %4160 = vmatmul.mubr.f32.gmra.mxu0 %v7231_v40 }
 0xb2e   :  { %v7233_v19 = vpop.eup %7232 }
 0xb2f   :  { %4164 = vmatprep.mubr.f32.mxu0 %v7233_v19  ;;  %v7235_v24 = vpop.eup %7234 }
 0xb31   :  { %4165 = vmatmul.mubr.f32.gmra.mxu0 %v7235_v24 }
 0xb32   :  { %v7237_v44 = vpop.eup %7236 }
 0xb33   :  { %v7239_v2 = vpop.eup %7238  ;;  %4169 = vmatprep.mubr.f32.mxu0 %v7237_v44 }
 0xb35   :  { %4170 = vmatmul.mubr.f32.gmra.mxu0 %v7239_v2 }
 0xb36   :  { %v7241_v22 = vpop.eup %7240 }
 0xb37   :  { %4174 = vmatprep.mubr.f32.mxu0 %v7241_v22  ;;  %v7243_v51 = vpop.eup %7242 }
 0xb39   :  { %4175 = vmatmul.mubr.f32.gmra.mxu0 %v7243_v51 }
 0xbbc   :  { %v6535_v60 = vpop.f32.mrf.mxu0 }
 0xbbe   :  { %v6536_v25 = vpop.f32.mrf.mxu0 }
 0xbbf   :  { %v8787_v23 = vadd.f32 %v6536_v25, %v6535_v60 }
 0xbc0   :  { %v6538_v35 = vpop.f32.mrf.mxu0 }
 0xbc1   :  { %7244 = vrcp.f32 %v8787_v23 }
 0xbc2   :  { %v6539_v9 = vpop.f32.mrf.mxu0 }
 0xbc3   :  { %v8790_v4 = vadd.f32 %v6539_v9, %v6538_v35 }
 0xbc4   :  { %v6541_v11 = vpop.f32.mrf.mxu0 }
 0xbc5   :  { %7246 = vrcp.f32 %v8790_v4 }
 0xbc6   :  { %v6542_v12 = vpop.f32.mrf.mxu0 }
 0xbc7   :  { %v8793_v16 = vadd.f32 %v6542_v12, %v6541_v11 }
 0xbc8   :  { %v6544_v48 = vpop.f32.mrf.mxu0 }
 0xbc9   :  { %7248 = vrcp.f32 %v8793_v16 }
 0xbca   :  { %v6545_v18 = vpop.f32.mrf.mxu0 }
 0xbcb   :  { %v8796_v0 = vadd.f32 %v6545_v18, %v6544_v48 }
 0xbcd   :  { %7250 = vrcp.f32 %v8796_v0  ;;  %v6547_v17 = vpop.f32.mrf.mxu0 }
 0xbce   :  { %v7245_v39 = vpop.eup %7244 }
 0xbcf   :  { %v6548_v34 = vpop.f32.mrf.mxu0  ;;  %4212 = vrot.lane.b32.xlu0 %v7245_v39, %s7540_s4 }
 0xbd0   :  { %v8800_v47 = vadd.f32 %v6548_v34, %v6547_v17 }
 0xbd1   :  { %v6550_v10 = vpop.f32.mrf.mxu0 }
 0xbd2   :  { %v7247_v29 = vpop.eup %7246  ;;  %7252 = vrcp.f32 %v8800_v47 }
 0xbd3   :  { %v6551_v53 = vpop.f32.mrf.mxu0  ;;  %4214 = vrot.lane.b32.xlu1 %v7247_v29, %s7540_s4 }
 0xbd4   :  { %v8804_v52 = vadd.f32 %v6551_v53, %v6550_v10 }
 0xbd5   :  { %v6553_v45 = vpop.f32.mrf.mxu0 }
 0xbd6   :  { %v7249_v59 = vpop.eup %7248  ;;  %7254 = vrcp.f32 %v8804_v52 }
 0xbd7   :  { %v6554_v30 = vpop.f32.mrf.mxu0  ;;  %4216 = vrot.lane.b32.xlu0 %v7249_v59, %s7540_s4 }
 0xbd8   :  { %v8808_v56 = vadd.f32 %v6554_v30, %v6553_v45 }
 0xbd9   :  { %v6556_v41 = vpop.f32.mrf.mxu0 }
 0xbda   :  { %v7251_v61 = vpop.eup %7250  ;;  %7256 = vrcp.f32 %v8808_v56 }
 0xbdb   :  { %v6557_v43 = vpop.f32.mrf.mxu0  ;;  %4218 = vrot.lane.b32.xlu1 %v7251_v61, %s7540_s4 }
 0xbdc   :  { %v8812_v57 = vadd.f32 %v6557_v43, %v6556_v41 }
 0xbdd   :  { %v6559_v46 = vpop.f32.mrf.mxu0 }
 0xbde   :  { %7258 = vrcp.f32 %v8812_v57 }
 0xbdf   :  { %v7253_v38 = vpop.eup %7252  ;;  %v6560_v32 = vpop.f32.mrf.mxu0 }
 0xbe0   :  { %v8815_v3 = vadd.f32 %v6560_v32, %v6559_v46  ;;  %4220 = vrot.lane.b32.xlu0 %v7253_v38, %s7540_s4 }
 0xbe1   :  { %v6562_v7 = vpop.f32.mrf.mxu0 }
 0xbe2   :  { %7260 = vrcp.f32 %v8815_v3 }
 0xbe3   :  { %v7255_v21 = vpop.eup %7254  ;;  %v6563_v36 = vpop.f32.mrf.mxu0 }
 0xbe4   :  { %v8819_v63 = vadd.f32 %v6563_v36, %v6562_v7  ;;  %4222 = vrot.lane.b32.xlu1 %v7255_v21, %s7540_s4 }
 0xbe5   :  { %v6565_v62 = vpop.f32.mrf.mxu0 }
 0xbe6   :  { %7262 = vrcp.f32 %v8819_v63 }
 0xbe7   :  { %v7257_v40 = vpop.eup %7256  ;;  %v6566_v19 = vpop.f32.mrf.mxu0 }
 0xbe8   :  { %v8823_v24 = vadd.f32 %v6566_v19, %v6565_v62  ;;  %4224 = vrot.lane.b32.xlu0 %v7257_v40, %s7540_s4 }
 0xbe9   :  { %v6568_v44 = vpop.f32.mrf.mxu0 }
 0xbea   :  { %7264 = vrcp.f32 %v8823_v24 }
 0xbeb   :  { %v7259_v2 = vpop.eup %7258  ;;  %v6569_v22 = vpop.f32.mrf.mxu0 }
 0xbec   :  { %v8827_v51 = vadd.f32 %v6569_v22, %v6568_v44  ;;  %4226 = vrot.lane.b32.xlu1 %v7259_v2, %s7540_s4 }
 0xbed   :  { %v6571_v6 = vpop.f32.mrf.mxu0 }
 0xbee   :  { %7266 = vrcp.f32 %v8827_v51 }
 0xbef   :  { %v7261_v5 = vpop.eup %7260  ;;  %v6572_v37 = vpop.f32.mrf.mxu0 }
 0xbf0   :  { %v8831_v60 = vadd.f32 %v6572_v37, %v6571_v6  ;;  %4228 = vrot.lane.b32.xlu0 %v7261_v5, %s7540_s4 }
 0xbf1   :  { %v6574_v25 = vpop.f32.mrf.mxu0 }
 0xbf2   :  { %7268 = vrcp.f32 %v8831_v60 }
 0xbf3   :  { %v7263_v35 = vpop.eup %7262  ;;  %v6575_v9 = vpop.f32.mrf.mxu0 }
 0xbf4   :  { %v8835_v11 = vadd.f32 %v6575_v9, %v6574_v25  ;;  %4230 = vrot.lane.b32.xlu1 %v7263_v35, %s7540_s4 }
 0xbf5   :  { %v6577_v12 = vpop.f32.mrf.mxu0 }
 0xbf6   :  { %7270 = vrcp.f32 %v8835_v11 }
 0xbf7   :  { %v7265_v13 = vpop.eup %7264  ;;  %v6578_v48 = vpop.f32.mrf.mxu0 }
 0xbf8   :  { %v6579_v18 = vadd.f32 %v6578_v48, %v6577_v12  ;;  %4232 = vrot.lane.b32.xlu0 %v7265_v13, %s7540_s4 }
 0xbf9   :  { %v6580_v17 = vpop.f32.mrf.mxu0 }
 0xbfa   :  { %7272 = vrcp.f32 %v6579_v18 }
 0xbfb   :  { %v7267_v39 = vpop.eup %7266  ;;  %v6581_v34 = vpop.f32.mrf.mxu0 }
 0xbfc   :  { %v6582_v10 = vadd.f32 %v6581_v34, %v6580_v17  ;;  %4234 = vrot.lane.b32.xlu1 %v7267_v39, %s7540_s4 }
 0xbfe   :  { %7274 = vrcp.f32 %v6582_v10 }
 0xbff   :  { %v7269_v29 = vpop.eup %7268 }
 0xc00   :  { %4236 = vrot.lane.b32.xlu0 %v7269_v29, %s7540_s4 }
 0xc03   :  { %v7271_v53 = vpop.eup %7270 }
 0xc04   :  { %4238 = vrot.lane.b32.xlu1 %v7271_v53, %s7540_s4 }
 0xc07   :  { %v7273_v45 = vpop.eup %7272 }
 0xc08   :  { %4240 = vrot.lane.b32.xlu0 %v7273_v45, %s7540_s4 }
 0xc0b   :  { %v7275_v59 = vpop.eup %7274 }
 0xc0c   :  { %4242 = vrot.lane.b32.xlu1 %v7275_v59, %s7540_s4 }
 0xc41   :  { %v4213_v30 = vpop.permute.xlu0 %4212 }
 0xc42   :  { %v4260_v41 = vmul.f32 %v8787_v23, %v4213_v30 }
 0xc44   :  { %6859 = vmatprep.mubr.msk.f32.mxu0 %vm176_vm0, %v4260_v41 }
 0xc45   :  { %v4215_v61 = vpop.permute.xlu1 %4214 }
 0xc46   :  { %v4261_v43 = vmul.f32 %v8790_v4, %v4215_v61 }
 0xc48   :  { %6860 = vmatmul.mubr.msk.f32.vlgmr.msra.gmra.mxu0 %vm176_vm0, %v4261_v43 }
 0xc49   :  { %v4217_v46 = vpop.permute.xlu0 %4216 }
 0xc4a   :  { %v4262_v38 = vmul.f32 %v8793_v16, %v4217_v46 }
 0xc4c   :  { %6862 = vmatprep.mubr.msk.f32.mxu0 %vm176_vm0, %v4262_v38 }
 0xc4d   :  { %v4219_v32 = vpop.permute.xlu1 %4218 }
 0xc4e   :  { %v4263_v7 = vmul.f32 %v8796_v0, %v4219_v32 }
 0xc50   :  { %6863 = vmatmul.mubr.msk.f32.gmra.mxu0 %vm176_vm0, %v4263_v7 }
 0xc52   :  { %v4221_v21 = vpop.permute.xlu0 %4220 }
 0xc53   :  { %v4264_v23 = vmul.f32 %v8800_v47, %v4221_v21 }
 0xc55   :  { %6865 = vmatprep.mubr.msk.f32.mxu0 %vm176_vm0, %v4264_v23 }
 0xc56   :  { %v4223_v36 = vpop.permute.xlu1 %4222 }
 0xc57   :  { %v4265_v4 = vmul.f32 %v8804_v52, %v4223_v36 }
 0xc59   :  { %6866 = vmatmul.mubr.msk.f32.gmra.mxu0 %vm176_vm0, %v4265_v4 }
 0xc5a   :  { %v4225_v62 = vpop.permute.xlu0 %4224 }
 0xc5b   :  { %v4266_v16 = vmul.f32 %v8808_v56, %v4225_v62 }
 0xc5d   :  { %6868 = vmatprep.mubr.msk.f32.mxu0 %vm176_vm0, %v4266_v16 }
 0xc5e   :  { %v4227_v40 = vpop.permute.xlu1 %4226 }
 0xc5f   :  { %v4267_v0 = vmul.f32 %v8812_v57, %v4227_v40 }
 0xc61   :  { %6869 = vmatmul.mubr.msk.f32.gmra.mxu0 %vm176_vm0, %v4267_v0 }
 0xc62   :  { %v4229_v19 = vpop.permute.xlu0 %4228 }
 0xc63   :  { %v4268_v47 = vmul.f32 %v8815_v3, %v4229_v19 }
 0xc65   :  { %6871 = vmatprep.mubr.msk.f32.mxu0 %vm176_vm0, %v4268_v47 }
 0xc66   :  { %v4231_v44 = vpop.permute.xlu1 %4230 }
 0xc67   :  { %v4269_v52 = vmul.f32 %v8819_v63, %v4231_v44 }
 0xc69   :  { %6872 = vmatmul.mubr.msk.f32.gmra.mxu0 %vm176_vm0, %v4269_v52 }
 0xc6a   :  { %v4233_v2 = vpop.permute.xlu0 %4232 }
 0xc6b   :  { %v4270_v56 = vmul.f32 %v8823_v24, %v4233_v2 }
 0xc6d   :  { %6874 = vmatprep.mubr.msk.f32.mxu0 %vm176_vm0, %v4270_v56 }
 0xc6e   :  { %v4235_v22 = vpop.permute.xlu1 %4234 }
 0xc6f   :  { %v4271_v57 = vmul.f32 %v8827_v51, %v4235_v22  ;;  %v8875_v51 = vld [vmem:[#allocation8 + $0x1e0] ss:$0 sm:$0xff] }
 0xc71   :  { %6875 = vmatmul.mubr.msk.f32.gmra.mxu0 %vm176_vm0, %v4271_v57 }
 0xc72   :  { %v4237_v6 = vpop.permute.xlu0 %4236 }
 0xc73   :  { %v4272_v3 = vmul.f32 %v8831_v60, %v4237_v6 }
 0xc75   :  { %6877 = vmatprep.mubr.msk.f32.mxu0 %vm176_vm0, %v4272_v3 }
 0xc76   :  { %v4239_v5 = vpop.permute.xlu1 %4238 }
 0xc77   :  { %v4273_v63 = vmul.f32 %v8835_v11, %v4239_v5 }
 0xc79   :  { %6878 = vmatmul.mubr.msk.f32.gmra.mxu0 %vm176_vm0, %v4273_v63 }
 0xc7a   :  { %v4241_v37 = vpop.permute.xlu0 %4240 }
 0xc7b   :  { %v4274_v25 = vmul.f32 %v6579_v18, %v4241_v37 }
 0xc7d   :  { %6880 = vmatprep.mubr.msk.f32.mxu0 %vm176_vm0, %v4274_v25 }
 0xc7e   :  { %v4243_v24 = vpop.permute.xlu1 %4242 }
 0xc7f   :  { %v4275_v35 = vmul.f32 %v6582_v10, %v4243_v24 }
 0xc81   :  { %6881 = vmatmul.mubr.msk.f32.gmra.mxu0 %vm176_vm0, %v4275_v35 }
 0xd08   :  { %v6861_v9 = vpop.f32.mrf.mxu0 }
 0xd09   :  { %v4400_v60 = vadd.f32 %v6861_v9, %v8875_v51 }
 0xd0a   :  { %v4394_v12 = vpop.f32.mrf.mxu0 }
 0xd0b   :  { %v8879_v13 = vadd.f32 %v4400_v60, %v8483_v26  ;;  %v4395_v11 = vadd.f32 %v8875_v51, %v4394_v12 }
 0xd0d   :  { %v8883_v48 = vadd.f32 %v4395_v11, %v8478_v55  ;;  %v4494_v18 = vsel %vm176_vm0, %v8879_v13, 0.0  ;;  %v4743_v11 = vld [vmem:[#allocation8 + $0x228] sm:$0xff] }
 0xd0e   :  { %4495 = vadd.xlane.f32.xlu1 %v4494_v18  ;;  %6883 = vmatprep.subr.mxu1 %v4743_v11 }
 0xd0f   :  { %v4491_v17 = vsel %vm176_vm0, %v8883_v48, 0.0  ;;  %6884 = vmatpush3.msra.mxu1 %v4743_v11 }
 0xd10   :  { %4492 = vadd.xlane.f32.xlu0 %v4491_v17  ;;  %v6864_v39 = vpop.f32.mrf.mxu0 }
 0xd11   :  { %v4410_v10 = vadd.f32 %v6864_v39, %v8875_v51 }
 0xd12   :  { %v4404_v34 = vpop.f32.mrf.mxu0 }
 0xd13   :  { %v4405_v26 = vadd.f32 %v8875_v51, %v4404_v34  ;;  %v8895_v55 = vadd.f32 %v4410_v10, %v8489_v50 }
 0xd15   :  { %v8892_v29 = vadd.f32 %v4405_v26, %v8485_v31  ;;  %v4500_v41 = vsel %vm176_vm0, %v8895_v55, 0.0 }
 0xd17   :  { %v4497_v53 = vsel %vm176_vm0, %v8892_v29, 0.0 }
 0xd18   :  { %4498 = vadd.xlane.f32.xlu0 %v4497_v53 }
 0xd19   :  { %v6867_v45 = vpop.f32.mrf.mxu0 }
 0xd1a   :  { %v4420_v59 = vadd.f32 %v6867_v45, %v8875_v51 }
 0xd1b   :  { %v4414_v30 = vpop.f32.mrf.mxu0 }
 0xd1c   :  { %v8903_v61 = vadd.f32 %v4420_v59, %v8497_v1  ;;  %v4415_v31 = vadd.f32 %v8875_v51, %v4414_v30  ;;  %4501 = vadd.xlane.f32.xlu0 %v4500_v41 }
 0xd1e   :  { %v8907_v50 = vadd.f32 %v4415_v31, %v8493_v8  ;;  %v4506_v43 = vsel %vm176_vm0, %v8903_v61, 0.0 }
 0xd20   :  { %4507 = vadd.xlane.f32.xlu0 %v4506_v43  ;;  %v4503_v46 = vsel %vm176_vm0, %v8907_v50, 0.0 }
 0xd21   :  { %4504 = vadd.xlane.f32.xlu1 %v4503_v46  ;;  %v6870_v38 = vpop.f32.mrf.mxu0 }
 0xd22   :  { %v4430_v32 = vadd.f32 %v6870_v38, %v8875_v51 }
 0xd23   :  { %v4424_v7 = vpop.f32.mrf.mxu0 }
 0xd24   :  { %v8915_v1 = vadd.f32 %v4430_v32, %v8505_v58  ;;  %v4425_v21 = vadd.f32 %v8875_v51, %v4424_v7 }
 0xd26   :  { %v8919_v8 = vadd.f32 %v4425_v21, %v8501_v27  ;;  %v4512_v23 = vsel %vm176_vm0, %v8915_v1, 0.0 }
 0xd27   :  { %4513 = vadd.xlane.f32.xlu0 %v4512_v23 }
 0xd28   :  { %v4509_v36 = vsel %vm176_vm0, %v8919_v8, 0.0 }
 0xd29   :  { %4510 = vadd.xlane.f32.xlu1 %v4509_v36  ;;  %v6873_v4 = vpop.f32.mrf.mxu0 }
 0xd2a   :  { %v4440_v62 = vadd.f32 %v6873_v4, %v8875_v51 }
 0xd2b   :  { %v4434_v16 = vpop.f32.mrf.mxu0 }
 0xd2c   :  { %v8927_v58 = vadd.f32 %v4440_v62, %v8513_v15  ;;  %v4435_v40 = vadd.f32 %v8875_v51, %v4434_v16 }
 0xd2e   :  { %v8931_v27 = vadd.f32 %v4435_v40, %v8509_v54  ;;  %v4518_v0 = vsel %vm176_vm0, %v8927_v58, 0.0 }
 0xd2f   :  { %4519 = vadd.xlane.f32.xlu0 %v4518_v0 }
 0xd30   :  { %v4515_v19 = vsel %vm176_vm0, %v8931_v27, 0.0 }
 0xd31   :  { %4516 = vadd.xlane.f32.xlu1 %v4515_v19  ;;  %v6876_v47 = vpop.f32.mrf.mxu0 }
 0xd32   :  { %v4450_v44 = vadd.f32 %v6876_v47, %v8875_v51 }
 0xd33   :  { %v4444_v52 = vpop.f32.mrf.mxu0 }
 0xd34   :  { %v8939_v15 = vadd.f32 %v4450_v44, %v8521_v42  ;;  %v4445_v2 = vadd.f32 %v8875_v51, %v4444_v52 }
 0xd36   :  { %v8943_v54 = vadd.f32 %v4445_v2, %v8517_v33  ;;  %v4524_v56 = vsel %vm176_vm0, %v8939_v15, 0.0 }
 0xd37   :  { %4525 = vadd.xlane.f32.xlu0 %v4524_v56 }
 0xd38   :  { %v4521_v22 = vsel %vm176_vm0, %v8943_v54, 0.0 }
 0xd39   :  { %4522 = vadd.xlane.f32.xlu1 %v4521_v22  ;;  %v6879_v57 = vpop.f32.mrf.mxu0 }
 0xd3a   :  { %v4460_v6 = vadd.f32 %v6879_v57, %v8875_v51 }
 0xd3b   :  { %v4454_v3 = vpop.f32.mrf.mxu0 }
 0xd3c   :  { %v8951_v42 = vadd.f32 %v4460_v6, %v8529_v28  ;;  %v4455_v5 = vadd.f32 %v8875_v51, %v4454_v3 }
 0xd3e   :  { %v8955_v33 = vadd.f32 %v4455_v5, %v8525_v20  ;;  %v4530_v63 = vsel %vm176_vm0, %v8951_v42, 0.0 }
 0xd3f   :  { %4531 = vadd.xlane.f32.xlu0 %v4530_v63 }
 0xd40   :  { %v4527_v37 = vsel %vm176_vm0, %v8955_v33, 0.0 }
 0xd41   :  { %4528 = vadd.xlane.f32.xlu1 %v4527_v37  ;;  %v6882_v25 = vpop.f32.mrf.mxu0 }
 0xd42   :  { %v4470_v24 = vadd.f32 %v6882_v25, %v8875_v51  ;;  %v4742_v25 = vld [vmem:[#allocation8 + $0x220] sm:$0xff] }
 0xd43   :  { %v4464_v35 = vpop.f32.mrf.mxu0  ;;  %6885 = vmatprep.subr.mxu1 %v4742_v25 }
 0xd44   :  { %v8963_v28 = vadd.f32 %v4470_v24, %v8537_v49  ;;  %v4465_v9 = vadd.f32 %v8875_v51, %v4464_v35  ;;  %6886 = vmatpush3.msra.mxu1 %v4742_v25 }
 0xd46   :  { %v8967_v20 = vadd.f32 %v4465_v9, %v8533_v14  ;;  %v4536_v60 = vsel %vm176_vm0, %v8963_v28, 0.0 }
 0xd47   :  { %4537 = vadd.xlane.f32.xlu0 %v4536_v60 }
 0xd48   :  { %v4533_v12 = vsel %vm176_vm0, %v8967_v20, 0.0 }
 0xd49   :  { %4534 = vadd.xlane.f32.xlu1 %v4533_v12  ;;  %v4741_v12 = vld [vmem:[#allocation8 + $0x218] sm:$0xff] }
 0xd4a   :  { %6887 = vmatprep.subr.mxu1 %v4741_v12 }
 0xd4b   :  { %6888 = vmatpush3.msra.mxu1 %v4741_v12  ;;  %v9069_v12 = vld [vmem:[#allocation8 + $0x200] ss:$0 sm:$0xff] }
 0xd97   :  { %v4496_v18 = vpop.xlane.xlu1 %4495 }
 0xd98   :  { %v4541_v17 = vmul.f32 0.03125, %v4496_v18 }
 0xd99   :  { %v4493_v49 = vpop.xlane.xlu0 %4492 }
 0xd9a   :  { %v8974_v39 = vsub.f32 %v8879_v13, %v4541_v17  ;;  %v4540_v51 = vmul.f32 0.03125, %v4493_v49  ;;  %v4740_v17 = vld [vmem:[#allocation8 + $0x210] sm:$0xff] }
 0xd9b   :  { %6889 = vmatprep.subr.mxu1 %v4740_v17 }
 0xd9c   :  { %v8977_v14 = vsub.f32 %v8883_v48, %v4540_v51  ;;  %v4573_v34 = vmul.f32 %v8974_v39, %v8974_v39  ;;  %6890 = vmatpush3.msra.mxu1 %v4740_v17 }
 0xd9e   :  { %v4591_v10 = vsel %vm176_vm0, %v4573_v34, 0.0  ;;  %v4572_v26 = vmul.f32 %v8977_v14, %v8977_v14 }
 0xd9f   :  { %4592 = vadd.xlane.f32.xlu0 %v4591_v10 }
 0xda0   :  { %v4588_v53 = vsel %vm176_vm0, %v4572_v26, 0.0 }
 0xda1   :  { %4589 = vadd.xlane.f32.xlu1 %v4588_v53  ;;  %v4499_v45 = vpop.xlane.xlu0 %4498 }
 0xda2   :  { %v4542_v59 = vmul.f32 0.03125, %v4499_v45 }
 0xda4   :  { %v8986_v13 = vsub.f32 %v8892_v29, %v4542_v59 }
 0xda5   :  { %v4502_v30 = vpop.xlane.xlu0 %4501 }
 0xda6   :  { %v4543_v48 = vmul.f32 0.03125, %v4502_v30  ;;  %v4574_v41 = vmul.f32 %v8986_v13, %v8986_v13 }
 0xda8   :  { %v8991_v31 = vsub.f32 %v8895_v55, %v4543_v48  ;;  %v4594_v43 = vsel %vm176_vm0, %v4574_v41, 0.0 }
 0xda9   :  { %4595 = vadd.xlane.f32.xlu1 %v4594_v43  ;;  %v4508_v46 = vpop.xlane.xlu0 %4507 }
 0xdaa   :  { %v4505_v38 = vpop.xlane.xlu1 %4504  ;;  %v4545_v32 = vmul.f32 0.03125, %v4508_v46  ;;  %v4575_v7 = vmul.f32 %v8991_v31, %v8991_v31 }
 0xdab   :  { %v4544_v21 = vmul.f32 0.03125, %v4505_v38 }
 0xdac   :  { %v8997_v29 = vsub.f32 %v8903_v61, %v4545_v32  ;;  %v4597_v23 = vsel %vm176_vm0, %v4575_v7, 0.0 }
 0xdad   :  { %v9001_v36 = vsub.f32 %v8907_v50, %v4544_v21  ;;  %4598 = vadd.xlane.f32.xlu0 %v4597_v23 }
 0xdae   :  { %v4577_v55 = vmul.f32 %v8997_v29, %v8997_v29 }
 0xdaf   :  { %v4576_v4 = vmul.f32 %v9001_v36, %v9001_v36 }
 0xdb0   :  { %v4514_v62 = vpop.xlane.xlu0 %4513  ;;  %v4603_v16 = vsel %vm176_vm0, %v4577_v55, 0.0 }
 0xdb1   :  { %v4547_v40 = vmul.f32 0.03125, %v4514_v62  ;;  %v4600_v0 = vsel %vm176_vm0, %v4576_v4, 0.0  ;;  %4604 = vadd.xlane.f32.xlu0 %v4603_v16  ;;  %v4973_v4 = vld [vmem:[#allocation8 + $0x2b0] sm:$0xff]  ;;  %v4972_v62 = vld [vmem:[#allocation8 + $0x2a8] sm:$0xff] }
 0xdb2   :  { %v4511_v61 = vpop.xlane.xlu1 %4510  ;;  %4601 = vadd.xlane.f32.xlu1 %v4600_v0  ;;  %6915 = vmatprep.subr.mxu0 %v4973_v4  ;;  %v4969_v16 = vld [vmem:[#allocation8 + $0x290] sm:$0xff]  ;;  %v4967_v0 = vld [vmem:[#allocation8 + $0x280] sm:$0xff] }
 0xdb3   :  { %v9010_v19 = vsub.f32 %v8915_v1, %v4547_v40  ;;  %v4546_v50 = vmul.f32 0.03125, %v4511_v61  ;;  %6916 = vmatpush3.msra.mxu0 %v4973_v4  ;;  %v4968_v40 = vld [vmem:[#allocation8 + $0x288] sm:$0xff]  ;;  %v4966_v61 = vld [vmem:[#allocation8 + $0x278] sm:$0xff] }
 0xdb4   :  { %6917 = vmatprep.subr.mxu0 %v4972_v62 }
 0xdb5   :  { %v9013_v47 = vsub.f32 %v8919_v8, %v4546_v50  ;;  %v4579_v44 = vmul.f32 %v9010_v19, %v9010_v19  ;;  %6918 = vmatpush3.msra.mxu0 %v4972_v62  ;;  %v4965_v50 = vld [vmem:[#allocation8 + $0x270] sm:$0xff] }
 0xdb7   :  { %v4609_v52 = vsel %vm176_vm0, %v4579_v44, 0.0  ;;  %v4578_v2 = vmul.f32 %v9013_v47, %v9013_v47  ;;  %v4964_v44 = vld [vmem:[#allocation8 + $0x268] sm:$0xff] }
 0xdb8   :  { %4610 = vadd.xlane.f32.xlu0 %v4609_v52  ;;  %v4520_v56 = vpop.xlane.xlu0 %4519  ;;  %v4963_v52 = vld [vmem:[#allocation8 + $0x260] sm:$0xff] }
 0xdb9   :  { %v4549_v22 = vmul.f32 0.03125, %v4520_v56  ;;  %v4606_v57 = vsel %vm176_vm0, %v4578_v2, 0.0  ;;  %v4962_v2 = vld [vmem:[#allocation8 + $0x258] sm:$0xff] }
 0xdba   :  { %v4517_v6 = vpop.xlane.xlu1 %4516  ;;  %4607 = vadd.xlane.f32.xlu1 %v4606_v57 }
 0xdbb   :  { %v9022_v1 = vsub.f32 %v8927_v58, %v4549_v22  ;;  %v4548_v8 = vmul.f32 0.03125, %v4517_v6 }
 0xdbd   :  { %v9025_v3 = vsub.f32 %v8931_v27, %v4548_v8  ;;  %v4581_v5 = vmul.f32 %v9022_v1, %v9022_v1 }
 0xdbf   :  { %v4615_v63 = vsel %vm176_vm0, %v4581_v5, 0.0  ;;  %v4580_v37 = vmul.f32 %v9025_v3, %v9025_v3 }
 0xdc0   :  { %4616 = vadd.xlane.f32.xlu0 %v4615_v63  ;;  %v4526_v24 = vpop.xlane.xlu0 %4525 }
 0xdc1   :  { %v4551_v35 = vmul.f32 0.03125, %v4526_v24  ;;  %v4612_v58 = vsel %vm176_vm0, %v4580_v37, 0.0 }
 0xdc2   :  { %v4523_v9 = vpop.xlane.xlu1 %4522  ;;  %4613 = vadd.xlane.f32.xlu1 %v4612_v58 }
 0xdc3   :  { %v9034_v27 = vsub.f32 %v8939_v15, %v4551_v35  ;;  %v4550_v60 = vmul.f32 0.03125, %v4523_v9 }
 0xdc5   :  { %v9037_v11 = vsub.f32 %v8943_v54, %v4550_v60  ;;  %v4583_v18 = vmul.f32 %v9034_v27, %v9034_v27 }
 0xdc7   :  { %v4621_v49 = vsel %vm176_vm0, %v4583_v18, 0.0  ;;  %v4582_v51 = vmul.f32 %v9037_v11, %v9037_v11 }
 0xdc8   :  { %4622 = vadd.xlane.f32.xlu0 %v4621_v49  ;;  %v4532_v15 = vpop.xlane.xlu0 %4531 }
 0xdc9   :  { %v4553_v34 = vmul.f32 0.03125, %v4532_v15  ;;  %v4618_v10 = vsel %vm176_vm0, %v4582_v51, 0.0 }
 0xdca   :  { %v4529_v26 = vpop.xlane.xlu1 %4528  ;;  %4619 = vadd.xlane.f32.xlu1 %v4618_v10 }
 0xdcb   :  { %v9046_v54 = vsub.f32 %v8951_v42, %v4553_v34  ;;  %v4552_v53 = vmul.f32 0.03125, %v4529_v26 }
 0xdcd   :  { %v9049_v45 = vsub.f32 %v8955_v33, %v4552_v53  ;;  %v4585_v59 = vmul.f32 %v9046_v54, %v9046_v54 }
 0xdcf   :  { %v4627_v30 = vsel %vm176_vm0, %v4585_v59, 0.0  ;;  %v4584_v48 = vmul.f32 %v9049_v45, %v9049_v45  ;;  %v9074_v59 = vld [vmem:[#allocation8 + $0x208] ss:$0 sm:$0xff] }
 0xdd0   :  { %4628 = vadd.xlane.f32.xlu0 %v4627_v30  ;;  %v4538_v41 = vpop.xlane.xlu0 %4537 }
 0xdd1   :  { %v4555_v43 = vmul.f32 0.03125, %v4538_v41  ;;  %v4624_v46 = vsel %vm176_vm0, %v4584_v48, 0.0 }
 0xdd2   :  { %v4535_v38 = vpop.xlane.xlu1 %4534  ;;  %4625 = vadd.xlane.f32.xlu1 %v4624_v46 }
 0xdd3   :  { %v9058_v42 = vsub.f32 %v8963_v28, %v4555_v43  ;;  %v4554_v33 = vmul.f32 0.03125, %v4535_v38  ;;  %v4971_v28 = vld [vmem:[#allocation8 + $0x2a0] sm:$0xff] }
 0xdd4   :  { %6919 = vmatprep.subr.mxu0 %v4971_v28 }
 0xdd5   :  { %v9061_v32 = vsub.f32 %v8967_v20, %v4554_v33  ;;  %v4587_v7 = vmul.f32 %v9058_v42, %v9058_v42  ;;  %v4970_v20 = vld [vmem:[#allocation8 + $0x298] sm:$0xff]  ;;  %6920 = vmatpush3.msra.mxu0 %v4971_v28 }
 0xdd6   :  { %6921 = vmatprep.subr.mxu0 %v4970_v20 }
 0xdd7   :  { %v4633_v21 = vsel %vm176_vm0, %v4587_v7, 0.0  ;;  %v4586_v23 = vmul.f32 %v9061_v32, %v9061_v32  ;;  %6922 = vmatpush3.msra.mxu0 %v4970_v20 }
 0xdd8   :  { %4634 = vadd.xlane.f32.xlu0 %v4633_v21  ;;  %6923 = vmatprep.subr.mxu0 %v4969_v16 }
 0xdd9   :  { %v4630_v55 = vsel %vm176_vm0, %v4586_v23, 0.0  ;;  %6924 = vmatpush3.msra.mxu0 %v4969_v16 }
 0xdda   :  { %4631 = vadd.xlane.f32.xlu1 %v4630_v55  ;;  %6925 = vmatprep.subr.mxu0 %v4968_v40 }
 0xddb   :  { %6926 = vmatpush3.msra.mxu0 %v4968_v40 }
 0xddc   :  { %6927 = vmatprep.subr.mxu0 %v4967_v0 }
 0xddd   :  { %6928 = vmatpush3.msra.mxu0 %v4967_v0 }
 0xdde   :  { %6929 = vmatprep.subr.mxu0 %v4966_v61 }
 0xddf   :  { %6930 = vmatpush3.msra.mxu0 %v4966_v61 }
 0xde0   :  { %6931 = vmatprep.subr.mxu0 %v4965_v50 }
 0xde1   :  { %6932 = vmatpush3.msra.mxu0 %v4965_v50 }
 0xde2   :  { %6933 = vmatprep.subr.mxu0 %v4964_v44 }
 0xde3   :  { %6934 = vmatpush3.msra.mxu0 %v4964_v44 }
 0xde4   :  { %6935 = vmatprep.subr.mxu0 %v4963_v52 }
 0xde5   :  { %6936 = vmatpush3.msra.mxu0 %v4963_v52 }
 0xde6   :  { %6937 = vmatprep.subr.mxu0 %v4962_v2 }
 0xde7   :  { %6938 = vmatpush3.msra.mxu0 %v4962_v2 }
 0xe28   :  { %v4593_v56 = vpop.xlane.xlu0 %4592 }
 0xe29   :  { %v4637_v22 = vmul.f32 0.03125, %v4593_v56 }
 0xe2a   :  { %v4590_v57 = vpop.xlane.xlu1 %4589 }
 0xe2b   :  { %v4653_v6 = vadd.f32 1e-05, %v4637_v22  ;;  %v4636_v8 = vmul.f32 0.03125, %v4590_v57 }
 0xe2d   :  { %7276 = vrsqrt.f32 %v4653_v6  ;;  %v4652_v5 = vadd.f32 1e-05, %v4636_v8 }
 0xe2f   :  { %7278 = vrsqrt.f32 %v4652_v5 }
 0xe32   :  { %v4596_v63 = vpop.xlane.xlu1 %4595 }
 0xe33   :  { %v4638_v37 = vmul.f32 0.03125, %v4596_v63 }
 0xe35   :  { %v4654_v25 = vadd.f32 1e-05, %v4638_v37 }
 0xe36   :  { %v4599_v24 = vpop.xlane.xlu0 %4598 }
 0xe37   :  { %7280 = vrsqrt.f32 %v4654_v25  ;;  %v4639_v35 = vmul.f32 0.03125, %v4599_v24 }
 0xe39   :  { %v4655_v58 = vadd.f32 1e-05, %v4639_v35 }
 0xe3a   :  { %v7277_v9 = vpop.eup %7276  ;;  %v4605_v60 = vpop.xlane.xlu0 %4604 }
 0xe3b   :  { %v4685_v18 = vmul.f32 %v7277_v9, %v8974_v39  ;;  %7282 = vrsqrt.f32 %v4655_v58  ;;  %v4602_v17 = vpop.xlane.xlu1 %4601  ;;  %v4641_v49 = vmul.f32 0.03125, %v4605_v60 }
 0xe3c   :  { %v7279_v51 = vpop.eup %7278  ;;  %v4640_v15 = vmul.f32 0.03125, %v4602_v17 }
 0xe3d   :  { %v4657_v34 = vadd.f32 1e-05, %v4641_v49  ;;  %v4684_v10 = vmul.f32 %v7279_v51, %v8977_v14  ;;  %v4705_v26 = vmul.f32 %v9069_v12, %v4685_v18 }
 0xe3e   :  { %v4656_v53 = vadd.f32 1e-05, %v4640_v15 }
 0xe3f   :  { %7284 = vrsqrt.f32 %v4657_v34  ;;  %v4704_v30 = vmul.f32 %v9069_v12, %v4684_v10  ;;  %v9081_v41 = vadd.f32 %v9074_v59, %v4705_v26 }
 0xe40   :  { %7286 = vrsqrt.f32 %v4656_v53 }
 0xe41   :  { %v4611_v48 = vpop.xlane.xlu0 %4610  ;;  %v9078_v39 = vadd.f32 %v9074_v59, %v4704_v30 }
 0xe42   :  { %v4643_v43 = vmul.f32 0.03125, %v4611_v48 }
 0xe43   :  { %v4608_v46 = vpop.xlane.xlu1 %4607  ;;  %6891 = vmatprep.mubr.msk.f32.mxu1 %vm176_vm0, %v9078_v39 }
 0xe44   :  { %v7281_v14 = vpop.eup %7280  ;;  %v4659_v38 = vadd.f32 1e-05, %v4643_v43  ;;  %v4642_v33 = vmul.f32 0.03125, %v4608_v46  ;;  %6892 = vmatmul.mubr.msk.f32.vlgmr.msra.gmra.mxu1 %vm176_vm0, %v9081_v41 }
 0xe45   :  { %v4686_v7 = vmul.f32 %v7281_v14, %v8986_v13 }
 0xe46   :  { %7288 = vrsqrt.f32 %v4659_v38  ;;  %v4658_v21 = vadd.f32 1e-05, %v4642_v33 }
 0xe47   :  { %v4706_v23 = vmul.f32 %v9069_v12, %v4686_v7 }
 0xe48   :  { %v7283_v55 = vpop.eup %7282  ;;  %7290 = vrsqrt.f32 %v4658_v21 }
 0xe49   :  { %v4687_v4 = vmul.f32 %v7283_v55, %v8991_v31  ;;  %v4617_v62 = vpop.xlane.xlu0 %4616  ;;  %v9091_v28 = vadd.f32 %v9074_v59, %v4706_v23 }
 0xe4a   :  { %v4645_v20 = vmul.f32 0.03125, %v4617_v62 }
 0xe4b   :  { %v4614_v16 = vpop.xlane.xlu1 %4613  ;;  %6894 = vmatprep.mubr.msk.f32.mxu1 %vm176_vm0, %v9091_v28  ;;  %v4707_v40 = vmul.f32 %v9069_v12, %v4687_v4 }
 0xe4c   :  { %v7285_v13 = vpop.eup %7284  ;;  %v4661_v0 = vadd.f32 1e-05, %v4645_v20  ;;  %v4644_v61 = vmul.f32 0.03125, %v4614_v16 }
 0xe4d   :  { %v7287_v50 = vpop.eup %7286  ;;  %v4689_v44 = vmul.f32 %v7285_v13, %v8997_v29  ;;  %v9098_v52 = vadd.f32 %v9074_v59, %v4707_v40 }
 0xe4e   :  { %7292 = vrsqrt.f32 %v4661_v0  ;;  %v4660_v31 = vadd.f32 1e-05, %v4644_v61  ;;  %v4688_v2 = vmul.f32 %v7287_v50, %v9001_v36 }
 0xe4f   :  { %6895 = vmatmul.mubr.msk.f32.gmra.mxu1 %vm176_vm0, %v9098_v52  ;;  %v4709_v56 = vmul.f32 %v9069_v12, %v4689_v44 }
 0xe50   :  { %7294 = vrsqrt.f32 %v4660_v31  ;;  %v4708_v22 = vmul.f32 %v9069_v12, %v4688_v2 }
 0xe51   :  { %v4623_v57 = vpop.xlane.xlu0 %4622  ;;  %v9106_v6 = vadd.f32 %v9074_v59, %v4709_v56 }
 0xe52   :  { %v4647_v29 = vmul.f32 0.03125, %v4623_v57  ;;  %v9109_v8 = vadd.f32 %v9074_v59, %v4708_v22 }
 0xe53   :  { %v7289_v5 = vpop.eup %7288  ;;  %v4620_v63 = vpop.xlane.xlu1 %4619 }
 0xe54   :  { %v4691_v36 = vmul.f32 %v7289_v5, %v9010_v19  ;;  %v4663_v37 = vadd.f32 1e-05, %v4647_v29  ;;  %v4646_v25 = vmul.f32 0.03125, %v4620_v63  ;;  %6897 = vmatprep.mubr.msk.f32.mxu1 %vm176_vm0, %v9109_v8 }
 0xe55   :  { %v7291_v24 = vpop.eup %7290  ;;  %6898 = vmatmul.mubr.msk.f32.gmra.mxu1 %vm176_vm0, %v9106_v6 }
 0xe56   :  { %7296 = vrsqrt.f32 %v4663_v37  ;;  %v4662_v35 = vadd.f32 1e-05, %v4646_v25  ;;  %v4690_v58 = vmul.f32 %v7291_v24, %v9013_v47  ;;  %v4711_v9 = vmul.f32 %v9069_v12, %v4691_v36  ;;  %v4959_v36 = vld [vmem:[#allocation8 + $0x240] sm:$0xff] }
 0xe58   :  { %7298 = vrsqrt.f32 %v4662_v35  ;;  %v4710_v60 = vmul.f32 %v9069_v12, %v4690_v58  ;;  %v9123_v15 = vadd.f32 %v9074_v59, %v4711_v9 }
 0xe59   :  { %v4629_v18 = vpop.xlane.xlu0 %4628 }
 0xe5a   :  { %v4649_v19 = vmul.f32 0.03125, %v4629_v18  ;;  %v9120_v17 = vadd.f32 %v9074_v59, %v4710_v60 }
 0xe5b   :  { %v7293_v49 = vpop.eup %7292  ;;  %v4626_v51 = vpop.xlane.xlu1 %4625 }
 0xe5c   :  { %v4693_v34 = vmul.f32 %v7293_v49, %v9022_v1  ;;  %v4665_v10 = vadd.f32 1e-05, %v4649_v19  ;;  %v4648_v26 = vmul.f32 0.03125, %v4626_v51  ;;  %6900 = vmatprep.mubr.msk.f32.mxu1 %vm176_vm0, %v9120_v17 }
 0xe5d   :  { %v7295_v47 = vpop.eup %7294  ;;  %6901 = vmatmul.mubr.msk.f32.gmra.mxu1 %vm176_vm0, %v9123_v15 }
 0xe5e   :  { %7300 = vrsqrt.f32 %v4665_v10  ;;  %v4664_v53 = vadd.f32 1e-05, %v4648_v26  ;;  %v4692_v30 = vmul.f32 %v7295_v47, %v9025_v3  ;;  %v4713_v48 = vmul.f32 %v9069_v12, %v4693_v34 }
 0xe60   :  { %7302 = vrsqrt.f32 %v4664_v53  ;;  %v4712_v43 = vmul.f32 %v9069_v12, %v4692_v30  ;;  %v9137_v7 = vadd.f32 %v9074_v59, %v4713_v48 }
 0xe61   :  { %v4635_v46 = vpop.xlane.xlu0 %4634 }
 0xe62   :  { %v4651_v1 = vmul.f32 0.03125, %v4635_v46  ;;  %v9134_v14 = vadd.f32 %v9074_v59, %v4712_v43 }
 0xe63   :  { %v7297_v38 = vpop.eup %7296  ;;  %v4632_v33 = vpop.xlane.xlu1 %4631 }
 0xe64   :  { %v4695_v21 = vmul.f32 %v7297_v38, %v9034_v27  ;;  %v4667_v23 = vadd.f32 1e-05, %v4651_v1  ;;  %v4650_v55 = vmul.f32 0.03125, %v4632_v33  ;;  %6903 = vmatprep.mubr.msk.f32.mxu1 %vm176_vm0, %v9134_v14 }
 0xe65   :  { %v7299_v3 = vpop.eup %7298  ;;  %6904 = vmatmul.mubr.msk.f32.gmra.mxu1 %vm176_vm0, %v9137_v7 }
 0xe66   :  { %7304 = vrsqrt.f32 %v4667_v23  ;;  %v4666_v4 = vadd.f32 1e-05, %v4650_v55  ;;  %v4694_v62 = vmul.f32 %v7299_v3, %v9037_v11  ;;  %v4715_v20 = vmul.f32 %v9069_v12, %v4695_v21 }
 0xe68   :  { %7306 = vrsqrt.f32 %v4666_v4  ;;  %v4714_v16 = vmul.f32 %v9069_v12, %v4694_v62  ;;  %v9151_v13 = vadd.f32 %v9074_v59, %v4715_v20 }
 0xe6a   :  { %v9148_v27 = vadd.f32 %v9074_v59, %v4714_v16 }
 0xe6b   :  { %v7301_v40 = vpop.eup %7300 }
 0xe6c   :  { %v4697_v0 = vmul.f32 %v7301_v40, %v9046_v54  ;;  %6906 = vmatprep.mubr.msk.f32.mxu1 %vm176_vm0, %v9148_v27 }
 0xe6d   :  { %v7303_v61 = vpop.eup %7302  ;;  %6907 = vmatmul.mubr.msk.f32.gmra.mxu1 %vm176_vm0, %v9151_v13 }
 0xe6e   :  { %v4696_v11 = vmul.f32 %v7303_v61, %v9049_v45  ;;  %v4717_v50 = vmul.f32 %v9069_v12, %v4697_v0 }
 0xe70   :  { %v4716_v44 = vmul.f32 %v9069_v12, %v4696_v11  ;;  %v9165_v56 = vadd.f32 %v9074_v59, %v4717_v50 }
 0xe72   :  { %v9162_v31 = vadd.f32 %v9074_v59, %v4716_v44 }
 0xe73   :  { %v7305_v2 = vpop.eup %7304 }
 0xe74   :  { %v4699_v54 = vmul.f32 %v7305_v2, %v9058_v42  ;;  %6909 = vmatprep.mubr.msk.f32.mxu1 %vm176_vm0, %v9162_v31  ;;  %v4961_v42 = vld [vmem:[#allocation8 + $0x250] sm:$0xff] }
 0xe75   :  { %v7307_v22 = vpop.eup %7306  ;;  %6910 = vmatmul.mubr.msk.f32.gmra.mxu1 %vm176_vm0, %v9165_v56  ;;  %6939 = vmatprep.subr.mxu0 %v4961_v42 }
 0xe76   :  { %v4698_v45 = vmul.f32 %v7307_v22, %v9061_v32  ;;  %v4719_v57 = vmul.f32 %v9069_v12, %v4699_v54  ;;  %6940 = vmatpush3.msra.mxu0 %v4961_v42  ;;  %v4960_v32 = vld [vmem:[#allocation8 + $0x248] sm:$0xff] }
 0xe77   :  { %6941 = vmatprep.subr.mxu0 %v4960_v32 }
 0xe78   :  { %v4718_v29 = vmul.f32 %v9069_v12, %v4698_v45  ;;  %v9179_v63 = vadd.f32 %v9074_v59, %v4719_v57  ;;  %6942 = vmatpush3.msra.mxu0 %v4960_v32  ;;  %v4958_v12 = vld [vmem:[#allocation8 + $0x238] sm:$0xff] }
 0xe79   :  { %6943 = vmatprep.subr.mxu0 %v4959_v36 }
 0xe7a   :  { %v9176_v5 = vadd.f32 %v9074_v59, %v4718_v29  ;;  %6944 = vmatpush3.msra.mxu0 %v4959_v36  ;;  %v5982_v59 = vld [vmem:[#allocation8 + $0x230] ss:$0 sm:$0xff] }
 0xe7b   :  { %6945 = vmatprep.subr.mxu0 %v4958_v12 }
 0xe7c   :  { %6912 = vmatprep.mubr.msk.f32.mxu1 %vm176_vm0, %v9176_v5  ;;  %6946 = vmatpush3.msra.mxu0 %v4958_v12 }
 0xe7d   :  { %6913 = vmatmul.mubr.msk.f32.gmra.mxu1 %vm176_vm0, %v9179_v63 }
 0xf04   :  { %v6893_v37 = vpop.f32.mrf.mxu1 }
 0xf05   :  { %v4869_v25 = vadd.f32 %v6893_v37, %v5982_v59 }
 0xf06   :  { %v4863_v24 = vpop.f32.mrf.mxu1 }
 0xf07   :  { %v4864_v35 = vadd.f32 %v5982_v59, %v4863_v24  ;;  %v4943_v9 = vmax.f32 %v4869_v25, 0.0  ;;  %v9185_v25 = vld [vmem:[#allocation8 + $0x2b8] ss:$0 sm:$0xff] }
 0xf09   :  { %v4942_v58 = vmax.f32 %v4864_v35, 0.0 }
 0xf0b   :  { %6947 = vmatprep.mubr.f32.mxu0 %v4942_v58 }
 0xf0c   :  { %6948 = vmatmul.mubr.f32.vlgmr.msra.gmra.mxu0 %v4943_v9 }
 0xf0f   :  { %v6896_v60 = vpop.f32.mrf.mxu1 }
 0xf10   :  { %v4879_v18 = vadd.f32 %v6896_v60, %v5982_v59 }
 0xf11   :  { %v4873_v19 = vpop.f32.mrf.mxu1 }
 0xf12   :  { %v4874_v49 = vadd.f32 %v5982_v59, %v4873_v19  ;;  %v4945_v34 = vmax.f32 %v4879_v18, 0.0 }
 0xf14   :  { %v4944_v51 = vmax.f32 %v4874_v49, 0.0 }
 0xf15   :  { %v6899_v10 = vpop.f32.mrf.mxu1 }
 0xf16   :  { %6950 = vmatprep.mubr.f32.mxu0 %v4944_v51  ;;  %v4889_v26 = vadd.f32 %v6899_v10, %v5982_v59 }
 0xf17   :  { %v4883_v47 = vpop.f32.mrf.mxu1  ;;  %6951 = vmatmul.mubr.f32.gmra.mxu0 %v4945_v34 }
 0xf18   :  { %v4884_v53 = vadd.f32 %v5982_v59, %v4883_v47  ;;  %v4947_v48 = vmax.f32 %v4889_v26, 0.0 }
 0xf1a   :  { %v4946_v30 = vmax.f32 %v4884_v53, 0.0 }
 0xf1c   :  { %6953 = vmatprep.mubr.f32.mxu0 %v4946_v30 }
 0xf1d   :  { %v6902_v43 = vpop.f32.mrf.mxu1  ;;  %6954 = vmatmul.mubr.f32.gmra.mxu0 %v4947_v48 }
 0xf1e   :  { %v4899_v46 = vadd.f32 %v6902_v43, %v5982_v59 }
 0xf1f   :  { %v4893_v1 = vpop.f32.mrf.mxu1 }
 0xf20   :  { %v4894_v38 = vadd.f32 %v5982_v59, %v4893_v1  ;;  %v4949_v21 = vmax.f32 %v4899_v46, 0.0 }
 0xf22   :  { %v4948_v33 = vmax.f32 %v4894_v38, 0.0 }
 0xf24   :  { %6956 = vmatprep.mubr.f32.mxu0 %v4948_v33 }
 0xf25   :  { %v6905_v23 = vpop.f32.mrf.mxu1  ;;  %6957 = vmatmul.mubr.f32.gmra.mxu0 %v4949_v21 }
 0xf26   :  { %v4909_v55 = vadd.f32 %v6905_v23, %v5982_v59 }
 0xf27   :  { %v4903_v3 = vpop.f32.mrf.mxu1 }
 0xf28   :  { %v4904_v4 = vadd.f32 %v5982_v59, %v4903_v3  ;;  %v4951_v20 = vmax.f32 %v4909_v55, 0.0 }
 0xf2a   :  { %v4950_v62 = vmax.f32 %v4904_v4, 0.0 }
 0xf2c   :  { %6959 = vmatprep.mubr.f32.mxu0 %v4950_v62 }
 0xf2d   :  { %v6908_v16 = vpop.f32.mrf.mxu1  ;;  %6960 = vmatmul.mubr.f32.gmra.mxu0 %v4951_v20 }
 0xf2e   :  { %v4919_v40 = vadd.f32 %v6908_v16, %v5982_v59 }
 0xf2f   :  { %v4913_v0 = vpop.f32.mrf.mxu1 }
 0xf30   :  { %v4914_v61 = vadd.f32 %v5982_v59, %v4913_v0  ;;  %v4953_v50 = vmax.f32 %v4919_v40, 0.0 }
 0xf32   :  { %v4952_v11 = vmax.f32 %v4914_v61, 0.0 }
 0xf34   :  { %6962 = vmatprep.mubr.f32.mxu0 %v4952_v11 }
 0xf35   :  { %v6911_v44 = vpop.f32.mrf.mxu1  ;;  %6963 = vmatmul.mubr.f32.gmra.mxu0 %v4953_v50 }
 0xf36   :  { %v4929_v2 = vadd.f32 %v6911_v44, %v5982_v59 }
 0xf37   :  { %v4923_v54 = vpop.f32.mrf.mxu1 }
 0xf38   :  { %v4924_v22 = vadd.f32 %v5982_v59, %v4923_v54  ;;  %v4955_v57 = vmax.f32 %v4929_v2, 0.0 }
 0xf3a   :  { %v4954_v45 = vmax.f32 %v4924_v22, 0.0 }
 0xf3c   :  { %6965 = vmatprep.mubr.f32.mxu0 %v4954_v45 }
 0xf3d   :  { %v6914_v29 = vpop.f32.mrf.mxu1  ;;  %6966 = vmatmul.mubr.f32.gmra.mxu0 %v4955_v57 }
 0xf3e   :  { %v4939_v42 = vadd.f32 %v6914_v29, %v5982_v59 }
 0xf3f   :  { %v4933_v32 = vpop.f32.mrf.mxu1 }
 0xf40   :  { %v4934_v36 = vadd.f32 %v5982_v59, %v4933_v32  ;;  %v4957_v37 = vmax.f32 %v4939_v42, 0.0 }
 0xf42   :  { %v4956_v12 = vmax.f32 %v4934_v36, 0.0 }
 0xf44   :  { %6968 = vmatprep.mubr.f32.mxu0 %v4956_v12 }
 0xf45   :  { %6969 = vmatmul.mubr.f32.gmra.mxu0 %v4957_v37 }
 0xfcc   :  { %v6949_v24 = vpop.f32.mrf.mxu0 }
 0xfcd   :  { %v5051_v35 = vadd.f32 %v6949_v24, %v9185_v25 }
 0xfce   :  { %v5045_v58 = vpop.f32.mrf.mxu0 }
 0xfcf   :  { %v9189_v9 = vadd.f32 %v5051_v35, %v9081_v41  ;;  %v5046_v60 = vadd.f32 %v9185_v25, %v5045_v58 }
 0xfd1   :  { %v9193_v18 = vadd.f32 %v5046_v60, %v9078_v39  ;;  %v5145_v59 = vsel %vm176_vm0, %v9189_v9, 0.0 }
 0xfd2   :  { %5146 = vadd.xlane.f32.xlu0 %v5145_v59 }
 0xfd3   :  { %v5142_v19 = vsel %vm176_vm0, %v9193_v18, 0.0 }
 0xfd4   :  { %5143 = vadd.xlane.f32.xlu1 %v5142_v19 }
 0xfd7   :  { %v6952_v49 = vpop.f32.mrf.mxu0 }
 0xfd8   :  { %v5061_v51 = vadd.f32 %v6952_v49, %v9185_v25 }
 0xfd9   :  { %v5055_v34 = vpop.f32.mrf.mxu0 }
 0xfda   :  { %v9201_v41 = vadd.f32 %v5061_v51, %v9098_v52  ;;  %v5056_v10 = vadd.f32 %v9185_v25, %v5055_v34 }
 0xfdc   :  { %v9205_v39 = vadd.f32 %v5056_v10, %v9091_v28  ;;  %v5151_v26 = vsel %vm176_vm0, %v9201_v41, 0.0 }
 0xfdd   :  { %v6955_v47 = vpop.f32.mrf.mxu0  ;;  %5152 = vadd.xlane.f32.xlu0 %v5151_v26 }
 0xfde   :  { %v5071_v53 = vadd.f32 %v6955_v47, %v9185_v25  ;;  %v5148_v30 = vsel %vm176_vm0, %v9205_v39, 0.0 }
 0xfdf   :  { %v5065_v48 = vpop.f32.mrf.mxu0  ;;  %5149 = vadd.xlane.f32.xlu1 %v5148_v30 }
 0xfe0   :  { %v9213_v52 = vadd.f32 %v5071_v53, %v9106_v6  ;;  %v5066_v43 = vadd.f32 %v9185_v25, %v5065_v48 }
 0xfe2   :  { %v9217_v28 = vadd.f32 %v5066_v43, %v9109_v8  ;;  %v5157_v46 = vsel %vm176_vm0, %v9213_v52, 0.0 }
 0xfe3   :  { %5158 = vadd.xlane.f32.xlu0 %v5157_v46 }
 0xfe4   :  { %v5154_v1 = vsel %vm176_vm0, %v9217_v28, 0.0 }
 0xfe5   :  { %5155 = vadd.xlane.f32.xlu1 %v5154_v1  ;;  %v6958_v38 = vpop.f32.mrf.mxu0 }
 0xfe6   :  { %v5081_v33 = vadd.f32 %v6958_v38, %v9185_v25 }
 0xfe7   :  { %v5075_v21 = vpop.f32.mrf.mxu0 }
 0xfe8   :  { %v9225_v6 = vadd.f32 %v5081_v33, %v9123_v15  ;;  %v5076_v23 = vadd.f32 %v9185_v25, %v5075_v21 }
 0xfea   :  { %v9229_v8 = vadd.f32 %v5076_v23, %v9120_v17  ;;  %v5163_v55 = vsel %vm176_vm0, %v9225_v6, 0.0 }
 0xfeb   :  { %5164 = vadd.xlane.f32.xlu0 %v5163_v55 }
 0xfec   :  { %v5160_v3 = vsel %vm176_vm0, %v9229_v8, 0.0 }
 0xfed   :  { %5161 = vadd.xlane.f32.xlu1 %v5160_v3  ;;  %v6961_v4 = vpop.f32.mrf.mxu0 }
 0xfee   :  { %v5091_v62 = vadd.f32 %v6961_v4, %v9185_v25 }
 0xfef   :  { %v5085_v20 = vpop.f32.mrf.mxu0 }
 0xff0   :  { %v9237_v15 = vadd.f32 %v5091_v62, %v9137_v7  ;;  %v5086_v16 = vadd.f32 %v9185_v25, %v5085_v20 }
 0xff2   :  { %v9241_v17 = vadd.f32 %v5086_v16, %v9134_v14  ;;  %v5169_v40 = vsel %vm176_vm0, %v9237_v15, 0.0 }
 0xff3   :  { %5170 = vadd.xlane.f32.xlu0 %v5169_v40 }
 0xff4   :  { %v5166_v0 = vsel %vm176_vm0, %v9241_v17, 0.0 }
 0xff5   :  { %5167 = vadd.xlane.f32.xlu1 %v5166_v0  ;;  %v6964_v61 = vpop.f32.mrf.mxu0 }
 0xff6   :  { %v5101_v11 = vadd.f32 %v6964_v61, %v9185_v25 }
 0xff7   :  { %v5095_v50 = vpop.f32.mrf.mxu0 }
 0xff8   :  { %v9249_v7 = vadd.f32 %v5101_v11, %v9151_v13  ;;  %v5096_v44 = vadd.f32 %v9185_v25, %v5095_v50 }
 0xffa   :  { %v9253_v14 = vadd.f32 %v5096_v44, %v9148_v27  ;;  %v5175_v2 = vsel %vm176_vm0, %v9249_v7, 0.0 }
 0xffb   :  { %5176 = vadd.xlane.f32.xlu0 %v5175_v2 }
 0xffc   :  { %v5172_v54 = vsel %vm176_vm0, %v9253_v14, 0.0 }
 0xffd   :  { %5173 = vadd.xlane.f32.xlu1 %v5172_v54  ;;  %v6967_v22 = vpop.f32.mrf.mxu0 }
 0xffe   :  { %v5111_v45 = vadd.f32 %v6967_v22, %v9185_v25 }
 0xfff   :  { %v5105_v57 = vpop.f32.mrf.mxu0 }
0x1000   :  { %v9261_v13 = vadd.f32 %v5111_v45, %v9165_v56  ;;  %v5106_v29 = vadd.f32 %v9185_v25, %v5105_v57 }
0x1002   :  { %v9265_v27 = vadd.f32 %v5106_v29, %v9162_v31  ;;  %v5181_v42 = vsel %vm176_vm0, %v9261_v13, 0.0 }
0x1003   :  { %5182 = vadd.xlane.f32.xlu0 %v5181_v42 }
0x1004   :  { %v5178_v32 = vsel %vm176_vm0, %v9265_v27, 0.0 }
0x1005   :  { %5179 = vadd.xlane.f32.xlu1 %v5178_v32  ;;  %v6970_v36 = vpop.f32.mrf.mxu0  ;;  %v5393_v32 = vld [vmem:[#allocation8 + $0x2e8] sm:$0xff] }
0x1006   :  { %v5121_v12 = vadd.f32 %v6970_v36, %v9185_v25  ;;  %6971 = vmatprep.subr.mxu1 %v5393_v32 }
0x1007   :  { %v5115_v37 = vpop.f32.mrf.mxu0  ;;  %6972 = vmatpush3.msra.mxu1 %v5393_v32 }
0x1008   :  { %v9273_v56 = vadd.f32 %v5121_v12, %v9179_v63  ;;  %v5116_v24 = vadd.f32 %v9185_v25, %v5115_v37  ;;  %v5392_v37 = vld [vmem:[#allocation8 + $0x2e0] sm:$0xff] }
0x1009   :  { %6973 = vmatprep.subr.mxu1 %v5392_v37 }
0x100a   :  { %v9277_v31 = vadd.f32 %v5116_v24, %v9176_v5  ;;  %v5187_v35 = vsel %vm176_vm0, %v9273_v56, 0.0  ;;  %6974 = vmatpush3.msra.mxu1 %v5392_v37 }
0x100b   :  { %5188 = vadd.xlane.f32.xlu0 %v5187_v35 }
0x100c   :  { %v5184_v58 = vsel %vm176_vm0, %v9277_v31, 0.0 }
0x100d   :  { %5185 = vadd.xlane.f32.xlu1 %v5184_v58  ;;  %v5391_v58 = vld [vmem:[#allocation8 + $0x2d8] sm:$0xff] }
0x100e   :  { %6975 = vmatprep.subr.mxu1 %v5391_v58 }
0x100f   :  { %6976 = vmatpush3.msra.mxu1 %v5391_v58 }
0x105b   :  { %v5147_v60 = vpop.xlane.xlu0 %5146 }
0x105c   :  { %v5191_v59 = vmul.f32 0.03125, %v5147_v60 }
0x105d   :  { %v5144_v19 = vpop.xlane.xlu1 %5143 }
0x105e   :  { %v9284_v49 = vsub.f32 %v9189_v9, %v5191_v59  ;;  %v5190_v63 = vmul.f32 0.03125, %v5144_v19  ;;  %v5390_v19 = vld [vmem:[#allocation8 + $0x2d0] sm:$0xff] }
0x105f   :  { %6977 = vmatprep.subr.mxu1 %v5390_v19 }
0x1060   :  { %v9287_v25 = vsub.f32 %v9193_v18, %v5190_v63  ;;  %v5223_v5 = vmul.f32 %v9284_v49, %v9284_v49  ;;  %6978 = vmatpush3.msra.mxu1 %v5390_v19 }
0x1062   :  { %v5241_v51 = vsel %vm176_vm0, %v5223_v5, 0.0  ;;  %v5222_v34 = vmul.f32 %v9287_v25, %v9287_v25 }
0x1063   :  { %5242 = vadd.xlane.f32.xlu0 %v5241_v51 }
0x1064   :  { %v5238_v10 = vsel %vm176_vm0, %v5222_v34, 0.0 }
0x1065   :  { %5239 = vadd.xlane.f32.xlu1 %v5238_v10 }
0x1066   :  { %v5153_v26 = vpop.xlane.xlu0 %5152 }
0x1067   :  { %v5193_v47 = vmul.f32 0.03125, %v5153_v26 }
0x1068   :  { %v5150_v9 = vpop.xlane.xlu1 %5149 }
0x1069   :  { %v9296_v53 = vsub.f32 %v9201_v41, %v5193_v47  ;;  %v5192_v18 = vmul.f32 0.03125, %v5150_v9 }
0x106b   :  { %v9299_v30 = vsub.f32 %v9205_v39, %v5192_v18  ;;  %v5225_v48 = vmul.f32 %v9296_v53, %v9296_v53 }
0x106c   :  { %v5159_v43 = vpop.xlane.xlu0 %5158 }
0x106d   :  { %v5195_v46 = vmul.f32 0.03125, %v5159_v43  ;;  %v5247_v1 = vsel %vm176_vm0, %v5225_v48, 0.0  ;;  %v5224_v38 = vmul.f32 %v9299_v30, %v9299_v30 }
0x106e   :  { %v5156_v33 = vpop.xlane.xlu1 %5155  ;;  %5248 = vadd.xlane.f32.xlu0 %v5247_v1 }
0x106f   :  { %v9307_v21 = vsub.f32 %v9213_v52, %v5195_v46  ;;  %v5194_v41 = vmul.f32 0.03125, %v5156_v33  ;;  %v5244_v23 = vsel %vm176_vm0, %v5224_v38, 0.0 }
0x1070   :  { %5245 = vadd.xlane.f32.xlu1 %v5244_v23 }
0x1071   :  { %v9311_v39 = vsub.f32 %v9217_v28, %v5194_v41  ;;  %v5227_v55 = vmul.f32 %v9307_v21, %v9307_v21 }
0x1073   :  { %v5253_v3 = vsel %vm176_vm0, %v5227_v55, 0.0  ;;  %v5226_v4 = vmul.f32 %v9311_v39, %v9311_v39 }
0x1074   :  { %5254 = vadd.xlane.f32.xlu0 %v5253_v3  ;;  %v5165_v62 = vpop.xlane.xlu0 %5164 }
0x1075   :  { %v5197_v20 = vmul.f32 0.03125, %v5165_v62  ;;  %v5250_v52 = vsel %vm176_vm0, %v5226_v4, 0.0 }
0x1076   :  { %v5162_v16 = vpop.xlane.xlu1 %5161  ;;  %5251 = vadd.xlane.f32.xlu1 %v5250_v52 }
0x1077   :  { %v9320_v40 = vsub.f32 %v9225_v6, %v5197_v20  ;;  %v5196_v28 = vmul.f32 0.03125, %v5162_v16 }
0x1079   :  { %v9323_v0 = vsub.f32 %v9229_v8, %v5196_v28  ;;  %v5229_v61 = vmul.f32 %v9320_v40, %v9320_v40 }
0x107b   :  { %v5259_v11 = vsel %vm176_vm0, %v5229_v61, 0.0  ;;  %v5228_v50 = vmul.f32 %v9323_v0, %v9323_v0 }
0x107c   :  { %5260 = vadd.xlane.f32.xlu0 %v5259_v11  ;;  %v5171_v44 = vpop.xlane.xlu0 %5170 }
0x107d   :  { %v5199_v2 = vmul.f32 0.03125, %v5171_v44  ;;  %v5256_v54 = vsel %vm176_vm0, %v5228_v50, 0.0 }
0x107e   :  { %v5168_v22 = vpop.xlane.xlu1 %5167  ;;  %5257 = vadd.xlane.f32.xlu1 %v5256_v54 }
0x107f   :  { %v9332_v6 = vsub.f32 %v9237_v15, %v5199_v2  ;;  %v5198_v8 = vmul.f32 0.03125, %v5168_v22 }
0x1081   :  { %v9335_v45 = vsub.f32 %v9241_v17, %v5198_v8  ;;  %v5231_v57 = vmul.f32 %v9332_v6, %v9332_v6  ;;  %v9379_v8 = vld [vmem:[#allocation8 + $0x2c0] ss:$0 sm:$0xff] }
0x1083   :  { %v5265_v29 = vsel %vm176_vm0, %v5231_v57, 0.0  ;;  %v5230_v42 = vmul.f32 %v9335_v45, %v9335_v45 }
0x1084   :  { %5266 = vadd.xlane.f32.xlu0 %v5265_v29  ;;  %v5177_v36 = vpop.xlane.xlu0 %5176 }
0x1085   :  { %v5201_v12 = vmul.f32 0.03125, %v5177_v36  ;;  %v5262_v15 = vsel %vm176_vm0, %v5230_v42, 0.0 }
0x1086   :  { %v5174_v24 = vpop.xlane.xlu1 %5173  ;;  %5263 = vadd.xlane.f32.xlu1 %v5262_v15 }
0x1087   :  { %v9344_v17 = vsub.f32 %v9249_v7, %v5201_v12  ;;  %v5200_v35 = vmul.f32 0.03125, %v5174_v24  ;;  %v9384_v24 = vld [vmem:[#allocation8 + $0x2c8] ss:$0 sm:$0xff] }
0x1089   :  { %v9347_v60 = vsub.f32 %v9253_v14, %v5200_v35  ;;  %v5233_v59 = vmul.f32 %v9344_v17, %v9344_v17 }
0x108b   :  { %v5271_v63 = vsel %vm176_vm0, %v5233_v59, 0.0  ;;  %v5232_v5 = vmul.f32 %v9347_v60, %v9347_v60 }
0x108c   :  { %5272 = vadd.xlane.f32.xlu0 %v5271_v63  ;;  %v5183_v7 = vpop.xlane.xlu0 %5182 }
0x108d   :  { %v5203_v51 = vmul.f32 0.03125, %v5183_v7  ;;  %v5268_v34 = vsel %vm176_vm0, %v5232_v5, 0.0 }
0x108e   :  { %v5180_v10 = vpop.xlane.xlu1 %5179  ;;  %5269 = vadd.xlane.f32.xlu1 %v5268_v34 }
0x108f   :  { %v9356_v14 = vsub.f32 %v9261_v13, %v5203_v51  ;;  %v5202_v26 = vmul.f32 0.03125, %v5180_v10 }
0x1091   :  { %v9359_v47 = vsub.f32 %v9265_v27, %v5202_v26  ;;  %v5235_v9 = vmul.f32 %v9356_v14, %v9356_v14 }
0x1093   :  { %v5277_v18 = vsel %vm176_vm0, %v5235_v9, 0.0  ;;  %v5234_v48 = vmul.f32 %v9359_v47, %v9359_v47 }
0x1094   :  { %5278 = vadd.xlane.f32.xlu0 %v5277_v18  ;;  %v5189_v43 = vpop.xlane.xlu0 %5188 }
0x1095   :  { %v5205_v46 = vmul.f32 0.03125, %v5189_v43  ;;  %v5274_v1 = vsel %vm176_vm0, %v5234_v48, 0.0 }
0x1096   :  { %5275 = vadd.xlane.f32.xlu1 %v5274_v1  ;;  %v5186_v13 = vpop.xlane.xlu1 %5185 }
0x1097   :  { %v9368_v38 = vsub.f32 %v9273_v56, %v5205_v46  ;;  %v5204_v27 = vmul.f32 0.03125, %v5186_v13 }
0x1099   :  { %v9371_v33 = vsub.f32 %v9277_v31, %v5204_v27  ;;  %v5237_v41 = vmul.f32 %v9368_v38, %v9368_v38 }
0x109b   :  { %v5283_v23 = vsel %vm176_vm0, %v5237_v41, 0.0  ;;  %v5236_v55 = vmul.f32 %v9371_v33, %v9371_v33 }
0x109c   :  { %5284 = vadd.xlane.f32.xlu0 %v5283_v23 }
0x109d   :  { %v5280_v3 = vsel %vm176_vm0, %v5236_v55, 0.0 }
0x109e   :  { %5281 = vadd.xlane.f32.xlu1 %v5280_v3 }
0x10ec   :  { %v5243_v4 = vpop.xlane.xlu0 %5242 }
0x10ed   :  { %v5287_v62 = vmul.f32 0.03125, %v5243_v4 }
0x10ee   :  { %v5240_v56 = vpop.xlane.xlu1 %5239 }
0x10ef   :  { %v5303_v20 = vadd.f32 1e-05, %v5287_v62  ;;  %v5286_v52 = vmul.f32 0.03125, %v5240_v56 }
0x10f1   :  { %7308 = vrsqrt.f32 %v5303_v20  ;;  %v5302_v31 = vadd.f32 1e-05, %v5286_v52 }
0x10f3   :  { %7310 = vrsqrt.f32 %v5302_v31 }
0x10f7   :  { %v5249_v16 = vpop.xlane.xlu0 %5248 }
0x10f8   :  { %v5289_v28 = vmul.f32 0.03125, %v5249_v16 }
0x10f9   :  { %v5246_v61 = vpop.xlane.xlu1 %5245 }
0x10fa   :  { %v5305_v11 = vadd.f32 1e-05, %v5289_v28  ;;  %v5288_v50 = vmul.f32 0.03125, %v5246_v61 }
0x10fc   :  { %7312 = vrsqrt.f32 %v5305_v11  ;;  %v5304_v44 = vadd.f32 1e-05, %v5288_v50 }
0x10fd   :  { %v5255_v2 = vpop.xlane.xlu0 %5254 }
0x10fe   :  { %v7309_v54 = vpop.eup %7308  ;;  %7314 = vrsqrt.f32 %v5304_v44  ;;  %v5291_v22 = vmul.f32 0.03125, %v5255_v2 }
0x10ff   :  { %v5335_v57 = vmul.f32 %v7309_v54, %v9284_v49  ;;  %v5252_v29 = vpop.xlane.xlu1 %5251 }
0x1100   :  { %v7311_v42 = vpop.eup %7310  ;;  %v5307_v32 = vadd.f32 1e-05, %v5291_v22  ;;  %v5290_v36 = vmul.f32 0.03125, %v5252_v29 }
0x1101   :  { %v5334_v12 = vmul.f32 %v7311_v42, %v9287_v25  ;;  %v5355_v15 = vmul.f32 %v9379_v8, %v5335_v57 }
0x1102   :  { %7316 = vrsqrt.f32 %v5307_v32  ;;  %v5306_v37 = vadd.f32 1e-05, %v5290_v36 }
0x1103   :  { %v5354_v35 = vmul.f32 %v9379_v8, %v5334_v12  ;;  %v5375_v49 = vadd.f32 %v9384_v24, %v5355_v15 }
0x1104   :  { %7318 = vrsqrt.f32 %v5306_v37 }
0x1105   :  { %v5261_v58 = vpop.xlane.xlu0 %5260  ;;  %v5374_v59 = vadd.f32 %v9384_v24, %v5354_v35 }
0x1106   :  { %v5293_v19 = vmul.f32 0.03125, %v5261_v58 }
0x1107   :  { %v5258_v63 = vpop.xlane.xlu1 %5257  ;;  %6979 = vmatprep.mubr.msk.f32.mxu1 %vm176_vm0, %v5374_v59 }
0x1108   :  { %v5309_v5 = vadd.f32 1e-05, %v5293_v19  ;;  %v5292_v25 = vmul.f32 0.03125, %v5258_v63  ;;  %6980 = vmatmul.mubr.msk.f32.vlgmr.msra.gmra.mxu1 %vm176_vm0, %v5375_v49 }
0x1109   :  { %v7313_v7 = vpop.eup %7312 }
0x110a   :  { %v5337_v51 = vmul.f32 %v7313_v7, %v9296_v53  ;;  %7320 = vrsqrt.f32 %v5309_v5  ;;  %v5308_v34 = vadd.f32 1e-05, %v5292_v25 }
0x110b   :  { %v7315_v10 = vpop.eup %7314 }
0x110c   :  { %7322 = vrsqrt.f32 %v5308_v34  ;;  %v5336_v26 = vmul.f32 %v7315_v10, %v9299_v30  ;;  %v5357_v18 = vmul.f32 %v9379_v8, %v5337_v51 }
0x110d   :  { %v5267_v9 = vpop.xlane.xlu0 %5266 }
0x110e   :  { %v5295_v48 = vmul.f32 0.03125, %v5267_v9  ;;  %v5356_v43 = vmul.f32 %v9379_v8, %v5336_v26  ;;  %v5377_v55 = vadd.f32 %v9384_v24, %v5357_v18 }
0x110f   :  { %v7317_v46 = vpop.eup %7316  ;;  %v5264_v1 = vpop.xlane.xlu1 %5263 }
0x1110   :  { %v5339_v13 = vmul.f32 %v7317_v46, %v9307_v21  ;;  %v5311_v27 = vadd.f32 1e-05, %v5295_v48  ;;  %v5294_v41 = vmul.f32 0.03125, %v5264_v1  ;;  %v5376_v53 = vadd.f32 %v9384_v24, %v5356_v43 }
0x1111   :  { %v7319_v23 = vpop.eup %7318 }
0x1112   :  { %7324 = vrsqrt.f32 %v5311_v27  ;;  %v5310_v3 = vadd.f32 1e-05, %v5294_v41  ;;  %6982 = vmatprep.mubr.msk.f32.mxu1 %vm176_vm0, %v5376_v53  ;;  %v5338_v30 = vmul.f32 %v7319_v23, %v9311_v39  ;;  %v5359_v4 = vmul.f32 %v9379_v8, %v5339_v13 }
0x1113   :  { %6983 = vmatmul.mubr.msk.f32.gmra.mxu1 %vm176_vm0, %v5377_v55 }
0x1114   :  { %7326 = vrsqrt.f32 %v5310_v3  ;;  %v5358_v21 = vmul.f32 %v9379_v8, %v5338_v30  ;;  %v5379_v16 = vadd.f32 %v9384_v24, %v5359_v4 }
0x1115   :  { %v5273_v62 = vpop.xlane.xlu0 %5272 }
0x1116   :  { %v5297_v56 = vmul.f32 0.03125, %v5273_v62  ;;  %v5378_v20 = vadd.f32 %v9384_v24, %v5358_v21 }
0x1117   :  { %v7321_v52 = vpop.eup %7320  ;;  %v5270_v31 = vpop.xlane.xlu1 %5269 }
0x1118   :  { %v5341_v28 = vmul.f32 %v7321_v52, %v9320_v40  ;;  %v5313_v61 = vadd.f32 1e-05, %v5297_v56  ;;  %v5296_v11 = vmul.f32 0.03125, %v5270_v31  ;;  %6985 = vmatprep.mubr.msk.f32.mxu1 %vm176_vm0, %v5378_v20 }
0x1119   :  { %v7323_v39 = vpop.eup %7322  ;;  %6986 = vmatmul.mubr.msk.f32.gmra.mxu1 %vm176_vm0, %v5379_v16 }
0x111a   :  { %7328 = vrsqrt.f32 %v5313_v61  ;;  %v5312_v50 = vadd.f32 1e-05, %v5296_v11  ;;  %v5340_v44 = vmul.f32 %v7323_v39, %v9323_v0  ;;  %v5361_v2 = vmul.f32 %v9379_v8, %v5341_v28 }
0x111c   :  { %7330 = vrsqrt.f32 %v5312_v50  ;;  %v5360_v54 = vmul.f32 %v9379_v8, %v5340_v44  ;;  %v5381_v32 = vadd.f32 %v9384_v24, %v5361_v2 }
0x111d   :  { %v5279_v22 = vpop.xlane.xlu0 %5278 }
0x111e   :  { %v5299_v57 = vmul.f32 0.03125, %v5279_v22  ;;  %v5380_v40 = vadd.f32 %v9384_v24, %v5360_v54 }
0x111f   :  { %v7325_v29 = vpop.eup %7324  ;;  %v5276_v42 = vpop.xlane.xlu1 %5275 }
0x1120   :  { %v5343_v36 = vmul.f32 %v7325_v29, %v9332_v6  ;;  %v5315_v12 = vadd.f32 1e-05, %v5299_v57  ;;  %v5298_v15 = vmul.f32 0.03125, %v5276_v42  ;;  %6988 = vmatprep.mubr.msk.f32.mxu1 %vm176_vm0, %v5380_v40 }
0x1121   :  { %v7327_v0 = vpop.eup %7326  ;;  %6989 = vmatmul.mubr.msk.f32.gmra.mxu1 %vm176_vm0, %v5381_v32 }
0x1122   :  { %7332 = vrsqrt.f32 %v5315_v12  ;;  %v5314_v37 = vadd.f32 1e-05, %v5298_v15  ;;  %v5342_v35 = vmul.f32 %v7327_v0, %v9335_v45  ;;  %v5363_v58 = vmul.f32 %v9379_v8, %v5343_v36 }
0x1124   :  { %7334 = vrsqrt.f32 %v5314_v37  ;;  %v5362_v59 = vmul.f32 %v9379_v8, %v5342_v35  ;;  %v5383_v25 = vadd.f32 %v9384_v24, %v5363_v58 }
0x1125   :  { %v5285_v49 = vpop.xlane.xlu0 %5284 }
0x1126   :  { %v5301_v19 = vmul.f32 0.03125, %v5285_v49  ;;  %v5382_v6 = vadd.f32 %v9384_v24, %v5362_v59 }
0x1127   :  { %v7329_v63 = vpop.eup %7328  ;;  %v5282_v5 = vpop.xlane.xlu1 %5281 }
0x1128   :  { %v5345_v7 = vmul.f32 %v7329_v63, %v9344_v17  ;;  %v5317_v51 = vadd.f32 1e-05, %v5301_v19  ;;  %v5300_v34 = vmul.f32 0.03125, %v5282_v5  ;;  %6991 = vmatprep.mubr.msk.f32.mxu1 %vm176_vm0, %v5382_v6 }
0x1129   :  { %v7331_v45 = vpop.eup %7330  ;;  %6992 = vmatmul.mubr.msk.f32.gmra.mxu1 %vm176_vm0, %v5383_v25 }
0x112a   :  { %7336 = vrsqrt.f32 %v5317_v51  ;;  %v5316_v10 = vadd.f32 1e-05, %v5300_v34  ;;  %v5344_v26 = vmul.f32 %v7331_v45, %v9347_v60  ;;  %v5365_v9 = vmul.f32 %v9379_v8, %v5345_v7 }
0x112c   :  { %7338 = vrsqrt.f32 %v5316_v10  ;;  %v5364_v18 = vmul.f32 %v9379_v8, %v5344_v26  ;;  %v5385_v17 = vadd.f32 %v9384_v24, %v5365_v9 }
0x112e   :  { %v5384_v48 = vadd.f32 %v9384_v24, %v5364_v18 }
0x112f   :  { %v7333_v43 = vpop.eup %7332 }
0x1130   :  { %v5347_v46 = vmul.f32 %v7333_v43, %v9356_v14  ;;  %6994 = vmatprep.mubr.msk.f32.mxu1 %vm176_vm0, %v5384_v48 }
0x1131   :  { %v7335_v1 = vpop.eup %7334  ;;  %6995 = vmatmul.mubr.msk.f32.gmra.mxu1 %vm176_vm0, %v5385_v17 }
0x1132   :  { %v5346_v13 = vmul.f32 %v7335_v1, %v9359_v47  ;;  %v5367_v60 = vmul.f32 %v9379_v8, %v5347_v46 }
0x1134   :  { %v5366_v27 = vmul.f32 %v9379_v8, %v5346_v13  ;;  %v5387_v23 = vadd.f32 %v9384_v24, %v5367_v60 }
0x1136   :  { %v5386_v41 = vadd.f32 %v9384_v24, %v5366_v27 }
0x1137   :  { %v7337_v53 = vpop.eup %7336 }
0x1138   :  { %v5349_v55 = vmul.f32 %v7337_v53, %v9368_v38  ;;  %6997 = vmatprep.mubr.msk.f32.mxu1 %vm176_vm0, %v5386_v41  ;;  %v6002_v38 = vld [vmem:[#allocation8 + $0x2f0] ss:$0 sm:$0xff] }
0x1139   :  { %v7339_v14 = vpop.eup %7338  ;;  %6998 = vmatmul.mubr.msk.f32.gmra.mxu1 %vm176_vm0, %v5387_v23 }
0x113a   :  { %v5348_v3 = vmul.f32 %v7339_v14, %v9371_v33  ;;  %v5369_v47 = vmul.f32 %v9379_v8, %v5349_v55 }
0x113c   :  { %v5368_v30 = vmul.f32 %v9379_v8, %v5348_v3  ;;  %v5389_v21 = vadd.f32 %v9384_v24, %v5369_v47 }
0x113e   :  { %v5388_v4 = vadd.f32 %v9384_v24, %v5368_v30 }
0x1140   :  { %7000 = vmatprep.mubr.msk.f32.mxu1 %vm176_vm0, %v5388_v4 }
0x1141   :  { %7001 = vmatmul.mubr.msk.f32.gmra.mxu1 %vm176_vm0, %v5389_v21 }
0x11c8   :  { %v6981_v62 = vpop.f32.mrf.mxu1 }
0x11c9   :  { %v5519_v56 = vadd.f32 %v6981_v62, %v6002_v38 }
0x11ca   :  { %v5513_v20 = vpop.f32.mrf.mxu1 }
0x11cb   :  { %5593 = vst.msk [vmem:[#allocation14 + $0x8] sm:$0xff] %vm176_vm0, %v5519_v56  ;;  %v5514_v52 = vadd.f32 %v6002_v38, %v5513_v20 }
0x11cd   :  { %5592 = vst.msk [vmem:[#allocation14] sm:$0xff] %vm176_vm0, %v5514_v52 }
0x11d3   :  { %v6984_v33 = vpop.f32.mrf.mxu1 }
0x11d4   :  { %v5529_v31 = vadd.f32 %v6984_v33, %v6002_v38 }
0x11d5   :  { %v5523_v8 = vpop.f32.mrf.mxu1 }
0x11d6   :  { %5595 = vst.msk [vmem:[#allocation14 + $0x18] sm:$0xff] %vm176_vm0, %v5529_v31  ;;  %v5524_v16 = vadd.f32 %v6002_v38, %v5523_v8 }
0x11d8   :  { %5594 = vst.msk [vmem:[#allocation14 + $0x10] sm:$0xff] %vm176_vm0, %v5524_v16 }
0x11d9   :  { %v6987_v24 = vpop.f32.mrf.mxu1 }
0x11da   :  { %v5539_v28 = vadd.f32 %v6987_v24, %v6002_v38 }
0x11db   :  { %v5533_v61 = vpop.f32.mrf.mxu1 }
0x11dc   :  { %5597 = vst.msk [vmem:[#allocation14 + $0x28] sm:$0xff] %vm176_vm0, %v5539_v28  ;;  %v5534_v11 = vadd.f32 %v6002_v38, %v5533_v61 }
0x11de   :  { %5596 = vst.msk [vmem:[#allocation14 + $0x20] sm:$0xff] %vm176_vm0, %v5534_v11 }
0x11e1   :  { %v6990_v39 = vpop.f32.mrf.mxu1 }
0x11e2   :  { %v5549_v50 = vadd.f32 %v6990_v39, %v6002_v38 }
0x11e3   :  { %v5543_v44 = vpop.f32.mrf.mxu1 }
0x11e4   :  { %5599 = vst.msk [vmem:[#allocation14 + $0x38] sm:$0xff] %vm176_vm0, %v5549_v50  ;;  %v5544_v2 = vadd.f32 %v6002_v38, %v5543_v44 }
0x11e6   :  { %5598 = vst.msk [vmem:[#allocation14 + $0x30] sm:$0xff] %vm176_vm0, %v5544_v2 }
0x11e9   :  { %v6993_v54 = vpop.f32.mrf.mxu1 }
0x11ea   :  { %v5559_v22 = vadd.f32 %v6993_v54, %v6002_v38 }
0x11eb   :  { %v5553_v57 = vpop.f32.mrf.mxu1 }
0x11ec   :  { %5601 = vst.msk [vmem:[#allocation14 + $0x48] sm:$0xff] %vm176_vm0, %v5559_v22  ;;  %v5554_v40 = vadd.f32 %v6002_v38, %v5553_v57 }
0x11ee   :  { %5600 = vst.msk [vmem:[#allocation14 + $0x40] sm:$0xff] %vm176_vm0, %v5554_v40 }
0x11f1   :  { %v6996_v29 = vpop.f32.mrf.mxu1 }
0x11f2   :  { %v5569_v42 = vadd.f32 %v6996_v29, %v6002_v38 }
0x11f3   :  { %v5563_v32 = vpop.f32.mrf.mxu1 }
0x11f4   :  { %5603 = vst.msk [vmem:[#allocation14 + $0x58] sm:$0xff] %vm176_vm0, %v5569_v42  ;;  %v5564_v36 = vadd.f32 %v6002_v38, %v5563_v32 }
0x11f6   :  { %5602 = vst.msk [vmem:[#allocation14 + $0x50] sm:$0xff] %vm176_vm0, %v5564_v36 }
0x11f9   :  { %v6999_v12 = vpop.f32.mrf.mxu1 }
0x11fa   :  { %v5579_v15 = vadd.f32 %v6999_v12, %v6002_v38 }
0x11fb   :  { %v5573_v0 = vpop.f32.mrf.mxu1 }
0x11fc   :  { %5605 = vst.msk [vmem:[#allocation14 + $0x68] sm:$0xff] %vm176_vm0, %v5579_v15  ;;  %v5574_v37 = vadd.f32 %v6002_v38, %v5573_v0 }
0x11fe   :  { %5604 = vst.msk [vmem:[#allocation14 + $0x60] sm:$0xff] %vm176_vm0, %v5574_v37 }
0x1201   :  { %v7002_v35 = vpop.f32.mrf.mxu1 }
0x1202   :  { %v5589_v58 = vadd.f32 %v7002_v35, %v6002_v38 }
0x1203   :  { %v5583_v59 = vpop.f32.mrf.mxu1 }
0x1204   :  { %5607 = vst.msk [vmem:[#allocation14 + $0x78] sm:$0xff] %vm176_vm0, %v5589_v58  ;;  %v5584_v49 = vadd.f32 %v6002_v38, %v5583_v59 }
0x1206   :  { %5606 = vst.msk [vmem:[#allocation14 + $0x70] sm:$0xff] %vm176_vm0, %v5584_v49 }
0x1207   :  { %7507 = shalt.err (!%p7504_p11)
}
0x1208   :  { %5619 = dma.vmem_to_hbm [thread:$0]  %s5614_s16, 2048, %s9476_s7, [#allocation4], %s7528_s29, %s7528_s29, %s7529_s30  }
0x1209   :  { %7524 = dma.done.wait [#allocation4], 2048  }
0x120a   :  { %7525 = vsyncadd [#allocation4], 4294965248 }
0x120b   :  { %5623 = vsyncpa [#allocation3], 1 }
0x120c   :  { %5624 = vsyncpa [#allocation6], 1 }
0x120d   :  { %5625 = vsyncpa [#allocation9], 1 }
0x120e   :  { %5626 = vsyncpa [#allocation12], 1 }
0x120f   :  { %5627 = vsyncpa [#allocation4], 1 }

</bundles_post_ra>
